<compile_context>
chip_gen: v7x
topology: tpu7x:2x2x1
jax: 0.10.0
libtpu: 0.0.40
codegen_flags: <defaults>
</compile_context>

<pallas_src>
import functools
import math

import numpy as np
import jax
import jax.numpy as jnp
from jax.experimental import pallas as pl
from jax.experimental.pallas import tpu as pltpu


def _tree_sum(vals):
    """Pairwise (balanced) sum of a list of arrays."""
    vals = list(vals)
    while len(vals) > 1:
        nxt = []
        for i in range(0, len(vals) - 1, 2):
            nxt.append(vals[i] + vals[i + 1])
        if len(vals) % 2:
            nxt.append(vals[-1])
        vals = nxt
    return vals[0]


# ----------------------------------------------------------------------------
# Fused forward kernel (one grid step == one batch element)
# ----------------------------------------------------------------------------
def _fused_kernel(p1c_ref, vec_ref,
                  w1bd_ref, w2f_ref, w3f_ref, wpc_ref, wpf_ref,
                  wz_ref, wfczbd_ref, bias_ref,
                  out_ref, out3f_ref,
                  *, n_agent, latent_dim, dim_action):
    A, L, D = n_agent, latent_dim, dim_action
    AL, AD = A * L, A * D
    NH = 2 * L + A                       # [l_logvar | l_mu | V]
    NALL = NH + AD                       # + per-agent FC phi-part
    FEA = 183 * A
    f32, bf16 = jnp.float32, jnp.bfloat16
    dot = functools.partial(jnp.dot, preferred_element_type=f32)

    # ---- Conv2d(3,32,8,4) + bias + ReLU + MaxPool2d(2) -----------------------
    # p1c lanes are (pooling-corner, patch)-major; w1bd is the conv1 matrix
    # block-diagonalised over the 4 corners, so one GEMM gives all 4 corner
    # outputs side by side in lanes and the 2x2 maxpool is a lane-block max.
    y = dot(p1c_ref[...], w1bd_ref[...])                     # [100, 128] f32
    ymax = jnp.maximum(jnp.maximum(y[:, 0:32], y[:, 32:64]),
                       jnp.maximum(y[:, 64:96], y[:, 96:128]))
    ypool = jnp.maximum(ymax + bias_ref[0:1, 0:32], 0.0)     # [100, 32] (10x10)
    yb = ypool.astype(bf16)

    # ---- Conv2d(32,64,4,2) + ReLU --------------------------------------------
    # One-hot im2col gather matrix generated in-kernel (iota+compare), gather is
    # a single MXU matmul; per-kernel-offset dots are tree-summed.
    ri = jax.lax.broadcasted_iota(jnp.int32, (256, 100), 0)
    ci = jax.lax.broadcasted_iota(jnp.int32, (256, 100), 1)
    ko, q = ri >> 4, ri & 15
    ky, kx, qy, qx = ko >> 2, ko & 3, q >> 2, q & 3
    s2t = (ci == 10 * (2 * qy + ky) + 2 * qx + kx).astype(bf16)   # [256, 100]
    g2 = dot(s2t, yb).astype(bf16)                           # [(ko,q)=256, 32]
    acc2 = _tree_sum([dot(g2[16 * k:16 * k + 16, :], w2f_ref[32 * k:32 * k + 32, :])
                      for k in range(16)])                   # [16, 64]
    out2 = jnp.maximum(acc2 + bias_ref[1:2, 0:64], 0.0).astype(bf16)

    # ---- Conv2d(64,128,3,1) + ReLU -------------------------------------------
    ri = jax.lax.broadcasted_iota(jnp.int32, (36, 16), 0)
    ci = jax.lax.broadcasted_iota(jnp.int32, (36, 16), 1)
    ko, rr = ri >> 2, ri & 3
    ky = (ko * 11) >> 5                                      # ko // 3 for 0..8
    kx = ko - 3 * ky
    ry, rx = rr >> 1, rr & 1
    s3t = (ci == 4 * (ry + ky) + rx + kx).astype(bf16)       # [36, 16]
    g3 = dot(s3t, out2).astype(bf16)                         # [(ko,r)=36, 64]
    acc3 = _tree_sum([dot(g3[4 * k:4 * k + 4, :], w3f_ref[64 * k:64 * k + 64, :])
                      for k in range(9)])                    # [4, 128]
    out3 = jnp.maximum(acc3 + bias_ref[2:3, 0:128], 0.0)     # 2x2 spatial, 128ch

    # ---- flatten conv3 output into one lane-dense [1,512] vector --------------
    # (lane = 128*r + c; the head weight rows were permuted to match, so this is
    # equivalent to the module's NCHW flatten.)
    for r in range(4):
        out3f_ref[0:1, 128 * r:128 * (r + 1)] = out3[r:r + 1, :]
    o3flat = out3f_ref[...].astype(bf16)                     # [1, 512]

    vec = vec_ref[...]                                       # [1, >=FEA+L+AL] f32
    fea = vec[:, 0:FEA].astype(bf16)
    eps1 = vec[:, FEA:FEA + L]
    eps2 = vec[:, FEA + L:FEA + L + AL]

    # ---- merged phi_s heads: h = [ l_logvar | l_mu | V | per-agent FC phi ] ----
    h = (dot(o3flat, wpc_ref[...]) + dot(fea, wpf_ref[...])
         + bias_ref[3:4, 0:NALL])                            # [1, NALL]
    l_logvar = h[:, 0:L]
    l_mu = h[:, L:2 * L]
    fc_phi = h[:, NH:NALL]

    # ---- reparameterisation 1, merged z_mu|z_logvar, reparameterisation 2 -----
    lam = eps1 * jnp.exp(0.5 * l_logvar) + l_mu              # [1, L]
    zh = dot(lam.astype(bf16), wz_ref[...]) + bias_ref[4:5, 0:2 * AL]   # [1, 2AL]
    mu_flat = zh[:, 0:AL]
    lv_flat = zh[:, AL:2 * AL]
    z_flat = mu_flat + jnp.exp(0.5 * lv_flat) * eps2         # [1, AL] agent-major

    # ---- per-agent action heads: z-part as one block-diagonal matmul ----------
    prob_flat = dot(z_flat.astype(bf16), wfczbd_ref[...]) + fc_phi      # [1, AD]

    # ---- single lane-dense [8,128] output slab --------------------------------
    out_ref[...] = jnp.zeros((8, 128), f32)
    out_ref[0:1, 0:NH] = h[:, 0:NH]          # l_logvar | l_mu | V
    out_ref[1:2, 0:2 * AL] = zh              # mu_flat | logvar_flat
    out_ref[2:3, 0:AD] = prob_flat           # prob (agent-major)


# ----------------------------------------------------------------------------
# Host-side glue: conv1 im2col in pooling-corner block layout (fused in jit).
# ----------------------------------------------------------------------------
def _conv1_patches(obs):
    # obs [B,3,84,84] -> [B, 100(pooled spatial), 768 = 4 corners x 192 patch]
    B = obs.shape[0]
    cols = []
    for i in range(8):
        for j in range(8):
            cols.append(obs[:, :, i:i + 77:4, j:j + 77:4])   # [B,3,20,20]
    p = jnp.stack(cols, axis=2)                              # [B,3,64,20,20]
    p = p.reshape(B, 192, 20, 20)                            # patch = 64c+8i+j
    p = p.reshape(B, 192, 10, 2, 10, 2)                      # [B,patch,py,cy,px,cx]
    p = p.transpose(0, 2, 4, 3, 5, 1)                        # [B,py,px,cy,cx,patch]
    return p.reshape(B, 100, 768)                            # lane = 192*(2cy+cx)+patch


def neural_coord_forward(fea, obs, eps1, eps2, params, *, n_agent, latent_dim,
                         dim_action):
    """Batched forward: each of the B items is one module forward (batch=1)."""
    A, L, D = n_agent, latent_dim, dim_action
    B = obs.shape[0]
    FEA = 183 * A
    NALL = 2 * L + A + A * D
    assert NALL <= 128 and 2 * A * L <= 128 and A * D <= 128

    SV = FEA + L + A * L
    SVP = ((SV + 127) // 128) * 128

    p1c = _conv1_patches(obs).astype(jnp.bfloat16)           # [B,100,768]
    vec = jnp.concatenate([fea, eps1, eps2.reshape(B, A * L)], axis=1)
    vec = jnp.pad(vec, ((0, 0), (0, SVP - SV)))[:, None, :]  # [B,1,SVP]

    def wspec(shape):
        return pl.BlockSpec(shape, lambda b, _s=shape: (0,) * len(_s))

    kernel = functools.partial(_fused_kernel, n_agent=A, latent_dim=L,
                               dim_action=D)
    slab = pl.pallas_call(
        kernel,
        grid=(B,),
        out_shape=jax.ShapeDtypeStruct((B, 8, 128), jnp.float32),
        in_specs=[
            pl.BlockSpec((None, 100, 768), lambda b: (b, 0, 0)),   # conv1 patches
            pl.BlockSpec((None, 1, SVP), lambda b: (b, 0, 0)),     # fea|eps1|eps2
            wspec((768, 128)),          # w1 block-diag over pooling corners
            wspec((512, 64)),           # conv2 weights, (ko,ic)-flat
            wspec((576, 128)),          # conv3 weights, (ko,ic)-flat
            wspec((512, NALL)),         # merged head, CNN half
            wspec((FEA, NALL)),         # merged head, fea half
            wspec((L, 2 * A * L)),      # merged z_mu|z_logvar
            wspec((A * L, A * D)),      # block-diag per-agent FC z-part
            wspec((8, 128)),            # bias slab
        ],
        out_specs=pl.BlockSpec((None, 8, 128), lambda b: (b, 0, 0)),
        scratch_shapes=[pltpu.VMEM((1, 512), jnp.float32)],
        compiler_params=pltpu.CompilerParams(
            dimension_semantics=("parallel",)),
    )(p1c, vec, params["w1bd"], params["w2f"], params["w3f"], params["wpc"],
      params["wpf"], params["wz"], params["wfczbd"], params["bias"])

    h = slab[:, 0, :]
    l_logvar = h[:, 0:L]
    l_mu = h[:, L:2 * L]
    V = h[:, 2 * L:2 * L + A]
    zrow = slab[:, 1, :]
    mu = zrow[:, 0:A * L].reshape(B, A, L)
    logvar = zrow[:, A * L:2 * A * L].reshape(B, A, L)
    prob = slab[:, 2, 0:A * D].reshape(B, A, D)
    return V, prob, l_mu, l_logvar, mu, logvar


# ----------------------------------------------------------------------------
# Parameters: raw PyTorch-shaped tensors + preprocessing into kernel form.
# ----------------------------------------------------------------------------
def _uniform(key, shape, fan_in):
    k = 1.0 / math.sqrt(fan_in)
    return jax.random.uniform(key, shape, jnp.float32, -k, k)


def make_params(key, *, n_agent, latent_dim, dim_action):
    A, L, D = n_agent, latent_dim, dim_action
    F = 512 + 183 * A
    ks = jax.random.split(key, 18)
    return {
        "wc1": _uniform(ks[0], (32, 3, 8, 8), 192), "bc1": _uniform(ks[1], (32,), 192),
        "wc2": _uniform(ks[2], (64, 32, 4, 4), 512), "bc2": _uniform(ks[3], (64,), 512),
        "wc3": _uniform(ks[4], (128, 64, 3, 3), 576), "bc3": _uniform(ks[5], (128,), 576),
        "wv": _uniform(ks[6], (F, A), F), "bv": _uniform(ks[7], (1, A), F),
        "wlv": _uniform(ks[8], (F, L), F), "blv": _uniform(ks[9], (1, L), F),
        "wmu": _uniform(ks[10], (F, L), F), "bmu": _uniform(ks[11], (1, L), F),
        "wzmu": _uniform(ks[12], (L, A * L), L), "bzmu": _uniform(ks[13], (1, A * L), L),
        "wzlv": _uniform(ks[14], (L, A * L), L), "bzlv": _uniform(ks[15], (1, A * L), L),
        "wfc": _uniform(ks[16], (A, L + F, D), L + F),
        "bfc": _uniform(ks[17], (A, D), L + F),
    }


def preprocess_params(raw, *, n_agent, latent_dim, dim_action):
    A, L, D = n_agent, latent_dim, dim_action
    F = 512 + 183 * A
    NALL = 2 * L + A + A * D
    bf = jnp.bfloat16
    p = {}

    # conv1 [32,3,8,8] -> matmul form [192,32] -> block-diag over 4 pooling corners
    w1 = raw["wc1"].reshape(32, 192).T                                  # [192, 32]
    p["w1bd"] = jnp.kron(jnp.eye(4, dtype=jnp.float32), w1).astype(bf)  # [768, 128]
    # conv2 / conv3 flattened to 2-D [(kernel-offset, in-ch), out-ch]
    p["w2f"] = raw["wc2"].transpose(2, 3, 1, 0).reshape(512, 64).astype(bf)
    p["w3f"] = raw["wc3"].transpose(2, 3, 1, 0).reshape(576, 128).astype(bf)

    # merged phi_s heads: [ logvar | mu | FCV | per-agent FC phi-part ]
    wfc = raw["wfc"]                                       # [A, L+F, D]
    wfc_phi = wfc[:, L:, :]                                # [A, F, D]
    wphi = jnp.concatenate(
        [raw["wlv"], raw["wmu"], raw["wv"],
         wfc_phi.transpose(1, 0, 2).reshape(F, A * D)], axis=1)          # [F, NALL]
    bphi = jnp.concatenate(
        [raw["blv"], raw["bmu"], raw["bv"], raw["bfc"].reshape(1, A * D)], axis=1)
    # CNN half: permute NCHW-flat rows (4*c + r) to the kernel's (128*r + c)
    p["wpc"] = (wphi[:512].reshape(128, 4, NALL).transpose(1, 0, 2)
                .reshape(512, NALL).astype(bf))
    p["wpf"] = wphi[512:].astype(bf)                                    # [183A, NALL]

    # merged z_mu | z_logvar, and block-diagonal per-agent FC z-part
    p["wz"] = jnp.concatenate([raw["wzmu"], raw["wzlv"]], axis=1).astype(bf)
    bz = jnp.concatenate([raw["bzmu"], raw["bzlv"]], axis=1)
    wfcz = wfc[:, :L, :]
    bd = jnp.zeros((A * L, A * D), jnp.float32)
    for a in range(A):
        bd = bd.at[a * L:(a + 1) * L, a * D:(a + 1) * D].set(wfcz[a])
    p["wfczbd"] = bd.astype(bf)

    # all biases packed into one lane-padded [8,128] f32 slab (kept f32)
    bias = jnp.zeros((8, 128), jnp.float32)
    bias = bias.at[0, :32].set(raw["bc1"])
    bias = bias.at[1, :64].set(raw["bc2"])
    bias = bias.at[2, :128].set(raw["bc3"])
    bias = bias.at[3, :NALL].set(bphi[0])
    bias = bias.at[4, :2 * A * L].set(bz[0])
    p["bias"] = bias
    return p


# ----------------------------------------------------------------------------
# Pure-JAX reference (mirrors the PyTorch module, batch=1) for correctness.
# ----------------------------------------------------------------------------
def neural_coord_reference(fea, obs, eps1, eps2, raw, *, n_agent, latent_dim,
                           dim_action):
    hp = jax.lax.Precision.HIGHEST
    dn = ("NCHW", "OIHW", "NCHW")
    y = jax.lax.conv_general_dilated(obs, raw["wc1"], (4, 4), "VALID",
                                     dimension_numbers=dn, precision=hp)
    y = jnp.maximum(y + raw["bc1"][None, :, None, None], 0.0)
    y = y.reshape(1, 32, 10, 2, 10, 2).max(axis=(3, 5))
    y = jax.lax.conv_general_dilated(y, raw["wc2"], (2, 2), "VALID",
                                     dimension_numbers=dn, precision=hp)
    y = jnp.maximum(y + raw["bc2"][None, :, None, None], 0.0)
    y = jax.lax.conv_general_dilated(y, raw["wc3"], (1, 1), "VALID",
                                     dimension_numbers=dn, precision=hp)
    y = jnp.maximum(y + raw["bc3"][None, :, None, None], 0.0)
    phi = jnp.concatenate([y.reshape(1, -1), fea], axis=1)
    V = jnp.dot(phi, raw["wv"], precision=hp) + raw["bv"]
    l_logvar = jnp.dot(phi, raw["wlv"], precision=hp) + raw["blv"]
    l_mu = jnp.dot(phi, raw["wmu"], precision=hp) + raw["bmu"]
    lam = eps1 * jnp.exp(0.5 * l_logvar) + l_mu
    mu = (jnp.dot(lam, raw["wzmu"], precision=hp) + raw["bzmu"]).reshape(-1, latent_dim)
    logvar = (jnp.dot(lam, raw["wzlv"], precision=hp) + raw["bzlv"]).reshape(-1, latent_dim)
    z = mu + jnp.exp(0.5 * logvar) * eps2
    probs = []
    for a in range(n_agent):
        za = jnp.concatenate([z[a:a + 1], phi], axis=1)
        probs.append(jnp.dot(za, raw["wfc"][a], precision=hp) + raw["bfc"][a:a + 1])
    return V, jnp.concatenate(probs, axis=0), l_mu, l_logvar, mu, logvar


if __name__ == "__main__":
    # Module hardcodes the 512-dim flattened CNN feature -> obs is [*, 3, 84, 84].
    n_agent, latent_dim, dim_action = 2, 16, 4
    B = 4                                   # batched grid: 4 independent forwards

    key = jax.random.PRNGKey(0)
    k_par, k_obs, k_fea, k_e1, k_e2 = jax.random.split(key, 5)

    raw = make_params(k_par, n_agent=n_agent, latent_dim=latent_dim,
                      dim_action=dim_action)
    params = preprocess_params(raw, n_agent=n_agent, latent_dim=latent_dim,
                               dim_action=dim_action)

    obs = jax.random.normal(k_obs, (B, 3, 84, 84), jnp.float32)   # NCHW
    fea = jax.random.normal(k_fea, (B, 183 * n_agent), jnp.float32)
    eps1 = jax.random.normal(k_e1, (B, latent_dim), jnp.float32)
    eps2 = jax.random.normal(k_e2, (B, n_agent, latent_dim), jnp.float32)

    fwd = jax.jit(functools.partial(neural_coord_forward, n_agent=n_agent,
                                    latent_dim=latent_dim, dim_action=dim_action))
    outs = fwd(fea, obs, eps1, eps2, params)
    jax.block_until_ready(outs)
    V, prob, l_mu, l_logvar, mu, logvar = outs

    assert V.shape == (B, n_agent)
    assert prob.shape == (B, n_agent, dim_action)
    assert l_mu.shape == (B, latent_dim) and l_logvar.shape == (B, latent_dim)
    assert mu.shape == (B, n_agent, latent_dim)
    assert logvar.shape == (B, n_agent, latent_dim)

    # Numerical check against the f32 (HIGHEST precision) reference.  The kernel
    # uses bf16 matmul operands with f32 accumulation -> ~1-3% error budget,
    # covered by the 5e-2 tolerance.
    for b in range(B):
        ref = neural_coord_reference(fea[b:b + 1], obs[b:b + 1], eps1[b:b + 1],
                                     eps2[b], raw, n_agent=n_agent,
                                     latent_dim=latent_dim, dim_action=dim_action)
        got = (V[b:b + 1], prob[b], l_mu[b:b + 1], l_logvar[b:b + 1], mu[b],
               logvar[b])
        for g, w in zip(got, ref):
            np.testing.assert_allclose(np.asarray(g), np.asarray(w),
                                       rtol=5e-2, atol=5e-2)
    print("KERNEL_OK")
</pallas_src>

<mosaic_0001>
module attributes {stable_mosaic.version = 11 : i64} {
  func.func @_fused_kernel(%arg0: i32, %arg1: memref<1x100x768xbf16, #tpu.memory_space<vmem>>, %arg2: memref<1x1x512xf32, #tpu.memory_space<vmem>>, %arg3: memref<768x128xbf16, #tpu.memory_space<vmem>>, %arg4: memref<512x64xbf16, #tpu.memory_space<vmem>>, %arg5: memref<576x128xbf16, #tpu.memory_space<vmem>>, %arg6: memref<512x42xbf16, #tpu.memory_space<vmem>>, %arg7: memref<366x42xbf16, #tpu.memory_space<vmem>>, %arg8: memref<16x64xbf16, #tpu.memory_space<vmem>>, %arg9: memref<32x8xbf16, #tpu.memory_space<vmem>>, %arg10: memref<8x128xf32, #tpu.memory_space<vmem>>, %arg11: memref<1x8x128xf32, #tpu.memory_space<vmem>>, %arg12: memref<1x512xf32, #tpu.memory_space<vmem>>) attributes {dimension_semantics = [#tpu.dimension_semantics<parallel>], iteration_bounds = array<i64: 4>, scalar_prefetch = 0 : i64, scratch_operands = 1 : i64, tpu.core_type = #tpu.core_type<tc>, window_params = [{transform_indices = @transform_0, window_bounds = array<i64: 1, 100, 768>}, {transform_indices = @transform_1, window_bounds = array<i64: 1, 1, 512>}, {pipeline_mode = #tpu.pipeline_mode<synchronous>, transform_indices = @transform_2, window_bounds = array<i64: 768, 128>}, {pipeline_mode = #tpu.pipeline_mode<synchronous>, transform_indices = @transform_3, window_bounds = array<i64: 512, 64>}, {pipeline_mode = #tpu.pipeline_mode<synchronous>, transform_indices = @transform_4, window_bounds = array<i64: 576, 128>}, {pipeline_mode = #tpu.pipeline_mode<synchronous>, transform_indices = @transform_5, window_bounds = array<i64: 512, 42>}, {pipeline_mode = #tpu.pipeline_mode<synchronous>, transform_indices = @transform_6, window_bounds = array<i64: 366, 42>}, {pipeline_mode = #tpu.pipeline_mode<synchronous>, transform_indices = @transform_7, window_bounds = array<i64: 16, 64>}, {pipeline_mode = #tpu.pipeline_mode<synchronous>, transform_indices = @transform_8, window_bounds = array<i64: 32, 8>}, {pipeline_mode = #tpu.pipeline_mode<synchronous>, transform_indices = @transform_9, window_bounds = array<i64: 8, 128>}, {transform_indices = @transform_10, window_bounds = array<i64: 1, 8, 128>}]} {
    %c0 = arith.constant 0 : index
    %c0_0 = arith.constant 0 : index
    %c0_1 = arith.constant 0 : index
    %0 = vector.load %arg1[%c0, %c0_0, %c0_1] : memref<1x100x768xbf16, #tpu.memory_space<vmem>>, vector<1x100x768xbf16>
    %1 = vector.shape_cast %0 : vector<1x100x768xbf16> to vector<100x768xbf16>
    %c0_2 = arith.constant 0 : index
    %c0_3 = arith.constant 0 : index
    %2 = vector.load %arg3[%c0_2, %c0_3] : memref<768x128xbf16, #tpu.memory_space<vmem>>, vector<768x128xbf16>
    %cst = arith.constant dense<0.000000e+00> : vector<100x128xf32>
    %3 = tpu.matmul %1, %2, %cst {dimension_numbers = #tpu.dot_dimension_numbers<[1], [0], [0], [1], [0, 0, 1, 1], [], []>} : vector<100x768xbf16>, vector<768x128xbf16>, vector<100x128xf32> -> vector<100x128xf32>
    %4 = vector.extract_strided_slice %3 {offsets = [0, 0], sizes = [100, 32], strides = [1, 1]} : vector<100x128xf32> to vector<100x32xf32>
    %5 = vector.extract_strided_slice %3 {offsets = [0, 32], sizes = [100, 32], strides = [1, 1]} : vector<100x128xf32> to vector<100x32xf32>
    %6 = arith.maximumf %4, %5 : vector<100x32xf32>
    %7 = vector.extract_strided_slice %3 {offsets = [0, 64], sizes = [100, 32], strides = [1, 1]} : vector<100x128xf32> to vector<100x32xf32>
    %8 = vector.extract_strided_slice %3 {offsets = [0, 96], sizes = [100, 32], strides = [1, 1]} : vector<100x128xf32> to vector<100x32xf32>
    %9 = arith.maximumf %7, %8 : vector<100x32xf32>
    %10 = arith.maximumf %6, %9 : vector<100x32xf32>
    %c0_4 = arith.constant 0 : index
    %c0_5 = arith.constant 0 : index
    %11 = vector.load %arg10[%c0_4, %c0_5] : memref<8x128xf32, #tpu.memory_space<vmem>>, vector<1x32xf32>
    %12 = vector.broadcast %11 : vector<1x32xf32> to vector<100x32xf32>
    %13 = arith.addf %10, %12 : vector<100x32xf32>
    %cst_6 = arith.constant 0.000000e+00 : f32
    %14 = vector.broadcast %cst_6 : f32 to vector<100x32xf32>
    %15 = arith.maximumf %13, %14 : vector<100x32xf32>
    %16 = arith.truncf %15 : vector<100x32xf32> to vector<100x32xbf16>
    %17 = tpu.iota {dimensions = array<i32: 0>} : vector<256x100xi32>
    %18 = tpu.iota {dimensions = array<i32: 1>} : vector<256x100xi32>
    %c4_i32 = arith.constant 4 : i32
    %19 = vector.broadcast %c4_i32 : i32 to vector<256x100xi32>
    %20 = arith.shrsi %17, %19 : vector<256x100xi32>
    %c15_i32 = arith.constant 15 : i32
    %21 = vector.broadcast %c15_i32 : i32 to vector<256x100xi32>
    %22 = arith.andi %17, %21 : vector<256x100xi32>
    %c2_i32 = arith.constant 2 : i32
    %23 = vector.broadcast %c2_i32 : i32 to vector<256x100xi32>
    %24 = arith.shrsi %20, %23 : vector<256x100xi32>
    %c3_i32 = arith.constant 3 : i32
    %25 = vector.broadcast %c3_i32 : i32 to vector<256x100xi32>
    %26 = arith.andi %20, %25 : vector<256x100xi32>
    %c2_i32_7 = arith.constant 2 : i32
    %27 = vector.broadcast %c2_i32_7 : i32 to vector<256x100xi32>
    %28 = arith.shrsi %22, %27 : vector<256x100xi32>
    %c3_i32_8 = arith.constant 3 : i32
    %29 = vector.broadcast %c3_i32_8 : i32 to vector<256x100xi32>
    %30 = arith.andi %22, %29 : vector<256x100xi32>
    %c2_i32_9 = arith.constant 2 : i32
    %31 = vector.broadcast %c2_i32_9 : i32 to vector<256x100xi32>
    %32 = arith.muli %31, %28 : vector<256x100xi32>
    %33 = arith.addi %32, %24 : vector<256x100xi32>
    %c10_i32 = arith.constant 10 : i32
    %34 = vector.broadcast %c10_i32 : i32 to vector<256x100xi32>
    %35 = arith.muli %34, %33 : vector<256x100xi32>
    %c2_i32_10 = arith.constant 2 : i32
    %36 = vector.broadcast %c2_i32_10 : i32 to vector<256x100xi32>
    %37 = arith.muli %36, %30 : vector<256x100xi32>
    %38 = arith.addi %35, %37 : vector<256x100xi32>
    %39 = arith.addi %38, %26 : vector<256x100xi32>
    %40 = arith.cmpi eq, %18, %39 : vector<256x100xi32>
    %41 = arith.extui %40 : vector<256x100xi1> to vector<256x100xi32>
    %42 = arith.sitofp %41 : vector<256x100xi32> to vector<256x100xf32>
    %43 = arith.truncf %42 : vector<256x100xf32> to vector<256x100xbf16>
    %cst_11 = arith.constant dense<0.000000e+00> : vector<256x32xf32>
    %44 = tpu.matmul %43, %16, %cst_11 {dimension_numbers = #tpu.dot_dimension_numbers<[1], [0], [0], [1], [0, 0, 1, 1], [], []>} : vector<256x100xbf16>, vector<100x32xbf16>, vector<256x32xf32> -> vector<256x32xf32>
    %45 = arith.truncf %44 : vector<256x32xf32> to vector<256x32xbf16>
    %46 = vector.extract_strided_slice %45 {offsets = [0, 0], sizes = [16, 32], strides = [1, 1]} : vector<256x32xbf16> to vector<16x32xbf16>
    %c0_12 = arith.constant 0 : index
    %c0_13 = arith.constant 0 : index
    %47 = vector.load %arg4[%c0_12, %c0_13] : memref<512x64xbf16, #tpu.memory_space<vmem>>, vector<32x64xbf16>
    %cst_14 = arith.constant dense<0.000000e+00> : vector<16x64xf32>
    %48 = tpu.matmul %46, %47, %cst_14 {dimension_numbers = #tpu.dot_dimension_numbers<[1], [0], [0], [1], [0, 0, 1, 1], [], []>} : vector<16x32xbf16>, vector<32x64xbf16>, vector<16x64xf32> -> vector<16x64xf32>
    %49 = vector.extract_strided_slice %45 {offsets = [16, 0], sizes = [16, 32], strides = [1, 1]} : vector<256x32xbf16> to vector<16x32xbf16>
    %c32 = arith.constant 32 : index
    %c0_15 = arith.constant 0 : index
    %50 = vector.load %arg4[%c32, %c0_15] : memref<512x64xbf16, #tpu.memory_space<vmem>>, vector<32x64xbf16>
    %cst_16 = arith.constant dense<0.000000e+00> : vector<16x64xf32>
    %51 = tpu.matmul %49, %50, %cst_16 {dimension_numbers = #tpu.dot_dimension_numbers<[1], [0], [0], [1], [0, 0, 1, 1], [], []>} : vector<16x32xbf16>, vector<32x64xbf16>, vector<16x64xf32> -> vector<16x64xf32>
    %52 = vector.extract_strided_slice %45 {offsets = [32, 0], sizes = [16, 32], strides = [1, 1]} : vector<256x32xbf16> to vector<16x32xbf16>
    %c64 = arith.constant 64 : index
    %c0_17 = arith.constant 0 : index
    %53 = vector.load %arg4[%c64, %c0_17] : memref<512x64xbf16, #tpu.memory_space<vmem>>, vector<32x64xbf16>
    %cst_18 = arith.constant dense<0.000000e+00> : vector<16x64xf32>
    %54 = tpu.matmul %52, %53, %cst_18 {dimension_numbers = #tpu.dot_dimension_numbers<[1], [0], [0], [1], [0, 0, 1, 1], [], []>} : vector<16x32xbf16>, vector<32x64xbf16>, vector<16x64xf32> -> vector<16x64xf32>
    %55 = vector.extract_strided_slice %45 {offsets = [48, 0], sizes = [16, 32], strides = [1, 1]} : vector<256x32xbf16> to vector<16x32xbf16>
    %c96 = arith.constant 96 : index
    %c0_19 = arith.constant 0 : index
    %56 = vector.load %arg4[%c96, %c0_19] : memref<512x64xbf16, #tpu.memory_space<vmem>>, vector<32x64xbf16>
    %cst_20 = arith.constant dense<0.000000e+00> : vector<16x64xf32>
    %57 = tpu.matmul %55, %56, %cst_20 {dimension_numbers = #tpu.dot_dimension_numbers<[1], [0], [0], [1], [0, 0, 1, 1], [], []>} : vector<16x32xbf16>, vector<32x64xbf16>, vector<16x64xf32> -> vector<16x64xf32>
    %58 = vector.extract_strided_slice %45 {offsets = [64, 0], sizes = [16, 32], strides = [1, 1]} : vector<256x32xbf16> to vector<16x32xbf16>
    %c128 = arith.constant 128 : index
    %c0_21 = arith.constant 0 : index
    %59 = vector.load %arg4[%c128, %c0_21] : memref<512x64xbf16, #tpu.memory_space<vmem>>, vector<32x64xbf16>
    %cst_22 = arith.constant dense<0.000000e+00> : vector<16x64xf32>
    %60 = tpu.matmul %58, %59, %cst_22 {dimension_numbers = #tpu.dot_dimension_numbers<[1], [0], [0], [1], [0, 0, 1, 1], [], []>} : vector<16x32xbf16>, vector<32x64xbf16>, vector<16x64xf32> -> vector<16x64xf32>
    %61 = vector.extract_strided_slice %45 {offsets = [80, 0], sizes = [16, 32], strides = [1, 1]} : vector<256x32xbf16> to vector<16x32xbf16>
    %c160 = arith.constant 160 : index
    %c0_23 = arith.constant 0 : index
    %62 = vector.load %arg4[%c160, %c0_23] : memref<512x64xbf16, #tpu.memory_space<vmem>>, vector<32x64xbf16>
    %cst_24 = arith.constant dense<0.000000e+00> : vector<16x64xf32>
    %63 = tpu.matmul %61, %62, %cst_24 {dimension_numbers = #tpu.dot_dimension_numbers<[1], [0], [0], [1], [0, 0, 1, 1], [], []>} : vector<16x32xbf16>, vector<32x64xbf16>, vector<16x64xf32> -> vector<16x64xf32>
    %64 = vector.extract_strided_slice %45 {offsets = [96, 0], sizes = [16, 32], strides = [1, 1]} : vector<256x32xbf16> to vector<16x32xbf16>
    %c192 = arith.constant 192 : index
    %c0_25 = arith.constant 0 : index
    %65 = vector.load %arg4[%c192, %c0_25] : memref<512x64xbf16, #tpu.memory_space<vmem>>, vector<32x64xbf16>
    %cst_26 = arith.constant dense<0.000000e+00> : vector<16x64xf32>
    %66 = tpu.matmul %64, %65, %cst_26 {dimension_numbers = #tpu.dot_dimension_numbers<[1], [0], [0], [1], [0, 0, 1, 1], [], []>} : vector<16x32xbf16>, vector<32x64xbf16>, vector<16x64xf32> -> vector<16x64xf32>
    %67 = vector.extract_strided_slice %45 {offsets = [112, 0], sizes = [16, 32], strides = [1, 1]} : vector<256x32xbf16> to vector<16x32xbf16>
    %c224 = arith.constant 224 : index
    %c0_27 = arith.constant 0 : index
    %68 = vector.load %arg4[%c224, %c0_27] : memref<512x64xbf16, #tpu.memory_space<vmem>>, vector<32x64xbf16>
    %cst_28 = arith.constant dense<0.000000e+00> : vector<16x64xf32>
    %69 = tpu.matmul %67, %68, %cst_28 {dimension_numbers = #tpu.dot_dimension_numbers<[1], [0], [0], [1], [0, 0, 1, 1], [], []>} : vector<16x32xbf16>, vector<32x64xbf16>, vector<16x64xf32> -> vector<16x64xf32>
    %70 = vector.extract_strided_slice %45 {offsets = [128, 0], sizes = [16, 32], strides = [1, 1]} : vector<256x32xbf16> to vector<16x32xbf16>
    %c256 = arith.constant 256 : index
    %c0_29 = arith.constant 0 : index
    %71 = vector.load %arg4[%c256, %c0_29] : memref<512x64xbf16, #tpu.memory_space<vmem>>, vector<32x64xbf16>
    %cst_30 = arith.constant dense<0.000000e+00> : vector<16x64xf32>
    %72 = tpu.matmul %70, %71, %cst_30 {dimension_numbers = #tpu.dot_dimension_numbers<[1], [0], [0], [1], [0, 0, 1, 1], [], []>} : vector<16x32xbf16>, vector<32x64xbf16>, vector<16x64xf32> -> vector<16x64xf32>
    %73 = vector.extract_strided_slice %45 {offsets = [144, 0], sizes = [16, 32], strides = [1, 1]} : vector<256x32xbf16> to vector<16x32xbf16>
    %c288 = arith.constant 288 : index
    %c0_31 = arith.constant 0 : index
    %74 = vector.load %arg4[%c288, %c0_31] : memref<512x64xbf16, #tpu.memory_space<vmem>>, vector<32x64xbf16>
    %cst_32 = arith.constant dense<0.000000e+00> : vector<16x64xf32>
    %75 = tpu.matmul %73, %74, %cst_32 {dimension_numbers = #tpu.dot_dimension_numbers<[1], [0], [0], [1], [0, 0, 1, 1], [], []>} : vector<16x32xbf16>, vector<32x64xbf16>, vector<16x64xf32> -> vector<16x64xf32>
    %76 = vector.extract_strided_slice %45 {offsets = [160, 0], sizes = [16, 32], strides = [1, 1]} : vector<256x32xbf16> to vector<16x32xbf16>
    %c320 = arith.constant 320 : index
    %c0_33 = arith.constant 0 : index
    %77 = vector.load %arg4[%c320, %c0_33] : memref<512x64xbf16, #tpu.memory_space<vmem>>, vector<32x64xbf16>
    %cst_34 = arith.constant dense<0.000000e+00> : vector<16x64xf32>
    %78 = tpu.matmul %76, %77, %cst_34 {dimension_numbers = #tpu.dot_dimension_numbers<[1], [0], [0], [1], [0, 0, 1, 1], [], []>} : vector<16x32xbf16>, vector<32x64xbf16>, vector<16x64xf32> -> vector<16x64xf32>
    %79 = vector.extract_strided_slice %45 {offsets = [176, 0], sizes = [16, 32], strides = [1, 1]} : vector<256x32xbf16> to vector<16x32xbf16>
    %c352 = arith.constant 352 : index
    %c0_35 = arith.constant 0 : index
    %80 = vector.load %arg4[%c352, %c0_35] : memref<512x64xbf16, #tpu.memory_space<vmem>>, vector<32x64xbf16>
    %cst_36 = arith.constant dense<0.000000e+00> : vector<16x64xf32>
    %81 = tpu.matmul %79, %80, %cst_36 {dimension_numbers = #tpu.dot_dimension_numbers<[1], [0], [0], [1], [0, 0, 1, 1], [], []>} : vector<16x32xbf16>, vector<32x64xbf16>, vector<16x64xf32> -> vector<16x64xf32>
    %82 = vector.extract_strided_slice %45 {offsets = [192, 0], sizes = [16, 32], strides = [1, 1]} : vector<256x32xbf16> to vector<16x32xbf16>
    %c384 = arith.constant 384 : index
    %c0_37 = arith.constant 0 : index
    %83 = vector.load %arg4[%c384, %c0_37] : memref<512x64xbf16, #tpu.memory_space<vmem>>, vector<32x64xbf16>
    %cst_38 = arith.constant dense<0.000000e+00> : vector<16x64xf32>
    %84 = tpu.matmul %82, %83, %cst_38 {dimension_numbers = #tpu.dot_dimension_numbers<[1], [0], [0], [1], [0, 0, 1, 1], [], []>} : vector<16x32xbf16>, vector<32x64xbf16>, vector<16x64xf32> -> vector<16x64xf32>
    %85 = vector.extract_strided_slice %45 {offsets = [208, 0], sizes = [16, 32], strides = [1, 1]} : vector<256x32xbf16> to vector<16x32xbf16>
    %c416 = arith.constant 416 : index
    %c0_39 = arith.constant 0 : index
    %86 = vector.load %arg4[%c416, %c0_39] : memref<512x64xbf16, #tpu.memory_space<vmem>>, vector<32x64xbf16>
    %cst_40 = arith.constant dense<0.000000e+00> : vector<16x64xf32>
    %87 = tpu.matmul %85, %86, %cst_40 {dimension_numbers = #tpu.dot_dimension_numbers<[1], [0], [0], [1], [0, 0, 1, 1], [], []>} : vector<16x32xbf16>, vector<32x64xbf16>, vector<16x64xf32> -> vector<16x64xf32>
    %88 = vector.extract_strided_slice %45 {offsets = [224, 0], sizes = [16, 32], strides = [1, 1]} : vector<256x32xbf16> to vector<16x32xbf16>
    %c448 = arith.constant 448 : index
    %c0_41 = arith.constant 0 : index
    %89 = vector.load %arg4[%c448, %c0_41] : memref<512x64xbf16, #tpu.memory_space<vmem>>, vector<32x64xbf16>
    %cst_42 = arith.constant dense<0.000000e+00> : vector<16x64xf32>
    %90 = tpu.matmul %88, %89, %cst_42 {dimension_numbers = #tpu.dot_dimension_numbers<[1], [0], [0], [1], [0, 0, 1, 1], [], []>} : vector<16x32xbf16>, vector<32x64xbf16>, vector<16x64xf32> -> vector<16x64xf32>
    %91 = vector.extract_strided_slice %45 {offsets = [240, 0], sizes = [16, 32], strides = [1, 1]} : vector<256x32xbf16> to vector<16x32xbf16>
    %c480 = arith.constant 480 : index
    %c0_43 = arith.constant 0 : index
    %92 = vector.load %arg4[%c480, %c0_43] : memref<512x64xbf16, #tpu.memory_space<vmem>>, vector<32x64xbf16>
    %cst_44 = arith.constant dense<0.000000e+00> : vector<16x64xf32>
    %93 = tpu.matmul %91, %92, %cst_44 {dimension_numbers = #tpu.dot_dimension_numbers<[1], [0], [0], [1], [0, 0, 1, 1], [], []>} : vector<16x32xbf16>, vector<32x64xbf16>, vector<16x64xf32> -> vector<16x64xf32>
    %94 = arith.addf %48, %51 : vector<16x64xf32>
    %95 = arith.addf %54, %57 : vector<16x64xf32>
    %96 = arith.addf %60, %63 : vector<16x64xf32>
    %97 = arith.addf %66, %69 : vector<16x64xf32>
    %98 = arith.addf %72, %75 : vector<16x64xf32>
    %99 = arith.addf %78, %81 : vector<16x64xf32>
    %100 = arith.addf %84, %87 : vector<16x64xf32>
    %101 = arith.addf %90, %93 : vector<16x64xf32>
    %102 = arith.addf %94, %95 : vector<16x64xf32>
    %103 = arith.addf %96, %97 : vector<16x64xf32>
    %104 = arith.addf %98, %99 : vector<16x64xf32>
    %105 = arith.addf %100, %101 : vector<16x64xf32>
    %106 = arith.addf %102, %103 : vector<16x64xf32>
    %107 = arith.addf %104, %105 : vector<16x64xf32>
    %108 = arith.addf %106, %107 : vector<16x64xf32>
    %c1 = arith.constant 1 : index
    %c0_45 = arith.constant 0 : index
    %109 = vector.load %arg10[%c1, %c0_45] : memref<8x128xf32, #tpu.memory_space<vmem>>, vector<1x64xf32>
    %110 = vector.broadcast %109 : vector<1x64xf32> to vector<16x64xf32>
    %111 = arith.addf %108, %110 : vector<16x64xf32>
    %cst_46 = arith.constant 0.000000e+00 : f32
    %112 = vector.broadcast %cst_46 : f32 to vector<16x64xf32>
    %113 = arith.maximumf %111, %112 : vector<16x64xf32>
    %114 = arith.truncf %113 : vector<16x64xf32> to vector<16x64xbf16>
    %115 = tpu.iota {dimensions = array<i32: 0>} : vector<36x16xi32>
    %116 = tpu.iota {dimensions = array<i32: 1>} : vector<36x16xi32>
    %c2_i32_47 = arith.constant 2 : i32
    %117 = vector.broadcast %c2_i32_47 : i32 to vector<36x16xi32>
    %118 = arith.shrsi %115, %117 : vector<36x16xi32>
    %c3_i32_48 = arith.constant 3 : i32
    %119 = vector.broadcast %c3_i32_48 : i32 to vector<36x16xi32>
    %120 = arith.andi %115, %119 : vector<36x16xi32>
    %c11_i32 = arith.constant 11 : i32
    %121 = vector.broadcast %c11_i32 : i32 to vector<36x16xi32>
    %122 = arith.muli %118, %121 : vector<36x16xi32>
    %c5_i32 = arith.constant 5 : i32
    %123 = vector.broadcast %c5_i32 : i32 to vector<36x16xi32>
    %124 = arith.shrsi %122, %123 : vector<36x16xi32>
    %c3_i32_49 = arith.constant 3 : i32
    %125 = vector.broadcast %c3_i32_49 : i32 to vector<36x16xi32>
    %126 = arith.muli %125, %124 : vector<36x16xi32>
    %127 = arith.subi %118, %126 : vector<36x16xi32>
    %c1_i32 = arith.constant 1 : i32
    %128 = vector.broadcast %c1_i32 : i32 to vector<36x16xi32>
    %129 = arith.shrsi %120, %128 : vector<36x16xi32>
    %c1_i32_50 = arith.constant 1 : i32
    %130 = vector.broadcast %c1_i32_50 : i32 to vector<36x16xi32>
    %131 = arith.andi %120, %130 : vector<36x16xi32>
    %132 = arith.addi %129, %124 : vector<36x16xi32>
    %c4_i32_51 = arith.constant 4 : i32
    %133 = vector.broadcast %c4_i32_51 : i32 to vector<36x16xi32>
    %134 = arith.muli %133, %132 : vector<36x16xi32>
    %135 = arith.addi %134, %131 : vector<36x16xi32>
    %136 = arith.addi %135, %127 : vector<36x16xi32>
    %137 = arith.cmpi eq, %116, %136 : vector<36x16xi32>
    %138 = arith.extui %137 : vector<36x16xi1> to vector<36x16xi32>
    %139 = arith.sitofp %138 : vector<36x16xi32> to vector<36x16xf32>
    %140 = arith.truncf %139 : vector<36x16xf32> to vector<36x16xbf16>
    %cst_52 = arith.constant dense<0.000000e+00> : vector<36x64xf32>
    %141 = tpu.matmul %140, %114, %cst_52 {dimension_numbers = #tpu.dot_dimension_numbers<[1], [0], [0], [1], [0, 0, 1, 1], [], []>} : vector<36x16xbf16>, vector<16x64xbf16>, vector<36x64xf32> -> vector<36x64xf32>
    %142 = arith.truncf %141 : vector<36x64xf32> to vector<36x64xbf16>
    %143 = vector.extract_strided_slice %142 {offsets = [0, 0], sizes = [4, 64], strides = [1, 1]} : vector<36x64xbf16> to vector<4x64xbf16>
    %c0_53 = arith.constant 0 : index
    %c0_54 = arith.constant 0 : index
    %144 = vector.load %arg5[%c0_53, %c0_54] : memref<576x128xbf16, #tpu.memory_space<vmem>>, vector<64x128xbf16>
    %cst_55 = arith.constant dense<0.000000e+00> : vector<4x128xf32>
    %145 = tpu.matmul %143, %144, %cst_55 {dimension_numbers = #tpu.dot_dimension_numbers<[1], [0], [0], [1], [0, 0, 1, 1], [], []>} : vector<4x64xbf16>, vector<64x128xbf16>, vector<4x128xf32> -> vector<4x128xf32>
    %146 = vector.extract_strided_slice %142 {offsets = [4, 0], sizes = [4, 64], strides = [1, 1]} : vector<36x64xbf16> to vector<4x64xbf16>
    %c64_56 = arith.constant 64 : index
    %c0_57 = arith.constant 0 : index
    %147 = vector.load %arg5[%c64_56, %c0_57] : memref<576x128xbf16, #tpu.memory_space<vmem>>, vector<64x128xbf16>
    %cst_58 = arith.constant dense<0.000000e+00> : vector<4x128xf32>
    %148 = tpu.matmul %146, %147, %cst_58 {dimension_numbers = #tpu.dot_dimension_numbers<[1], [0], [0], [1], [0, 0, 1, 1], [], []>} : vector<4x64xbf16>, vector<64x128xbf16>, vector<4x128xf32> -> vector<4x128xf32>
    %149 = vector.extract_strided_slice %142 {offsets = [8, 0], sizes = [4, 64], strides = [1, 1]} : vector<36x64xbf16> to vector<4x64xbf16>
    %c128_59 = arith.constant 128 : index
    %c0_60 = arith.constant 0 : index
    %150 = vector.load %arg5[%c128_59, %c0_60] : memref<576x128xbf16, #tpu.memory_space<vmem>>, vector<64x128xbf16>
    %cst_61 = arith.constant dense<0.000000e+00> : vector<4x128xf32>
    %151 = tpu.matmul %149, %150, %cst_61 {dimension_numbers = #tpu.dot_dimension_numbers<[1], [0], [0], [1], [0, 0, 1, 1], [], []>} : vector<4x64xbf16>, vector<64x128xbf16>, vector<4x128xf32> -> vector<4x128xf32>
    %152 = vector.extract_strided_slice %142 {offsets = [12, 0], sizes = [4, 64], strides = [1, 1]} : vector<36x64xbf16> to vector<4x64xbf16>
    %c192_62 = arith.constant 192 : index
    %c0_63 = arith.constant 0 : index
    %153 = vector.load %arg5[%c192_62, %c0_63] : memref<576x128xbf16, #tpu.memory_space<vmem>>, vector<64x128xbf16>
    %cst_64 = arith.constant dense<0.000000e+00> : vector<4x128xf32>
    %154 = tpu.matmul %152, %153, %cst_64 {dimension_numbers = #tpu.dot_dimension_numbers<[1], [0], [0], [1], [0, 0, 1, 1], [], []>} : vector<4x64xbf16>, vector<64x128xbf16>, vector<4x128xf32> -> vector<4x128xf32>
    %155 = vector.extract_strided_slice %142 {offsets = [16, 0], sizes = [4, 64], strides = [1, 1]} : vector<36x64xbf16> to vector<4x64xbf16>
    %c256_65 = arith.constant 256 : index
    %c0_66 = arith.constant 0 : index
    %156 = vector.load %arg5[%c256_65, %c0_66] : memref<576x128xbf16, #tpu.memory_space<vmem>>, vector<64x128xbf16>
    %cst_67 = arith.constant dense<0.000000e+00> : vector<4x128xf32>
    %157 = tpu.matmul %155, %156, %cst_67 {dimension_numbers = #tpu.dot_dimension_numbers<[1], [0], [0], [1], [0, 0, 1, 1], [], []>} : vector<4x64xbf16>, vector<64x128xbf16>, vector<4x128xf32> -> vector<4x128xf32>
    %158 = vector.extract_strided_slice %142 {offsets = [20, 0], sizes = [4, 64], strides = [1, 1]} : vector<36x64xbf16> to vector<4x64xbf16>
    %c320_68 = arith.constant 320 : index
    %c0_69 = arith.constant 0 : index
    %159 = vector.load %arg5[%c320_68, %c0_69] : memref<576x128xbf16, #tpu.memory_space<vmem>>, vector<64x128xbf16>
    %cst_70 = arith.constant dense<0.000000e+00> : vector<4x128xf32>
    %160 = tpu.matmul %158, %159, %cst_70 {dimension_numbers = #tpu.dot_dimension_numbers<[1], [0], [0], [1], [0, 0, 1, 1], [], []>} : vector<4x64xbf16>, vector<64x128xbf16>, vector<4x128xf32> -> vector<4x128xf32>
    %161 = vector.extract_strided_slice %142 {offsets = [24, 0], sizes = [4, 64], strides = [1, 1]} : vector<36x64xbf16> to vector<4x64xbf16>
    %c384_71 = arith.constant 384 : index
    %c0_72 = arith.constant 0 : index
    %162 = vector.load %arg5[%c384_71, %c0_72] : memref<576x128xbf16, #tpu.memory_space<vmem>>, vector<64x128xbf16>
    %cst_73 = arith.constant dense<0.000000e+00> : vector<4x128xf32>
    %163 = tpu.matmul %161, %162, %cst_73 {dimension_numbers = #tpu.dot_dimension_numbers<[1], [0], [0], [1], [0, 0, 1, 1], [], []>} : vector<4x64xbf16>, vector<64x128xbf16>, vector<4x128xf32> -> vector<4x128xf32>
    %164 = vector.extract_strided_slice %142 {offsets = [28, 0], sizes = [4, 64], strides = [1, 1]} : vector<36x64xbf16> to vector<4x64xbf16>
    %c448_74 = arith.constant 448 : index
    %c0_75 = arith.constant 0 : index
    %165 = vector.load %arg5[%c448_74, %c0_75] : memref<576x128xbf16, #tpu.memory_space<vmem>>, vector<64x128xbf16>
    %cst_76 = arith.constant dense<0.000000e+00> : vector<4x128xf32>
    %166 = tpu.matmul %164, %165, %cst_76 {dimension_numbers = #tpu.dot_dimension_numbers<[1], [0], [0], [1], [0, 0, 1, 1], [], []>} : vector<4x64xbf16>, vector<64x128xbf16>, vector<4x128xf32> -> vector<4x128xf32>
    %167 = vector.extract_strided_slice %142 {offsets = [32, 0], sizes = [4, 64], strides = [1, 1]} : vector<36x64xbf16> to vector<4x64xbf16>
    %c512 = arith.constant 512 : index
    %c0_77 = arith.constant 0 : index
    %168 = vector.load %arg5[%c512, %c0_77] : memref<576x128xbf16, #tpu.memory_space<vmem>>, vector<64x128xbf16>
    %cst_78 = arith.constant dense<0.000000e+00> : vector<4x128xf32>
    %169 = tpu.matmul %167, %168, %cst_78 {dimension_numbers = #tpu.dot_dimension_numbers<[1], [0], [0], [1], [0, 0, 1, 1], [], []>} : vector<4x64xbf16>, vector<64x128xbf16>, vector<4x128xf32> -> vector<4x128xf32>
    %170 = arith.addf %145, %148 : vector<4x128xf32>
    %171 = arith.addf %151, %154 : vector<4x128xf32>
    %172 = arith.addf %157, %160 : vector<4x128xf32>
    %173 = arith.addf %163, %166 : vector<4x128xf32>
    %174 = arith.addf %170, %171 : vector<4x128xf32>
    %175 = arith.addf %172, %173 : vector<4x128xf32>
    %176 = arith.addf %174, %175 : vector<4x128xf32>
    %177 = arith.addf %176, %169 : vector<4x128xf32>
    %c2 = arith.constant 2 : index
    %c0_79 = arith.constant 0 : index
    %178 = vector.load %arg10[%c2, %c0_79] : memref<8x128xf32, #tpu.memory_space<vmem>>, vector<1x128xf32>
    %179 = vector.broadcast %178 : vector<1x128xf32> to vector<4x128xf32>
    %180 = arith.addf %177, %179 : vector<4x128xf32>
    %cst_80 = arith.constant 0.000000e+00 : f32
    %181 = vector.broadcast %cst_80 : f32 to vector<4x128xf32>
    %182 = arith.maximumf %180, %181 : vector<4x128xf32>
    %183 = vector.extract_strided_slice %182 {offsets = [0, 0], sizes = [1, 128], strides = [1, 1]} : vector<4x128xf32> to vector<1x128xf32>
    %c0_81 = arith.constant 0 : index
    %c0_82 = arith.constant 0 : index
    %184 = vector.load %arg12[%c0_81, %c0_82] : memref<1x512xf32, #tpu.memory_space<vmem>>, vector<1x128xf32>
    tpu.vector_store %arg12[%c0_81, %c0_82], %183 {strides = array<i32>} : memref<1x512xf32, #tpu.memory_space<vmem>>, vector<1x128xf32>,
    %185 = vector.extract_strided_slice %182 {offsets = [1, 0], sizes = [1, 128], strides = [1, 1]} : vector<4x128xf32> to vector<1x128xf32>
    %c0_83 = arith.constant 0 : index
    %c128_84 = arith.constant 128 : index
    %186 = vector.load %arg12[%c0_83, %c128_84] : memref<1x512xf32, #tpu.memory_space<vmem>>, vector<1x128xf32>
    tpu.vector_store %arg12[%c0_83, %c128_84], %185 {strides = array<i32>} : memref<1x512xf32, #tpu.memory_space<vmem>>, vector<1x128xf32>,
    %187 = vector.extract_strided_slice %182 {offsets = [2, 0], sizes = [1, 128], strides = [1, 1]} : vector<4x128xf32> to vector<1x128xf32>
    %c0_85 = arith.constant 0 : index
    %c256_86 = arith.constant 256 : index
    %188 = vector.load %arg12[%c0_85, %c256_86] : memref<1x512xf32, #tpu.memory_space<vmem>>, vector<1x128xf32>
    tpu.vector_store %arg12[%c0_85, %c256_86], %187 {strides = array<i32>} : memref<1x512xf32, #tpu.memory_space<vmem>>, vector<1x128xf32>,
    %189 = vector.extract_strided_slice %182 {offsets = [3, 0], sizes = [1, 128], strides = [1, 1]} : vector<4x128xf32> to vector<1x128xf32>
    %c0_87 = arith.constant 0 : index
    %c384_88 = arith.constant 384 : index
    %190 = vector.load %arg12[%c0_87, %c384_88] : memref<1x512xf32, #tpu.memory_space<vmem>>, vector<1x128xf32>
    tpu.vector_store %arg12[%c0_87, %c384_88], %189 {strides = array<i32>} : memref<1x512xf32, #tpu.memory_space<vmem>>, vector<1x128xf32>,
    %c0_89 = arith.constant 0 : index
    %c0_90 = arith.constant 0 : index
    %191 = vector.load %arg12[%c0_89, %c0_90] : memref<1x512xf32, #tpu.memory_space<vmem>>, vector<1x512xf32>
    %192 = arith.truncf %191 : vector<1x512xf32> to vector<1x512xbf16>
    %c0_91 = arith.constant 0 : index
    %c0_92 = arith.constant 0 : index
    %c0_93 = arith.constant 0 : index
    %193 = vector.load %arg2[%c0_91, %c0_92, %c0_93] : memref<1x1x512xf32, #tpu.memory_space<vmem>>, vector<1x1x512xf32>
    %194 = vector.shape_cast %193 : vector<1x1x512xf32> to vector<1x512xf32>
    %195 = vector.extract_strided_slice %194 {offsets = [0, 0], sizes = [1, 366], strides = [1, 1]} : vector<1x512xf32> to vector<1x366xf32>
    %196 = arith.truncf %195 : vector<1x366xf32> to vector<1x366xbf16>
    %197 = vector.extract_strided_slice %194 {offsets = [0, 366], sizes = [1, 16], strides = [1, 1]} : vector<1x512xf32> to vector<1x16xf32>
    %198 = vector.extract_strided_slice %194 {offsets = [0, 382], sizes = [1, 32], strides = [1, 1]} : vector<1x512xf32> to vector<1x32xf32>
    %c0_94 = arith.constant 0 : index
    %c0_95 = arith.constant 0 : index
    %199 = vector.load %arg6[%c0_94, %c0_95] : memref<512x42xbf16, #tpu.memory_space<vmem>>, vector<512x42xbf16>
    %cst_96 = arith.constant dense<0.000000e+00> : vector<1x42xf32>
    %200 = tpu.matmul %192, %199, %cst_96 {dimension_numbers = #tpu.dot_dimension_numbers<[1], [0], [0], [1], [0, 0, 1, 1], [], []>} : vector<1x512xbf16>, vector<512x42xbf16>, vector<1x42xf32> -> vector<1x42xf32>
    %c0_97 = arith.constant 0 : index
    %c0_98 = arith.constant 0 : index
    %201 = vector.load %arg7[%c0_97, %c0_98] : memref<366x42xbf16, #tpu.memory_space<vmem>>, vector<366x42xbf16>
    %cst_99 = arith.constant dense<0.000000e+00> : vector<1x42xf32>
    %202 = tpu.matmul %196, %201, %cst_99 {dimension_numbers = #tpu.dot_dimension_numbers<[1], [0], [0], [1], [0, 0, 1, 1], [], []>} : vector<1x366xbf16>, vector<366x42xbf16>, vector<1x42xf32> -> vector<1x42xf32>
    %203 = arith.addf %200, %202 : vector<1x42xf32>
    %c3 = arith.constant 3 : index
    %c0_100 = arith.constant 0 : index
    %204 = vector.load %arg10[%c3, %c0_100] : memref<8x128xf32, #tpu.memory_space<vmem>>, vector<1x42xf32>
    %205 = arith.addf %203, %204 : vector<1x42xf32>
    %206 = vector.extract_strided_slice %205 {offsets = [0, 0], sizes = [1, 16], strides = [1, 1]} : vector<1x42xf32> to vector<1x16xf32>
    %207 = vector.extract_strided_slice %205 {offsets = [0, 16], sizes = [1, 16], strides = [1, 1]} : vector<1x42xf32> to vector<1x16xf32>
    %208 = vector.extract_strided_slice %205 {offsets = [0, 34], sizes = [1, 8], strides = [1, 1]} : vector<1x42xf32> to vector<1x8xf32>
    %cst_101 = arith.constant 5.000000e-01 : f32
    %209 = vector.broadcast %cst_101 : f32 to vector<1x16xf32>
    %210 = arith.mulf %209, %206 : vector<1x16xf32>
    %211 = math.exp %210 : vector<1x16xf32>
    %212 = arith.mulf %197, %211 : vector<1x16xf32>
    %213 = arith.addf %212, %207 : vector<1x16xf32>
    %214 = arith.truncf %213 : vector<1x16xf32> to vector<1x16xbf16>
    %c0_102 = arith.constant 0 : index
    %c0_103 = arith.constant 0 : index
    %215 = vector.load %arg8[%c0_102, %c0_103] : memref<16x64xbf16, #tpu.memory_space<vmem>>, vector<16x64xbf16>
    %cst_104 = arith.constant dense<0.000000e+00> : vector<1x64xf32>
    %216 = tpu.matmul %214, %215, %cst_104 {dimension_numbers = #tpu.dot_dimension_numbers<[1], [0], [0], [1], [0, 0, 1, 1], [], []>} : vector<1x16xbf16>, vector<16x64xbf16>, vector<1x64xf32> -> vector<1x64xf32>
    %c4 = arith.constant 4 : index
    %c0_105 = arith.constant 0 : index
    %217 = vector.load %arg10[%c4, %c0_105] : memref<8x128xf32, #tpu.memory_space<vmem>>, vector<1x64xf32>
    %218 = arith.addf %216, %217 : vector<1x64xf32>
    %219 = vector.extract_strided_slice %218 {offsets = [0, 0], sizes = [1, 32], strides = [1, 1]} : vector<1x64xf32> to vector<1x32xf32>
    %220 = vector.extract_strided_slice %218 {offsets = [0, 32], sizes = [1, 32], strides = [1, 1]} : vector<1x64xf32> to vector<1x32xf32>
    %cst_106 = arith.constant 5.000000e-01 : f32
    %221 = vector.broadcast %cst_106 : f32 to vector<1x32xf32>
    %222 = arith.mulf %221, %220 : vector<1x32xf32>
    %223 = math.exp %222 : vector<1x32xf32>
    %224 = arith.mulf %223, %198 : vector<1x32xf32>
    %225 = arith.addf %219, %224 : vector<1x32xf32>
    %226 = arith.truncf %225 : vector<1x32xf32> to vector<1x32xbf16>
    %c0_107 = arith.constant 0 : index
    %c0_108 = arith.constant 0 : index
    %227 = vector.load %arg9[%c0_107, %c0_108] : memref<32x8xbf16, #tpu.memory_space<vmem>>, vector<32x8xbf16>
    %cst_109 = arith.constant dense<0.000000e+00> : vector<1x8xf32>
    %228 = tpu.matmul %226, %227, %cst_109 {dimension_numbers = #tpu.dot_dimension_numbers<[1], [0], [0], [1], [0, 0, 1, 1], [], []>} : vector<1x32xbf16>, vector<32x8xbf16>, vector<1x8xf32> -> vector<1x8xf32>
    %229 = arith.addf %228, %208 : vector<1x8xf32>
    %cst_110 = arith.constant 0.000000e+00 : f32
    %230 = vector.broadcast %cst_110 : f32 to vector<8x128xf32>
    %c0_111 = arith.constant 0 : index
    %c0_112 = arith.constant 0 : index
    %c0_113 = arith.constant 0 : index
    %231 = vector.load %arg11[%c0_111, %c0_112, %c0_113] : memref<1x8x128xf32, #tpu.memory_space<vmem>>, vector<1x8x128xf32>
    %232 = vector.shape_cast %231 : vector<1x8x128xf32> to vector<8x128xf32>
    %233 = vector.shape_cast %230 : vector<8x128xf32> to vector<1x8x128xf32>
    tpu.vector_store %arg11[%c0_111, %c0_112, %c0_113], %233 {strides = array<i32>} : memref<1x8x128xf32, #tpu.memory_space<vmem>>, vector<1x8x128xf32>,
    %234 = vector.extract_strided_slice %205 {offsets = [0, 0], sizes = [1, 34], strides = [1, 1]} : vector<1x42xf32> to vector<1x34xf32>
    %c0_114 = arith.constant 0 : index
    %c0_115 = arith.constant 0 : index
    %c0_116 = arith.constant 0 : index
    %235 = vector.load %arg11[%c0_114, %c0_115, %c0_116] : memref<1x8x128xf32, #tpu.memory_space<vmem>>, vector<1x1x34xf32>
    %236 = vector.shape_cast %235 : vector<1x1x34xf32> to vector<1x34xf32>
    %237 = vector.shape_cast %234 : vector<1x34xf32> to vector<1x1x34xf32>
    tpu.vector_store %arg11[%c0_114, %c0_115, %c0_116], %237 {strides = array<i32>} : memref<1x8x128xf32, #tpu.memory_space<vmem>>, vector<1x1x34xf32>,
    %c0_117 = arith.constant 0 : index
    %c1_118 = arith.constant 1 : index
    %c0_119 = arith.constant 0 : index
    %238 = vector.load %arg11[%c0_117, %c1_118, %c0_119] : memref<1x8x128xf32, #tpu.memory_space<vmem>>, vector<1x1x64xf32>
    %239 = vector.shape_cast %238 : vector<1x1x64xf32> to vector<1x64xf32>
    %240 = vector.shape_cast %218 : vector<1x64xf32> to vector<1x1x64xf32>
    tpu.vector_store %arg11[%c0_117, %c1_118, %c0_119], %240 {strides = array<i32>} : memref<1x8x128xf32, #tpu.memory_space<vmem>>, vector<1x1x64xf32>,
    %c0_120 = arith.constant 0 : index
    %c2_121 = arith.constant 2 : index
    %c0_122 = arith.constant 0 : index
    %241 = vector.load %arg11[%c0_120, %c2_121, %c0_122] : memref<1x8x128xf32, #tpu.memory_space<vmem>>, vector<1x1x8xf32>
    %242 = vector.shape_cast %241 : vector<1x1x8xf32> to vector<1x8xf32>
    %243 = vector.shape_cast %229 : vector<1x8xf32> to vector<1x1x8xf32>
    tpu.vector_store %arg11[%c0_120, %c2_121, %c0_122], %243 {strides = array<i32>} : memref<1x8x128xf32, #tpu.memory_space<vmem>>, vector<1x1x8xf32>,
    return
  }
  func.func @transform_0(%arg0: i32) -> (i32, i32, i32) {
    %c0_i32 = arith.constant 0 : i32
    %c0_i32_0 = arith.constant 0 : i32
    %c0_i32_1 = arith.constant 0 : i32
    return %arg0, %c0_i32, %c0_i32_0 : i32, i32, i32
  }
  func.func @transform_1(%arg0: i32) -> (i32, i32, i32) {
    %c0_i32 = arith.constant 0 : i32
    %c0_i32_0 = arith.constant 0 : i32
    %c0_i32_1 = arith.constant 0 : i32
    return %arg0, %c0_i32, %c0_i32_0 : i32, i32, i32
  }
  func.func @transform_2(%arg0: i32) -> (i32, i32) {
    %c0_i32 = arith.constant 0 : i32
    %c0_i32_0 = arith.constant 0 : i32
    %c0_i32_1 = arith.constant 0 : i32
    return %c0_i32, %c0_i32_0 : i32, i32
  }
  func.func @transform_3(%arg0: i32) -> (i32, i32) {
    %c0_i32 = arith.constant 0 : i32
    %c0_i32_0 = arith.constant 0 : i32
    %c0_i32_1 = arith.constant 0 : i32
    return %c0_i32, %c0_i32_0 : i32, i32
  }
  func.func @transform_4(%arg0: i32) -> (i32, i32) {
    %c0_i32 = arith.constant 0 : i32
    %c0_i32_0 = arith.constant 0 : i32
    %c0_i32_1 = arith.constant 0 : i32
    return %c0_i32, %c0_i32_0 : i32, i32
  }
  func.func @transform_5(%arg0: i32) -> (i32, i32) {
    %c0_i32 = arith.constant 0 : i32
    %c0_i32_0 = arith.constant 0 : i32
    %c0_i32_1 = arith.constant 0 : i32
    return %c0_i32, %c0_i32_0 : i32, i32
  }
  func.func @transform_6(%arg0: i32) -> (i32, i32) {
    %c0_i32 = arith.constant 0 : i32
    %c0_i32_0 = arith.constant 0 : i32
    %c0_i32_1 = arith.constant 0 : i32
    return %c0_i32, %c0_i32_0 : i32, i32
  }
  func.func @transform_7(%arg0: i32) -> (i32, i32) {
    %c0_i32 = arith.constant 0 : i32
    %c0_i32_0 = arith.constant 0 : i32
    %c0_i32_1 = arith.constant 0 : i32
    return %c0_i32, %c0_i32_0 : i32, i32
  }
  func.func @transform_8(%arg0: i32) -> (i32, i32) {
    %c0_i32 = arith.constant 0 : i32
    %c0_i32_0 = arith.constant 0 : i32
    %c0_i32_1 = arith.constant 0 : i32
    return %c0_i32, %c0_i32_0 : i32, i32
  }
  func.func @transform_9(%arg0: i32) -> (i32, i32) {
    %c0_i32 = arith.constant 0 : i32
    %c0_i32_0 = arith.constant 0 : i32
    %c0_i32_1 = arith.constant 0 : i32
    return %c0_i32, %c0_i32_0 : i32, i32
  }
  func.func @transform_10(%arg0: i32) -> (i32, i32, i32) {
    %c0_i32 = arith.constant 0 : i32
    %c0_i32_0 = arith.constant 0 : i32
    %c0_i32_1 = arith.constant 0 : i32
    return %arg0, %c0_i32, %c0_i32_0 : i32, i32, i32
  }
}

</mosaic_0001>

<bundles_post_ra>
// kernel: neural_coord_forward.1
= control target key start
LH: loop header
LB: loop body
LE: loop exit
PB: predicated region body
PF: predicated region fallthrough
CT: control target
= control target key end

     0   :  { %s6289_s13 = smov 0   ;;  %s7818_s0 = inlined_call_operand.vmem [shape: bf16[4,100,768], index: 0, kind: input, shape index: {}]   ;;  %s7819_s1 = inlined_call_operand.vmem [shape: f32[4,1,512], index: 1, kind: input, shape index: {}]   ;;  %s7820_s2 = inlined_call_operand.vmem [shape: bf16[768,128], index: 2, kind: input, shape index: {}]   ;;  %s7821_s3 = inlined_call_operand.vmem [shape: bf16[512,64], index: 3, kind: input, shape index: {}]   ;;  %s7822_s4 = inlined_call_operand.vmem [shape: bf16[576,128], index: 4, kind: input, shape index: {}]   ;;  %s7823_s5 = inlined_call_operand.vmem [shape: bf16[512,42], index: 5, kind: input, shape index: {}]   ;;  %s7824_s6 = inlined_call_operand.vmem [shape: bf16[366,42], index: 6, kind: input, shape index: {}]   ;;  %s7825_s7 = inlined_call_operand.vmem [shape: bf16[16,64], index: 7, kind: input, shape index: {}]   ;;  %s7826_s8 = inlined_call_operand.vmem [shape: bf16[32,8], index: 8, kind: input, shape index: {}]   ;;  %s7827_s9 = inlined_call_operand.vmem [shape: f32[8,128], index: 9, kind: input, shape index: {}]   ;;  %s7828_s10 = inlined_call_operand.vmem [shape: f32[4,8,128], index: 10, kind: output, shape index: {}]  }
   0x1 LB: > { %s4946_s14 = sadd.s32 4294967295, %s6223_s13   ;;  %p4950_p0 = scmp.ge.s32.totalorder %s6223_s13, 1  ;;  %s6223_s13 = sphi %s6289_s13, %s20_s13  }
   0x2   : > { %p321_p1 = scmp.lt.s32.totalorder %s6223_s13, 5 }
   0x4   : > { %p322_p2 = pnand %p4950_p0, %p321_p1 }
   0x5   : > { %v5979_v0 = vld [vmem:[%s7820_s2 + $0x40] sm:$0xff] (!%p322_p2)   ;;  %v5983_v4 = vld [vmem:[%s7820_s2 + $0x48] sm:$0xff] (!%p322_p2)   ;;  %v5987_v8 = vld [vmem:[%s7820_s2 + $0x50] sm:$0xff] (!%p322_p2)   ;;  %p362_p3 = scmp.lt.s32.totalorder (!%p322_p2), %s4946_s14, 3  ;;  %s6226_s27 = smov (!%p322_p2), 64   ;;  %vm1963_vm2 = vcmask (!%p322_p2), 818176  }
   0x6   : > { %325 = sbr.rel (%p322_p2) target bundleno = 2575 (0xa0f), region = 60  ;;  %v5980_v1 = vld [vmem:[%s7820_s2 + $0xc0] sm:$0xff] (!%p322_p2)   ;;  %5259 = vmatprep.subr.bf16.mxu0 (!%p322_p2), %v5979_v0  ;;  %v5984_v5 = vld [vmem:[%s7820_s2 + $0xc8] sm:$0xff] (!%p322_p2)   ;;  %v5988_v9 = vld [vmem:[%s7820_s2 + $0xd0] sm:$0xff] (!%p322_p2)   ;;  %vm2012_vm14 = vcmask (!%p322_p2), 1041408   ;;  %s6231_s16 = smov (!%p322_p2), 34  }
   0x7   : > { %v5981_v2 = vld [vmem:[%s7820_s2] sm:$0xff] (!%p322_p2)   ;;  %5317 = vmatprep.subr.bf16.mxu1 (!%p322_p2), %v5980_v1  ;;  %v5985_v6 = vld [vmem:[%s7820_s2 + $0x8] sm:$0xff] (!%p322_p2)   ;;  %v5989_v10 = vld [vmem:[%s7820_s2 + $0x10] sm:$0xff] (!%p322_p2)   ;;  %s6232_s20 = smov (!%p322_p2), 112   ;;  %s6233_s21 = smov (!%p322_p2), 94  }
   0x8   : > { %v5982_v3 = vld [vmem:[%s7820_s2 + $0x80] sm:$0xff] (!%p322_p2)   ;;  %5260 = vmatpush3.bf16.msra.mxu0 (!%p322_p2), %v5981_v2  ;;  %v5986_v7 = vld [vmem:[%s7820_s2 + $0x88] sm:$0xff] (!%p322_p2)   ;;  %v5990_v11 = vld [vmem:[%s7820_s2 + $0x90] sm:$0xff] (!%p322_p2)  }
   0x9   : > { %5318 = vmatpush3.bf16.msra.mxu1 (!%p322_p2), %v5982_v3  ;;  %5261 = vmatprep.subr.bf16.mxu0 (!%p322_p2), %v5983_v4  ;;  %v5991_v12 = vld [vmem:[%s7820_s2 + $0x58] sm:$0xff] (!%p322_p2)   ;;  %v5995_v16 = vld [vmem:[%s7820_s2 + $0x60] sm:$0xff] (!%p322_p2)   ;;  %v5999_v20 = vld [vmem:[%s7820_s2 + $0x68] sm:$0xff] (!%p322_p2)  }
   0xa   : > { %5319 = vmatprep.subr.bf16.mxu1 (!%p322_p2), %v5984_v5  ;;  %v5992_v13 = vld [vmem:[%s7820_s2 + $0xd8] sm:$0xff] (!%p322_p2)   ;;  %v5996_v17 = vld [vmem:[%s7820_s2 + $0xe0] sm:$0xff] (!%p322_p2)   ;;  %v6000_v21 = vld [vmem:[%s7820_s2 + $0xe8] sm:$0xff] (!%p322_p2)  }
   0xb   : > { %v5993_v14 = vld [vmem:[%s7820_s2 + $0x18] sm:$0xff] (!%p322_p2)   ;;  %v5997_v18 = vld [vmem:[%s7820_s2 + $0x20] sm:$0xff] (!%p322_p2)   ;;  %v6001_v22 = vld [vmem:[%s7820_s2 + $0x28] sm:$0xff] (!%p322_p2)  }
   0xc   : > { %5262 = vmatpush3.bf16.msra.mxu0 (!%p322_p2), %v5985_v6  ;;  %v5994_v15 = vld [vmem:[%s7820_s2 + $0x98] sm:$0xff] (!%p322_p2)   ;;  %v5998_v19 = vld [vmem:[%s7820_s2 + $0xa0] sm:$0xff] (!%p322_p2)   ;;  %v6002_v23 = vld [vmem:[%s7820_s2 + $0xa8] sm:$0xff] (!%p322_p2)  }
   0xd   : > { %5320 = vmatpush3.bf16.msra.mxu1 %v5986_v7  ;;  %5263 = vmatprep.subr.bf16.mxu0 %v5987_v8  ;;  %s7846_s14 = smov (!%p362_p3, %s4946_s14), 3  ;;  %v6003_v24 = vld [vmem:[%s7820_s2 + $0x70] sm:$0xff]   ;;  %v6007_v28 = vld [vmem:[%s7820_s2 + $0x78] sm:$0xff]   ;;  %v6023_v39 = vld [vmem:[%s7820_s2 + $0x140] sm:$0xff]  }
   0xe   : > { %5321 = vmatprep.subr.bf16.mxu1 %v5988_v9  ;;  %v6004_v25 = vld [vmem:[%s7820_s2 + $0xf0] sm:$0xff]   ;;  %s5961_s11 = smul.u32 312, %s7846_s14  ;;  %v6008_v29 = vld [vmem:[%s7820_s2 + $0xf8] sm:$0xff]   ;;  %v6024_v40 = vld [vmem:[%s7820_s2 + $0x100] sm:$0xff]   ;;  %s4952_s25 = sshll.u32 %s7846_s14, 2 }
   0xf   : > { %v6005_v26 = vld [vmem:[%s7820_s2 + $0x30] sm:$0xff]   ;;  %v6009_v30 = vld [vmem:[%s7820_s2 + $0x38] sm:$0xff]   ;;  %v6029_v44 = vld [vmem:[%s7820_s2 + $0x148] sm:$0xff]   ;;  %s370_s30 = scalar_lea.vmem %s7819_s1, %s4952_s25 }
  0x10   : > { %5264 = vmatpush3.bf16.msra.mxu0 %v5989_v10  ;;  %v6006_v27 = vld [vmem:[%s7820_s2 + $0xb0] sm:$0xff]   ;;  %s6397_s24 = scalar_lea.vmem %s7818_s0, %s5961_s11  ;;  %v6010_v31 = vld [vmem:[%s7820_s2 + $0xb8] sm:$0xff]   ;;  %v6032_v45 = vld [vmem:[%s7820_s2 + $0x108] sm:$0xff]  }
  0x11   : > { %5322 = vmatpush3.bf16.msra.mxu1 %v5990_v11  ;;  %5265 = vmatprep.subr.bf16.mxu0 %v5991_v12  ;;  %v6011_v32 = vld [vmem:[%s6397_s24] ss:$24 sps:$4 sm:$0xff]   ;;  %v6013_v33 = vld [vmem:[%s6397_s24 + $0x4] ss:$24 sps:$4 sm:$0xff]   ;;  %v6017_v36 = vld [vmem:[%s6397_s24 + $0x34] ss:$24 sps:$4 sm:$0xff]  }
  0x12   : > { %5323 = vmatprep.subr.bf16.mxu1 %v5992_v13  ;;  %v6014_v34 = vld [vmem:[%s6397_s24 + $0x8] ss:$24 sps:$4 sm:$0xff]   ;;  %v6016_v35 = vld [vmem:[%s6397_s24 + $0xc] ss:$24 sps:$4 sm:$0xff]   ;;  %1032 = vmatprep.mubr.bf16.mxu0 %v6013_v33  ;;  %v6019_v37 = vld [vmem:[%s6397_s24 + $0x3c] ss:$24 sps:$4 sm:$0xff]  }
  0x13   : > { %1120 = vmatprep.mubr.bf16.mxu1 %v6016_v35  ;;  %v6021_v38 = vld [vmem:[%s6397_s24 + $0x30] ss:$24 sps:$4 sm:$0xff]   ;;  %v6025_v42 = vld [vmem:[%s6397_s24 + $0x64] ss:$24 sps:$4 sm:$0xff]   ;;  %v6030_v47 = vld [vmem:[%s6397_s24 + $0x60] ss:$24 sps:$4 sm:$0xff]  }
  0x14   : > { %5266 = vmatpush3.bf16.msra.mxu0 %v5993_v14  ;;  %v6022_v41 = vld [vmem:[%s6397_s24 + $0x38] ss:$24 sps:$4 sm:$0xff]   ;;  %v6027_v43 = vld [vmem:[%s6397_s24 + $0x6c] ss:$24 sps:$4 sm:$0xff]   ;;  %v6031_v48 = vld [vmem:[%s6397_s24 + $0x68] ss:$24 sps:$4 sm:$0xff]  }
  0x15   : > { %5324 = vmatpush3.bf16.msra.mxu1 %v5994_v15  ;;  %5267 = vmatprep.subr.bf16.mxu0 %v5995_v16  ;;  %v6033_v46 = vld [vmem:[%s7820_s2 + $0x150] sm:$0xff]   ;;  %v6041_v52 = vld [vmem:[%s7820_s2 + $0x158] sm:$0xff]   ;;  %v6049_v54 = vld [vmem:[%s7820_s2 + $0x160] sm:$0xff]  }
  0x16   : > { %5325 = vmatprep.subr.bf16.mxu1 %v5996_v17  ;;  %v6038_v49 = vld [vmem:[%s7820_s2 + $0x110] sm:$0xff]   ;;  %v6042_v53 = vld [vmem:[%s7820_s2 + $0x118] sm:$0xff]   ;;  %v6050_v55 = vld [vmem:[%s7820_s2 + $0x120] sm:$0xff]  }
  0x17   : > { %v6034_v50 = vld [vmem:[%s6397_s24 + $0x94] ss:$24 sps:$4 sm:$0xff]   ;;  %v6039_v56 = vld [vmem:[%s6397_s24 + $0x90] ss:$24 sps:$4 sm:$0xff]   ;;  %v6043_v58 = vld [vmem:[%s6397_s24 + $0xc4] ss:$24 sps:$4 sm:$0xff]  }
  0x18   : > { %5268 = vmatpush3.bf16.msra.mxu0 %v5997_v18  ;;  %v6036_v51 = vld [vmem:[%s6397_s24 + $0x9c] ss:$24 sps:$4 sm:$0xff]   ;;  %v6040_v57 = vld [vmem:[%s6397_s24 + $0x98] ss:$24 sps:$4 sm:$0xff]   ;;  %v6045_v59 = vld [vmem:[%s6397_s24 + $0xcc] ss:$24 sps:$4 sm:$0xff]  }
  0x19   : > { %5326 = vmatpush3.bf16.msra.mxu1 %v5998_v19  ;;  %5269 = vmatprep.subr.bf16.mxu0 %v5999_v20  ;;  %v6057_v60 = vld [vmem:[%s7820_s2 + $0x168] sm:$0xff]   ;;  %v6063_v62 = vld [vmem:[%s7820_s2 + $0x170] sm:$0xff]   ;;  %v6047_v63 = vld [vmem:[%s6397_s24 + $0xc0] ss:$24 sps:$4 sm:$0xff]  }
  0x1a   : > { %5327 = vmatprep.subr.bf16.mxu1 %v6000_v21  ;;  %v6058_v61 = vld [vmem:[%s7820_s2 + $0x128] sm:$0xff]   ;;  %v6064_v0 = vld [vmem:[%s7820_s2 + $0x130] sm:$0xff]   ;;  %v6065_v1 = vld [vmem:[%s7820_s2 + $0x178] sm:$0xff]  }
  0x1b   : > { %v6048_v2 = vld [vmem:[%s6397_s24 + $0xc8] ss:$24 sps:$4 sm:$0xff]   ;;  %v6051_v3 = vld [vmem:[%s6397_s24 + $0xf4] ss:$24 sps:$4 sm:$0xff]   ;;  %v6066_v5 = vld [vmem:[%s7820_s2 + $0x138] sm:$0xff]  }
  0x1c   : > { %5270 = vmatpush3.bf16.msra.mxu0 %v6001_v22  ;;  %v6053_v4 = vld [vmem:[%s6397_s24 + $0xfc] ss:$24 sps:$4 sm:$0xff]   ;;  %v412_v6 = vld [vmem:[%s6397_s24 + $0x120] sm:$0x33]  ;;  %v413_v7 = vld [vmem:[%s6397_s24 + $0x128] sm:$0x33] }
  0x1d   : > { %5328 = vmatpush3.bf16.msra.mxu1 %v6002_v23  ;;  %5271 = vmatprep.subr.bf16.mxu0 %v6003_v24  ;;  %v6055_v8 = vld [vmem:[%s6397_s24 + $0xf0] ss:$24 sps:$4 sm:$0xff]   ;;  %v4991_v10 = vcombine.high %v412_v6, %v412_v6  ;;  %v4993_v11 = vcombine.high %v413_v7, %v413_v7  ;;  %v6069_v12 = vld [vmem:[%s6397_s24 + $0x14] ss:$24 sps:$4 sm:$0xff]   ;;  %v4990_v13 = vcombine.low %v412_v6, %v412_v6  ;;  %v6070_v16 = vld [vmem:[%s6397_s24 + $0x44] ss:$24 sps:$4 sm:$0xff]  }
  0x1e   : > { %5329 = vmatprep.subr.bf16.mxu1 %v6004_v25  ;;  %v6056_v9 = vld [vmem:[%s6397_s24 + $0xf8] ss:$24 sps:$4 sm:$0xff]   ;;  %v4992_v14 = vcombine.low %v413_v7, %v413_v7  ;;  %v6073_v18 = vld [vmem:[%s6397_s24 + $0x74] ss:$24 sps:$4 sm:$0xff]   ;;  %v6076_v20 = vld [vmem:[%s6397_s24 + $0xa4] ss:$24 sps:$4 sm:$0xff]  }
  0x1f   : > { %v6067_v15 = vld [vmem:[%s6397_s24 + $0x10] ss:$24 sps:$4 sm:$0xff]   ;;  %v6072_v17 = vld [vmem:[%s6397_s24 + $0x40] ss:$24 sps:$4 sm:$0xff]   ;;  %v6079_v22 = vld [vmem:[%s6397_s24 + $0xd4] ss:$24 sps:$4 sm:$0xff]  }
  0x20   : > { %5272 = vmatpush3.bf16.msra.mxu0 %v6005_v26  ;;  %v6075_v19 = vld [vmem:[%s6397_s24 + $0x70] ss:$24 sps:$4 sm:$0xff]   ;;  %v6078_v21 = vld [vmem:[%s6397_s24 + $0xa0] ss:$24 sps:$4 sm:$0xff]   ;;  %v6082_v24 = vld [vmem:[%s6397_s24 + $0x104] ss:$24 sps:$4 sm:$0xff]  }
  0x21   : > { %5330 = vmatpush3.bf16.msra.mxu1 %v6006_v27  ;;  %5273 = vmatprep.subr.bf16.mxu0 %v6007_v28  ;;  %v6081_v23 = vld [vmem:[%s6397_s24 + $0xd0] ss:$24 sps:$4 sm:$0xff]   ;;  %v6084_v26 = vld [vmem:[%s6397_s24 + $0x100] ss:$24 sps:$4 sm:$0xff]  }
  0x22   : > { %5331 = vmatprep.subr.bf16.mxu1 %v6008_v29  ;;  %v414_v25 = vld [vmem:[%s6397_s24 + $0x130] sm:$0x33]  ;;  %s6225_s24 = smov 96  }
  0x23   : > { %v4995_v27 = vcombine.high %v414_v25, %v414_v25  ;;  %v4994_v28 = vcombine.low %v414_v25, %v414_v25 }
  0x24   : > { %5274 = vmatpush3.bf16.msra.mxu0 %v6009_v30 }
  0x25   : > { %5332 = vmatpush3.bf16.msra.mxu1 %v6010_v31  ;;  %5375 = vmatprep.subr.bf16.mxu0 %v6023_v39 }
  0x27   : > { %1033 = vmatmul.mubr.bf16.vlgmr.msra.gmra.mrb[0].mxu0 %v6011_v32 }
  0x28   : > { %1121 = vmatmul.mubr.bf16.vlgmr.msra.gmra.mrb[0].mxu1 %v6014_v34  ;;  %1040 = vmatprep.mubr.bf16.mxu0 %v6017_v36 }
  0x29   : > { %1128 = vmatprep.mubr.bf16.mxu1 %v6019_v37  ;;  %5376 = vmatpush3.bf16.msra.mxu0 %v6024_v40 }
  0x2a   : > { %5377 = vmatprep.subr.bf16.mxu0 %v6029_v44 }
  0x2d   : > { %5378 = vmatpush3.bf16.msra.mxu0 %v6032_v45 }
  0x2e   : > { %5379 = vmatprep.subr.bf16.mxu0 %v6033_v46 }
  0x2f   : > { %1041 = vmatmul.mubr.bf16.gmra.mrb[4].mxu0 %v6021_v38 }
  0x30   : > { %1129 = vmatmul.mubr.bf16.gmra.mrb[4].mxu1 %v6022_v41  ;;  %1048 = vmatprep.mubr.bf16.mxu0 %v6025_v42 }
  0x31   : > { %1136 = vmatprep.mubr.bf16.mxu1 %v6027_v43  ;;  %5380 = vmatpush3.bf16.msra.mxu0 %v6038_v49 }
  0x32   : > { %5381 = vmatprep.subr.bf16.mxu0 %v6041_v52 }
  0x35   : > { %5382 = vmatpush3.bf16.msra.mxu0 %v6042_v53 }
  0x36   : > { %5383 = vmatprep.subr.bf16.mxu0 %v6049_v54 }
  0x37   : > { %1049 = vmatmul.mubr.bf16.gmra.mrb[8].mxu0 %v6030_v47 }
  0x38   : > { %1137 = vmatmul.mubr.bf16.gmra.mrb[8].mxu1 %v6031_v48  ;;  %1056 = vmatprep.mubr.bf16.mxu0 %v6034_v50 }
  0x39   : > { %1144 = vmatprep.mubr.bf16.mxu1 %v6036_v51  ;;  %5384 = vmatpush3.bf16.msra.mxu0 %v6050_v55 }
  0x3a   : > { %5385 = vmatprep.subr.bf16.mxu0 %v6057_v60 }
  0x3d   : > { %5386 = vmatpush3.bf16.msra.mxu0 %v6058_v61 }
  0x3e   : > { %5387 = vmatprep.subr.bf16.mxu0 %v6063_v62 }
  0x3f   : > { %1057 = vmatmul.mubr.bf16.gmra.mrb[12].mxu0 %v6039_v56 }
  0x40   : > { %1145 = vmatmul.mubr.bf16.gmra.mrb[12].mxu1 %v6040_v57  ;;  %1064 = vmatprep.mubr.bf16.mxu0 %v6043_v58 }
  0x41   : > { %1152 = vmatprep.mubr.bf16.mxu1 %v6045_v59  ;;  %5388 = vmatpush3.bf16.msra.mxu0 %v6064_v0 }
  0x42   : > { %5389 = vmatprep.subr.bf16.mxu0 %v6065_v1 }
  0x45   : > { %5390 = vmatpush3.bf16.msra.mxu0 %v6066_v5 }
  0x47   : > { %1065 = vmatmul.mubr.bf16.gmra.mrb[16].mxu0 %v6047_v63 }
  0x48   : > { %1153 = vmatmul.mubr.bf16.gmra.mrb[16].mxu1 %v6048_v2  ;;  %1072 = vmatprep.mubr.bf16.mxu0 %v6051_v3 }
  0x49   : > { %1160 = vmatprep.mubr.bf16.mxu1 %v6053_v4 }
  0x4f   : > { %1073 = vmatmul.mubr.bf16.gmra.mrb[20].mxu0 %v6055_v8 }
  0x50   : > { %1161 = vmatmul.mubr.bf16.gmra.mrb[20].mxu1 %v6056_v9  ;;  %1080 = vmatprep.mubr.bf16.mxu0 %v4991_v10 }
  0x51   : > { %1168 = vmatprep.mubr.bf16.mxu1 %v4993_v11 }
  0x57   : > { %1081 = vmatmul.mubr.bf16.gmra.mrb[24].mxu0 %v4990_v13 }
  0x58   : > { %1169 = vmatmul.mubr.bf16.gmra.mrb[24].mxu1 %v4992_v14  ;;  %1208 = vmatprep.mubr.bf16.mxu0 %v6069_v12 }
  0x5f   : > { %1209 = vmatmul.mubr.bf16.vlgmr.msra.gmra.mrb[28].mxu0 %v6067_v15 }
  0x60   : > { %1216 = vmatprep.mubr.bf16.mxu0 %v6070_v16 }
  0x67   : > { %1217 = vmatmul.mubr.bf16.gmra.mrb[32].mxu0 %v6072_v17 }
  0x68   : > { %1224 = vmatprep.mubr.bf16.mxu0 %v6073_v18 }
  0x6f   : > { %1225 = vmatmul.mubr.bf16.gmra.mrb[36].mxu0 %v6075_v19 }
  0x70   : > { %1232 = vmatprep.mubr.bf16.mxu0 %v6076_v20 }
  0x77   : > { %1233 = vmatmul.mubr.bf16.gmra.mrb[40].mxu0 %v6078_v21 }
  0x78   : > { %1240 = vmatprep.mubr.bf16.mxu0 %v6079_v22 }
  0x7f   : > { %1241 = vmatmul.mubr.bf16.gmra.mrb[44].mxu0 %v6081_v23 }
  0x80   : > { %1248 = vmatprep.mubr.bf16.mxu0 %v6082_v24 }
  0x87   : > { %1249 = vmatmul.mubr.bf16.gmra.mrb[48].mxu0 %v6084_v26 }
  0x88   : > { %1256 = vmatprep.mubr.bf16.mxu0 %v4995_v27 }
  0x8f   : > { %1257 = vmatmul.mubr.bf16.gmra.mrb[52].mxu0 %v4994_v28 }
  0xfa   : > { %v5275_v29 = vpop.f32.mrb[0].mxu0 }
  0xfb   : > { %v5333_v30 = vpop.f32.mrb[0].mxu1  ;;  %v5276_v31 = vpop.f32.mrb[1].mxu0 }
  0xfc   : > { %v5277_v32 = vadd.f32 %v5276_v31, %v5275_v29  ;;  %v5334_v33 = vpop.f32.mrb[1].mxu1  ;;  %v5278_v34 = vpop.f32.mrb[2].mxu0 }
  0xfd   : > { %v5335_v35 = vadd.f32 %v5334_v33, %v5333_v30  ;;  %v5336_v36 = vpop.f32.mrb[2].mxu1  ;;  %v5279_v37 = vpop.f32.mrb[3].mxu0 }
  0xfe   : > { %v5280_v38 = vadd.f32 %v5279_v37, %v5278_v34  ;;  %v5337_v39 = vpop.f32.mrb[3].mxu1 }
  0xff   : > { %v6492_v40 = vadd.f32 %v5335_v35, %v5277_v32  ;;  %v5338_v41 = vadd.f32 %v5337_v39, %v5336_v36 }
 0x101   : > { %v6494_v42 = vadd.f32 %v5338_v41, %v5280_v38 }
 0x102   : > { %v5281_v43 = vpop.f32.mrb[4].mxu0 }
 0x103   : > { %v5339_v44 = vpop.f32.mrb[4].mxu1  ;;  %v5282_v45 = vpop.f32.mrb[5].mxu0 }
 0x104   : > { %v5283_v46 = vadd.f32 %v5282_v45, %v5281_v43  ;;  %v5340_v47 = vpop.f32.mrb[5].mxu1  ;;  %v5284_v48 = vpop.f32.mrb[6].mxu0 }
 0x105   : > { %v5341_v49 = vadd.f32 %v5340_v47, %v5339_v44  ;;  %v5342_v50 = vpop.f32.mrb[6].mxu1  ;;  %v5285_v51 = vpop.f32.mrb[7].mxu0 }
 0x106   : > { %v5286_v52 = vadd.f32 %v5285_v51, %v5284_v48  ;;  %v5343_v53 = vpop.f32.mrb[7].mxu1 }
 0x107   : > { %v6496_v54 = vadd.f32 %v5341_v49, %v5283_v46  ;;  %v5344_v55 = vadd.f32 %v5343_v53, %v5342_v50 }
 0x109   : > { %v6498_v56 = vadd.f32 %v5344_v55, %v5286_v52 }
 0x10a   : > { %v5287_v57 = vpop.f32.mrb[8].mxu0 }
 0x10b   : > { %v5345_v58 = vpop.f32.mrb[8].mxu1  ;;  %v5288_v59 = vpop.f32.mrb[9].mxu0 }
 0x10c   : > { %v5289_v60 = vadd.f32 %v5288_v59, %v5287_v57  ;;  %v5346_v61 = vpop.f32.mrb[9].mxu1  ;;  %v5290_v62 = vpop.f32.mrb[10].mxu0 }
 0x10d   : > { %v5347_v63 = vadd.f32 %v5346_v61, %v5345_v58  ;;  %v5348_v0 = vpop.f32.mrb[10].mxu1  ;;  %v5291_v1 = vpop.f32.mrb[11].mxu0 }
 0x10e   : > { %v5292_v2 = vadd.f32 %v5291_v1, %v5290_v62  ;;  %v5349_v3 = vpop.f32.mrb[11].mxu1 }
 0x10f   : > { %v6500_v4 = vadd.f32 %v5347_v63, %v5289_v60  ;;  %v5350_v5 = vadd.f32 %v5349_v3, %v5348_v0 }
 0x111   : > { %v6502_v6 = vadd.f32 %v5350_v5, %v5292_v2 }
 0x112   : > { %v5293_v7 = vpop.f32.mrb[12].mxu0 }
 0x113   : > { %v5351_v8 = vpop.f32.mrb[12].mxu1  ;;  %v5294_v9 = vpop.f32.mrb[13].mxu0 }
 0x114   : > { %v5295_v10 = vadd.f32 %v5294_v9, %v5293_v7  ;;  %v5352_v11 = vpop.f32.mrb[13].mxu1  ;;  %v5296_v12 = vpop.f32.mrb[14].mxu0 }
 0x115   : > { %v5353_v13 = vadd.f32 %v5352_v11, %v5351_v8  ;;  %v5354_v14 = vpop.f32.mrb[14].mxu1  ;;  %v5297_v15 = vpop.f32.mrb[15].mxu0 }
 0x116   : > { %v5298_v16 = vadd.f32 %v5297_v15, %v5296_v12  ;;  %v5355_v17 = vpop.f32.mrb[15].mxu1 }
 0x117   : > { %v6504_v18 = vadd.f32 %v5353_v13, %v5295_v10  ;;  %v5356_v19 = vadd.f32 %v5355_v17, %v5354_v14 }
 0x119   : > { %v6506_v20 = vadd.f32 %v5356_v19, %v5298_v16 }
 0x11a   : > { %v5299_v21 = vpop.f32.mrb[16].mxu0 }
 0x11b   : > { %v5357_v22 = vpop.f32.mrb[16].mxu1  ;;  %v5300_v23 = vpop.f32.mrb[17].mxu0 }
 0x11c   : > { %v5301_v24 = vadd.f32 %v5300_v23, %v5299_v21  ;;  %v5358_v25 = vpop.f32.mrb[17].mxu1  ;;  %v5302_v26 = vpop.f32.mrb[18].mxu0 }
 0x11d   : > { %v5359_v27 = vadd.f32 %v5358_v25, %v5357_v22  ;;  %v5360_v28 = vpop.f32.mrb[18].mxu1  ;;  %v5303_v29 = vpop.f32.mrb[19].mxu0 }
 0x11e   : > { %v5304_v30 = vadd.f32 %v5303_v29, %v5302_v26  ;;  %v5361_v31 = vpop.f32.mrb[19].mxu1 }
 0x11f   : > { %v6508_v32 = vadd.f32 %v5359_v27, %v5301_v24  ;;  %v5362_v33 = vadd.f32 %v5361_v31, %v5360_v28 }
 0x121   : > { %v6510_v34 = vadd.f32 %v5362_v33, %v5304_v30 }
 0x122   : > { %v5305_v35 = vpop.f32.mrb[20].mxu0 }
 0x123   : > { %v5363_v36 = vpop.f32.mrb[20].mxu1  ;;  %v5306_v37 = vpop.f32.mrb[21].mxu0 }
 0x124   : > { %v5307_v38 = vadd.f32 %v5306_v37, %v5305_v35  ;;  %v5364_v39 = vpop.f32.mrb[21].mxu1  ;;  %v5308_v41 = vpop.f32.mrb[22].mxu0 }
 0x125   : > { %v5365_v43 = vadd.f32 %v5364_v39, %v5363_v36  ;;  %v5366_v44 = vpop.f32.mrb[22].mxu1  ;;  %v5309_v45 = vpop.f32.mrb[23].mxu0 }
 0x126   : > { %v5310_v46 = vadd.f32 %v5309_v45, %v5308_v41  ;;  %v5367_v47 = vpop.f32.mrb[23].mxu1 }
 0x127   : > { %v6512_v48 = vadd.f32 %v5365_v43, %v5307_v38  ;;  %v5368_v49 = vadd.f32 %v5367_v47, %v5366_v44 }
 0x129   : > { %v6514_v50 = vadd.f32 %v5368_v49, %v5310_v46 }
 0x12a   : > { %v5311_v51 = vpop.f32.mrb[24].mxu0 }
 0x12b   : > { %v5369_v52 = vpop.f32.mrb[24].mxu1  ;;  %v5312_v53 = vpop.f32.mrb[25].mxu0 }
 0x12c   : > { %v5313_v55 = vadd.f32 %v5312_v53, %v5311_v51  ;;  %v5370_v57 = vpop.f32.mrb[25].mxu1  ;;  %v5314_v58 = vpop.f32.mrb[26].mxu0 }
 0x12d   : > { %v5371_v59 = vadd.f32 %v5370_v57, %v5369_v52  ;;  %v5315_v60 = vpop.f32.mrb[27].mxu0  ;;  %v5372_v61 = vpop.f32.mrb[26].mxu1 }
 0x12e   : > { %v5373_v62 = vpop.f32.mrb[27].mxu1 }
 0x12f   : > { %v6516_v63 = vadd.f32 %v5371_v59, %v5313_v55 }
 0x132   : > { %v5391_v0 = vpop.f32.mrb[28].mxu0 }
 0x133   : > { %v5392_v1 = vpop.f32.mrb[29].mxu0 }
 0x134   : > { %v5393_v2 = vadd.f32 %v5392_v1, %v5391_v0  ;;  %v5394_v3 = vpop.f32.mrb[30].mxu0 }
 0x135   : > { %v5395_v5 = vpop.f32.mrb[31].mxu0 }
 0x136   : > { %v5396_v7 = vadd.f32 %v5395_v5, %v5394_v3  ;;  %v6519_v8 = vadd.f32 %v5393_v2, %v6492_v40 }
 0x138   : > { %v6522_v9 = vadd.f32 %v5396_v7, %v6494_v42  ;;  %1277 = vrot.lane.b32.xlu0 %v6519_v8, %s6225_s24  ;;  %v7829_v7 = vlaneseq }
 0x13a   : > { %v5397_v10 = vpop.f32.mrb[32].mxu0 }
 0x13b   : > { %v5398_v11 = vpop.f32.mrb[33].mxu0 }
 0x13c   : > { %v5399_v12 = vadd.f32 %v5398_v11, %v5397_v10  ;;  %v5400_v13 = vpop.f32.mrb[34].mxu0  ;;  %1279 = vrot.lane.b32.xlu0 %v6522_v9, %s6225_s24 }
 0x13d   : > { %v5401_v14 = vpop.f32.mrb[35].mxu0 }
 0x13e   : > { %v5402_v15 = vadd.f32 %v5401_v14, %v5400_v13  ;;  %v1219_v16 = vadd.f32 %v5399_v12, %v6496_v54 }
 0x140   : > { %v1222_v40 = vadd.f32 %v5402_v15, %v6498_v56  ;;  %1281 = vrot.lane.b32.xlu1 %v1219_v16, %s6225_s24 }
 0x142   : > { %v5403_v42 = vpop.f32.mrb[36].mxu0 }
 0x143   : > { %v5404_v17 = vpop.f32.mrb[37].mxu0 }
 0x144   : > { %v5405_v19 = vadd.f32 %v5404_v17, %v5403_v42  ;;  %v5406_v21 = vpop.f32.mrb[38].mxu0  ;;  %1283 = vrot.lane.b32.xlu1 %v1222_v40, %s6225_s24 }
 0x145   : > { %v5407_v22 = vpop.f32.mrb[39].mxu0 }
 0x146   : > { %v1227_v23 = vadd.f32 %v5405_v19, %v6500_v4  ;;  %v5408_v24 = vadd.f32 %v5407_v22, %v5406_v21 }
 0x148   : > { %v1230_v25 = vadd.f32 %v5408_v24, %v6502_v6  ;;  %1285 = vrot.lane.b32.xlu0 %v1227_v23, %s6225_s24 }
 0x14a   : > { %v5409_v26 = vpop.f32.mrb[40].mxu0  ;;  %1287 = vrot.lane.b32.xlu1 %v1230_v25, %s6225_s24 }
 0x14b   : > { %v5410_v54 = vpop.f32.mrb[41].mxu0 }
 0x14c   : > { %v5411_v56 = vadd.f32 %v5410_v54, %v5409_v26  ;;  %v5412_v27 = vpop.f32.mrb[42].mxu0 }
 0x14d   : > { %v5413_v28 = vpop.f32.mrb[43].mxu0 }
 0x14e   : > { %v1235_v29 = vadd.f32 %v5411_v56, %v6504_v18  ;;  %v5414_v30 = vadd.f32 %v5413_v28, %v5412_v27 }
 0x150   : > { %v1238_v31 = vadd.f32 %v5414_v30, %v6506_v20  ;;  %1289 = vrot.lane.b32.xlu0 %v1235_v29, %s6225_s24 }
 0x152   : > { %v5415_v4 = vpop.f32.mrb[44].mxu0  ;;  %1291 = vrot.lane.b32.xlu1 %v1238_v31, %s6225_s24 }
 0x153   : > { %v5416_v6 = vpop.f32.mrb[45].mxu0 }
 0x154   : > { %v5417_v33 = vadd.f32 %v5416_v6, %v5415_v4  ;;  %v5418_v35 = vpop.f32.mrb[46].mxu0 }
 0x155   : > { %v5419_v36 = vpop.f32.mrb[47].mxu0 }
 0x156   : > { %v1243_v37 = vadd.f32 %v5417_v33, %v6508_v32  ;;  %v5420_v38 = vadd.f32 %v5419_v36, %v5418_v35 }
 0x158   : > { %v1246_v39 = vadd.f32 %v5420_v38, %v6510_v34  ;;  %1293 = vrot.lane.b32.xlu0 %v1243_v37, %s6225_s24 }
 0x15a   : > { %v5421_v18 = vpop.f32.mrb[48].mxu0  ;;  %1295 = vrot.lane.b32.xlu1 %v1246_v39, %s6225_s24 }
 0x15b   : > { %v5422_v20 = vpop.f32.mrb[49].mxu0 }
 0x15c   : > { %v5423_v41 = vadd.f32 %v5422_v20, %v5421_v18  ;;  %v5424_v43 = vpop.f32.mrb[50].mxu0 }
 0x15d   : > { %v5425_v44 = vpop.f32.mrb[51].mxu0 }
 0x15e   : > { %v6545_v45 = vadd.f32 %v5423_v41, %v6512_v48  ;;  %v5426_v46 = vadd.f32 %v5425_v44, %v5424_v43  ;;  %v7830_v41 = vmov 0.0  }
 0x15f   : > { %5678 = vmatprep.subr.bf16.mxu0 %v7830_v41 }
 0x160   : > { %v6548_v47 = vadd.f32 %v5426_v46, %v6514_v50  ;;  %1297 = vrot.lane.b32.xlu0 %v6545_v45, %s6225_s24 }
 0x162   : > { %v5427_v32 = vpop.f32.mrb[52].mxu0  ;;  %1299 = vrot.lane.b32.xlu1 %v6548_v47, %s6225_s24 }
 0x163   : > { %v5428_v34 = vpop.f32.mrb[53].mxu0 }
 0x164   : > { %v5429_v49 = vadd.f32 %v5428_v34, %v5427_v32  ;;  %v5430_v51 = vpop.f32.mrb[54].mxu0 }
 0x165   : > { %v5431_v52 = vpop.f32.mrb[55].mxu0 }
 0x166   : > { %v6555_v53 = vadd.f32 %v5429_v49, %v6516_v63 }
 0x168   : > { %1301 = vrot.lane.b32.xlu0 %v6555_v53, %s6225_s24 }
 0x1aa   : > { %v1278_v48 = vpop.permute.xlu0 %1277 }
 0x1ab   : > { %v6560_v50 = vmax.f32 %v6519_v8, %v1278_v48 }
 0x1ad   : > { %1342 = vrot.lane.b32.xlu1 %v6560_v50, %s6226_s27 }
 0x1ae   : > { %v1280_v55 = vpop.permute.xlu0 %1279 }
 0x1af   : > { %v6565_v57 = vmax.f32 %v6522_v9, %v1280_v55  ;;  %v6592_v9 = vshrl.u32 %v7829_v7, 7 }
 0x1b1   : > { %1344 = vrot.lane.b32.xlu0 %v6565_v57, %s6226_s27  ;;  %v6597_v10 = vadd.s32 8, %v6592_v9  ;;  %v1499_v12 = vand.u32 15, %v6592_v9  ;;  %v6636_v32 = vadd.s32 16, %v6592_v9  ;;  %v6639_v34 = vadd.s32 24, %v6592_v9 }
 0x1b2   : > { %v1282_v58 = vpop.permute.xlu1 %1281 }
 0x1b3   : > { %v6569_v59 = vmax.f32 %v1219_v16, %v1282_v58  ;;  %v1500_v13 = vand.u32 15, %v6597_v10  ;;  %v1467_v16 = vshra.s32 %v6592_v9, 4  ;;  %v1595_v42 = vshra.s32 %v1499_v12, 2 }
 0x1b4   : > { %v1501_v49 = vand.u32 15, %v6636_v32  ;;  %v1469_v51 = vshra.s32 %v6636_v32, 4  ;;  %v1502_v52 = vand.u32 15, %v6639_v34  ;;  %v1470_v48 = vshra.s32 %v6639_v34, 4 }
 0x1b5   : > { %1346 = vrot.lane.b32.xlu1 %v6569_v59, %s6226_s27  ;;  %v1596_v17 = vshra.s32 %v1500_v13, 2  ;;  %v1531_v21 = vshra.s32 %v1467_v16, 2  ;;  %v1628_v26 = vand.u32 3, %v1500_v13  ;;  %v1563_v33 = vand.u32 3, %v1467_v16 }
 0x1b6   : > { %v1284_v60 = vpop.permute.xlu1 %1283  ;;  %v1533_v55 = vshra.s32 %v1469_v51, 2  ;;  %v1598_v58 = vshra.s32 %v1502_v52, 2  ;;  %v1630_v13 = vand.u32 3, %v1502_v52  ;;  %v6651_v16 = vadd.s32 48, %v6592_v9 }
 0x1b7   : > { %v6573_v61 = vmax.f32 %v1222_v40, %v1284_v60  ;;  %v1468_v40 = vshra.s32 %v6597_v10, 4  ;;  %v1660_v24 = vmul.u32 2, %v1596_v17  ;;  %v1756_v4 = vmul.u32 2, %v1628_v26 }
 0x1b8   : > { %v1505_v26 = vand.u32 15, %v6651_v16 }
 0x1b9   : > { %1348 = vrot.lane.b32.xlu0 %v6573_v61, %s6226_s27  ;;  %v1532_v22 = vshra.s32 %v1468_v40, 2  ;;  %v1564_v35 = vand.u32 3, %v1468_v40 }
 0x1ba   : > { %v1286_v62 = vpop.permute.xlu0 %1285 }
 0x1bb   : > { %v6577_v63 = vmax.f32 %v1227_v23, %v1286_v62  ;;  %v1659_v23 = vmul.u32 2, %v1595_v42  ;;  %v1692_v56 = vadd.s32 %v1660_v24, %v1532_v22  ;;  %v6646_v62 = vadd.s32 32, %v6592_v9 }
 0x1bc   : > { %v1288_v0 = vpop.permute.xlu1 %1287  ;;  %v1565_v24 = vand.u32 3, %v1469_v51 }
 0x1bd   : > { %v6579_v1 = vmax.f32 %v1230_v25, %v1288_v0  ;;  %1350 = vrot.lane.b32.xlu1 %v6577_v63, %s6226_s27  ;;  %v1627_v25 = vand.u32 3, %v1499_v12  ;;  %v1691_v54 = vadd.s32 %v1659_v23, %v1531_v21  ;;  %v1534_v0 = vshra.s32 %v1470_v48, 2 }
 0x1be   : > { %v1438_v12 = vadd.s32 40, %v6592_v9  ;;  %v6654_v21 = vadd.s32 56, %v6592_v9  ;;  %v1471_v22 = vshra.s32 %v6646_v62, 4 }
 0x1bf   : > { %1352 = vrot.lane.b32.xlu0 %v6579_v1, %s6226_s27  ;;  %v1723_v28 = vmul.u32 10, %v1691_v54 }
 0x1c0   : > { %v1504_v23 = vand.u32 15, %v1438_v12 }
 0x1c2   : > { %v1290_v2 = vpop.permute.xlu0 %1289 }
 0x1c3   : > { %v6585_v3 = vmax.f32 %v1235_v29, %v1290_v2  ;;  %v1724_v29 = vmul.u32 10, %v1692_v56  ;;  %v1629_v2 = vand.u32 3, %v1501_v49  ;;  %v1758_v56 = vmul.u32 2, %v1630_v13 }
 0x1c4   : > { %v1292_v5 = vpop.permute.xlu1 %1291  ;;  %v6672_v13 = vadd.s32 80, %v6592_v9 }
 0x1c5   : > { %v6587_v8 = vmax.f32 %v1238_v31, %v1292_v5  ;;  %1354 = vrot.lane.b32.xlu1 %v6585_v3, %s6226_s27  ;;  %v1755_v31 = vmul.u32 2, %v1627_v25  ;;  %v1788_v38 = vadd.s32 %v1756_v4, %v1724_v29  ;;  %v1662_v5 = vmul.u32 2, %v1598_v58 }
 0x1c6   : > { %v1757_v17 = vmul.u32 2, %v1629_v2  ;;  %v6660_v29 = vadd.s32 64, %v6592_v9  ;;  %v1472_v4 = vshra.s32 %v1438_v12, 4 }
 0x1c7   : > { %1356 = vrot.lane.b32.xlu0 %v6587_v8, %s6226_s27  ;;  %v1820_v20 = vadd.s32 %v1788_v38, %v1564_v35  ;;  %v1694_v40 = vadd.s32 %v1662_v5, %v1534_v0  ;;  %v1601_v38 = vshra.s32 %v1505_v26, 2  ;;  %v1632_v5 = vand.u32 3, %v1504_v23 }
 0x1c9   : > { %v1726_v54 = vmul.u32 10, %v1694_v40  ;;  %v1633_v40 = vand.u32 3, %v1505_v26 }
 0x1ca   : > { %v1294_v11 = vpop.permute.xlu0 %1293 }
 0x1cb   : > { %v6601_v14 = vmax.f32 %v1243_v37, %v1294_v11  ;;  %v1787_v37 = vadd.s32 %v1755_v31, %v1723_v28  ;;  %v1506_v28 = vand.u32 15, %v6654_v21  ;;  %v1566_v31 = vand.u32 3, %v1470_v48 }
 0x1cc   : > { %v1296_v15 = vpop.permute.xlu1 %1295 }
 0x1cd   : > { %v6605_v19 = vmax.f32 %v1246_v39, %v1296_v15  ;;  %1358 = vrot.lane.b32.xlu1 %v6601_v14, %s6226_s27  ;;  %v6620_v39 = vand.u32 127, %v7829_v7  ;;  %v1819_v18 = vadd.s32 %v1787_v37, %v1563_v33  ;;  %v1503_v15 = vand.u32 15, %v6646_v62 }
 0x1ce   : > { %v1600_v33 = vshra.s32 %v1504_v23, 2  ;;  %v1473_v37 = vshra.s32 %v6651_v16, 4 }
 0x1cf   : > { %1360 = vrot.lane.b32.xlu0 %v6605_v19, %s6226_s27  ;;  %vm1851_vm0 = vcmp.eq.s32.totalorder %v6620_v39, %v1819_v18  ;;  %vm1852_vm1 = vcmp.eq.s32.totalorder %v6620_v39, %v1820_v20  ;;  %v1599_v25 = vshra.s32 %v1503_v15, 2  ;;  %v6664_v18 = vadd.s32 72, %v6592_v9 }
 0x1d0   : > { %v5045_v44 = vsel %vm1851_vm0, 1.0, %v7830_v41  ;;  %v1790_v20 = vadd.s32 %v1758_v56, %v1726_v54  ;;  %v1631_v51 = vand.u32 3, %v1503_v15  ;;  %v1664_v52 = vmul.u32 2, %v1600_v33 }
 0x1d1   : > { %v1663_v35 = vmul.u32 2, %v1599_v25  ;;  %v1537_v48 = vshra.s32 %v1473_v37, 2  ;;  %v1508_v58 = vand.u32 15, %v6664_v18  ;;  %v1476_v23 = vshra.s32 %v6664_v18, 4 }
 0x1d2   : > { %v1298_v27 = vpop.permute.xlu0 %1297  ;;  %v1759_v15 = vmul.u32 2, %v1631_v51  ;;  %v1567_v54 = vand.u32 3, %v1471_v22  ;;  %v1568_v56 = vand.u32 3, %v1472_v4 }
 0x1d3   : > { %v6612_v30 = vmax.f32 %v6545_v45, %v1298_v27  ;;  %v5046_v45 = vsel %vm1852_vm1, 1.0, %v7830_v41  ;;  %v1604_v25 = vshra.s32 %v1508_v58, 2 }
 0x1d4   : > { %v1300_v6 = vpop.permute.xlu1 %1299 }
 0x1d5   : > { %v6615_v36 = vmax.f32 %v6548_v47, %v1300_v6  ;;  %1362 = vrot.lane.b32.xlu1 %v6612_v30, %s6226_s27  ;;  %v1947_v47 = vpack.c.bf16 %v5046_v45, %v5045_v44  ;;  %v1535_v6 = vshra.s32 %v1471_v22, 2  ;;  %v1474_v44 = vshra.s32 %v6654_v21, 4 }
 0x1d6   : > { %v1602_v45 = vshra.s32 %v1506_v28, 2 }
 0x1d7   : > { %1364 = vrot.lane.b32.xlu0 %v6615_v36, %s6226_s27  ;;  %5646 = vmatprep.mubr.msk.bf16.mxu1 %vm1963_vm2, %v1947_v47  ;;  %v1507_v47 = vand.u32 15, %v6660_v29  ;;  %v1538_v0 = vshra.s32 %v1474_v44, 2 }
 0x1d8   : > { %v1666_v2 = vmul.u32 2, %v1602_v45 }
 0x1d9   : > { %v1603_v12 = vshra.s32 %v1507_v47, 2 }
 0x1da   : > { %v1302_v43 = vpop.permute.xlu0 %1301 }
 0x1db   : > { %v6630_v46 = vmax.f32 %v6555_v53, %v1302_v43  ;;  %v1597_v53 = vshra.s32 %v1501_v49, 2  ;;  %v1536_v49 = vshra.s32 %v1472_v4, 2  ;;  %v1667_v33 = vmul.u32 2, %v1603_v12 }
 0x1dc   : > { %v1569_v12 = vand.u32 3, %v1473_v37 }
 0x1dd   : > { %1366 = vrot.lane.b32.xlu1 %v6630_v46, %s6226_s27  ;;  %v1661_v60 = vmul.u32 2, %v1597_v53  ;;  %v1695_v53 = vadd.s32 %v1663_v35, %v1535_v6  ;;  %v1696_v16 = vadd.s32 %v1664_v52, %v1536_v49  ;;  %v1760_v6 = vmul.u32 2, %v1632_v5  ;;  %s6229_s27 = smov 18  }
 0x1de   : > { %v1509_v35 = vand.u32 15, %v6672_v13  ;;  %v1668_v49 = vmul.u32 2, %v1604_v25 }
 0x1df   : > { %v1693_v11 = vadd.s32 %v1661_v60, %v1533_v55  ;;  %v1665_v55 = vmul.u32 2, %v1601_v38  ;;  %v1822_v60 = vadd.s32 %v1790_v20, %v1566_v31  ;;  %v1727_v21 = vmul.u32 10, %v1695_v53 }
 0x1e0   : > { %v1698_v31 = vadd.s32 %v1666_v2, %v1538_v0  ;;  %v1728_v38 = vmul.u32 10, %v1696_v16  ;;  %v1761_v20 = vmul.u32 2, %v1633_v40  ;;  %v1477_v0 = vshra.s32 %v6672_v13, 4 }
 0x1e1   : > { %v1725_v42 = vmul.u32 10, %v1693_v11  ;;  %v1475_v11 = vshra.s32 %v6660_v29, 4  ;;  %vm1854_vm4 = vcmp.eq.s32.totalorder %v6620_v39, %v1822_v60  ;;  %v1791_v22 = vadd.s32 %v1759_v15, %v1727_v21 }
 0x1e2   : > { %v1730_v52 = vmul.u32 10, %v1698_v31  ;;  %v1605_v2 = vshra.s32 %v1509_v35, 2  ;;  %v1792_v5 = vadd.s32 %v1760_v6, %v1728_v38 }
 0x1e3   : > { %v1789_v27 = vadd.s32 %v1757_v17, %v1725_v42  ;;  %v6675_v42 = vadd.s32 88, %v6592_v9  ;;  %v6087_v17 = vld [vmem:[%s7821_s3 + $0x10] sm:$0xff]   ;;  %v1539_v26 = vshra.s32 %v1475_v11, 2  ;;  %v1823_v40 = vadd.s32 %v1791_v22, %v1567_v54 }
 0x1e4   : > { %5679 = vmatpush3.bf16.msra.mxu0 %v6087_v17  ;;  %v1669_v13 = vmul.u32 2, %v1605_v2  ;;  %v1824_v37 = vadd.s32 %v1792_v5, %v1568_v56  ;;  %v6713_v56 = vadd.s32 96, %v6592_v9 }
 0x1e5   : > { %v1821_v43 = vadd.s32 %v1789_v27, %v1565_v24  ;;  %v1697_v24 = vadd.s32 %v1665_v55, %v1537_v48  ;;  %v1634_v27 = vand.u32 3, %v1506_v28  ;;  %5680 = vmatprep.subr.bf16.mxu0 %v7830_v41  ;;  %v1510_v45 = vand.u32 15, %v6675_v42 }
 0x1e6   : > { %v1540_v28 = vshra.s32 %v1476_v23, 2  ;;  %v1635_v48 = vand.u32 3, %v1507_v47  ;;  %v6695_v55 = vsel %vm1854_vm4, 1.0, %v7830_v41  ;;  %v1699_v60 = vadd.s32 %v1667_v33, %v1539_v26 }
 0x1e7   : > { %vm1853_vm3 = vcmp.eq.s32.totalorder %v6620_v39, %v1821_v43  ;;  %v1729_v4 = vmul.u32 10, %v1697_v24  ;;  %v1762_v53 = vmul.u32 2, %v1634_v27  ;;  %v1478_v16 = vshra.s32 %v6675_v42, 4 }
 0x1e8   : > { %v6692_v51 = vsel %vm1853_vm3, 1.0, %v7830_v41  ;;  %v1606_v15 = vshra.s32 %v1510_v45, 2  ;;  %v1636_v43 = vand.u32 3, %v1508_v58  ;;  %v1700_v21 = vadd.s32 %v1668_v49, %v1540_v28 }
 0x1e9   : > { %v1793_v17 = vadd.s32 %v1761_v20, %v1729_v4  ;;  %v1570_v24 = vand.u32 3, %v1474_v44  ;;  %v1794_v25 = vadd.s32 %v1762_v53, %v1730_v52  ;;  %v1763_v27 = vmul.u32 2, %v1635_v48  ;;  %v6707_v44 = vld [vmem:[%s7827_s9] ss:$0 sm:$0xff] }
 0x1ea   : > { %v1731_v26 = vmul.u32 10, %v1699_v60  ;;  %v1541_v33 = vshra.s32 %v1477_v0, 2  ;;  %v1542_v38 = vshra.s32 %v1478_v16, 2  ;;  %v1670_v54 = vmul.u32 2, %v1606_v15 }
 0x1eb   : > { %vm1855_vm5 = vcmp.eq.s32.totalorder %v6620_v39, %v1823_v40  ;;  %v1825_v58 = vadd.s32 %v1793_v17, %v1569_v12  ;;  %v1732_v20 = vmul.u32 10, %v1700_v21  ;;  %v1764_v22 = vmul.u32 2, %v1636_v43 }
 0x1ec   : > { %v1826_v4 = vadd.s32 %v1794_v25, %v1570_v24  ;;  %v1571_v28 = vand.u32 3, %v1475_v11  ;;  %v1795_v52 = vadd.s32 %v1763_v27, %v1731_v26  ;;  %v1638_v53 = vand.u32 3, %v1510_v45 }
 0x1ed   : > { %v1701_v48 = vadd.s32 %v1669_v13, %v1541_v33  ;;  %v6716_v60 = vadd.s32 104, %v6592_v9  ;;  %vm1856_vm6 = vcmp.eq.s32.totalorder %v6620_v39, %v1824_v37  ;;  %v1702_v12 = vadd.s32 %v1670_v54, %v1542_v38 }
 0x1ee   : > { %v6724_v29 = vsel %vm1855_vm5, 1.0, %v7830_v41  ;;  %vm1857_vm7 = vcmp.eq.s32.totalorder %v6620_v39, %v1825_v58  ;;  %v1572_v11 = vand.u32 3, %v1476_v23  ;;  %vm1858_vm8 = vcmp.eq.s32.totalorder %v6620_v39, %v1826_v4 }
 0x1ef   : > { %v1827_v43 = vadd.s32 %v1795_v52, %v1571_v28  ;;  %v1733_v21 = vmul.u32 10, %v1701_v48  ;;  %v1766_v24 = vmul.u32 2, %v1638_v53  ;;  %v1512_v40 = vand.u32 15, %v6716_v60 }
 0x1f0   : > { %v1734_v18 = vmul.u32 10, %v1702_v12  ;;  %v6737_v23 = vsel %vm1856_vm6, 1.0, %v7830_v41  ;;  %v6742_v26 = vsel %vm1857_vm7, 1.0, %v7830_v41  ;;  %v6745_v33 = vsel %vm1858_vm8, 1.0, %v7830_v41 }
 0x1f1   : > { %v1573_v38 = vand.u32 3, %v1477_v0  ;;  %v1479_v54 = vshra.s32 %v6713_v56, 4  ;;  %vm1859_vm9 = vcmp.eq.s32.totalorder %v6620_v39, %v1827_v43  ;;  %v1608_v4 = vshra.s32 %v1512_v40, 2 }
 0x1f2   : > { %v1447_v52 = vadd.s32 112, %v6592_v9  ;;  %v1448_v12 = vadd.s32 120, %v6592_v9 }
 0x1f3   : > { %v1543_v48 = vshra.s32 %v1479_v54, 2 }
 0x21f   : > { %v1343_v47 = vpop.permute.xlu1 %1342 }
 0x220   : > { %v1381_v6 = vmax.f32 %v6560_v50, %v1343_v47  ;;  %v1637_v50 = vand.u32 3, %v1509_v35  ;;  %v1796_v35 = vadd.s32 %v1764_v22, %v1732_v20  ;;  %v1480_v22 = vshra.s32 %v6716_v60, 4 }
 0x222   : > { %v1399_v2 = vadd.f32 %v6707_v44, %v1381_v6  ;;  %v1765_v15 = vmul.u32 2, %v1637_v50  ;;  %v1828_v13 = vadd.s32 %v1796_v35, %v1572_v11  ;;  %v1574_v50 = vand.u32 3, %v1478_v16 }
 0x223   : > { %v1345_v49 = vpop.permute.xlu0 %1344 }
 0x224   : > { %v1382_v5 = vmax.f32 %v6565_v57, %v1345_v49  ;;  %v1511_v57 = vand.u32 15, %v6713_v56  ;;  %v1412_v25 = vmax.f32 %v1399_v2, 0.0  ;;  %v1797_v37 = vadd.s32 %v1765_v15, %v1733_v21 }
 0x225   : > { %v1798_v49 = vadd.s32 %v1766_v24, %v1734_v18  ;;  %vm1860_vm10 = vcmp.eq.s32.totalorder %v6620_v39, %v1828_v13  ;;  %v1544_v2 = vshra.s32 %v1480_v22, 2  ;;  %v1575_v21 = vand.u32 3, %v1479_v54 }
 0x226   : > { %v1400_v45 = vadd.f32 %v6707_v44, %v1382_v5  ;;  %v1829_v60 = vadd.s32 %v1797_v37, %v1573_v38  ;;  %v1672_v5 = vmul.u32 2, %v1608_v4  ;;  %v6769_v43 = vsel %vm1860_vm10, 1.0, %v7830_v41 }
 0x227   : > { %v1347_v17 = vpop.permute.xlu1 %1346  ;;  %v1830_v15 = vadd.s32 %v1798_v49, %v1574_v50  ;;  %v1639_v24 = vand.u32 3, %v1511_v57  ;;  %v1576_v38 = vand.u32 3, %v1480_v22  ;;  %v1514_v13 = vand.u32 15, %v1448_v12 }
 0x228   : > { %v1413_v27 = vmax.f32 %v1400_v45, 0.0  ;;  %v1383_v47 = vmax.f32 %v6569_v59, %v1347_v17  ;;  %v1607_v59 = vshra.s32 %v1511_v57, 2  ;;  %vm1861_vm11 = vcmp.eq.s32.totalorder %v6620_v39, %v1829_v60 }
 0x229   : > { %vm1862_vm12 = vcmp.eq.s32.totalorder %v6620_v39, %v1830_v15  ;;  %v1767_v57 = vmul.u32 2, %v1639_v24  ;;  %v6777_v54 = vadd.s32 128, %v6592_v9  ;;  %v6783_v49 = vsel %vm1861_vm11, 1.0, %v7830_v41 }
 0x22a   : > { %v1425_v6 = vpack.c.bf16 %v1413_v27, %v1412_v25  ;;  %v1401_v58 = vadd.f32 %v6707_v44, %v1383_v47  ;;  %v1671_v42 = vmul.u32 2, %v1607_v59  ;;  %v1640_v25 = vand.u32 3, %v1512_v40 }
 0x22b   : > { %v1349_v20 = vpop.permute.xlu0 %1348  ;;  %v1704_v59 = vadd.s32 %v1672_v5, %v1544_v2  ;;  %v1482_v40 = vshra.s32 %v1448_v12, 4  ;;  %v1610_v2 = vshra.s32 %v1514_v13, 2 }
 0x22c   : > { %v1384_v28 = vmax.f32 %v6573_v61, %v1349_v20  ;;  %5632 = vmatprep.subr.bf16.mxu1 %v1425_v6  ;;  %v6762_v61 = vsel %vm1859_vm9, 1.0, %v7830_v41  ;;  %v1414_v11 = vmax.f32 %v1401_v58, 0.0  ;;  %v1481_v20 = vshra.s32 %v1447_v52, 4 }
 0x22d   : > { %5633 = vmatpush3.bf16.msra.mxu1 %v1425_v6  ;;  %v1703_v6 = vadd.s32 %v1671_v42, %v1543_v48  ;;  %v1546_v12 = vshra.s32 %v1482_v40, 2 }
 0x22e   : > { %v1402_v53 = vadd.f32 %v6707_v44, %v1384_v28  ;;  %v1768_v28 = vmul.u32 2, %v1640_v25  ;;  %v1545_v48 = vshra.s32 %v1481_v20, 2  ;;  %v6796_v25 = vadd.s32 144, %v6592_v9 }
 0x22f   : > { %v1351_v16 = vpop.permute.xlu1 %1350  ;;  %v1735_v58 = vmul.u32 10, %v1703_v6 }
 0x230   : > { %v1415_v35 = vmax.f32 %v1402_v53, 0.0  ;;  %v1385_v45 = vmax.f32 %v6577_v63, %v1351_v16  ;;  %v1513_v63 = vand.u32 15, %v1447_v52  ;;  %v6786_v52 = vsel %vm1862_vm12, 1.0, %v7830_v41 }
 0x231   : > { %v1353_v17 = vpop.permute.xlu0 %1352  ;;  %v1736_v53 = vmul.u32 10, %v1704_v59  ;;  %v1799_v24 = vadd.s32 %v1767_v57, %v1735_v58  ;;  %v6804_v59 = vand.u32 3, %v1482_v40 }
 0x232   : > { %v1403_v27 = vadd.f32 %v6707_v44, %v1385_v45  ;;  %v1386_v47 = vmax.f32 %v6579_v1, %v1353_v17  ;;  %v1426_v18 = vpack.c.bf16 %v1415_v35, %v1414_v11  ;;  %v6780_v1 = vadd.s32 136, %v6592_v9 }
 0x233   : > { %v1609_v60 = vshra.s32 %v1513_v63, 2  ;;  %v6789_v11 = vand.u32 3, %v1481_v20  ;;  %v1515_v35 = vand.u32 15, %v6777_v54 }
 0x234   : > { %v1404_v37 = vadd.f32 %v6707_v44, %v1386_v47  ;;  %5634 = vmatprep.subr.bf16.mxu1 %v1426_v18  ;;  %v1416_v22 = vmax.f32 %v1403_v27, 0.0  ;;  %v1516_v45 = vand.u32 15, %v6780_v1  ;;  %v1641_v27 = vand.u32 3, %v1513_v63 }
 0x235   : > { %5635 = vmatpush3.bf16.msra.mxu1 %v1426_v18  ;;  %v6798_v47 = vand.u32 3, %v1514_v13  ;;  %v6801_v18 = vadd.s32 152, %v6592_v9  ;;  %v1673_v20 = vmul.u32 2, %v1609_v60  ;;  %v1484_v57 = vshra.s32 %v6780_v1, 4 }
 0x236   : > { %v1417_v4 = vmax.f32 %v1404_v37, 0.0  ;;  %v1674_v37 = vmul.u32 2, %v1610_v2  ;;  %v6808_v63 = vadd.s32 %v1799_v24, %v1575_v21  ;;  %v1517_v13 = vand.u32 15, %v6796_v25 }
 0x237   : > { %v1355_v50 = vpop.permute.xlu1 %1354  ;;  %v1770_v40 = vmul.u32 2, %v6798_v47  ;;  %v1705_v2 = vadd.s32 %v1673_v20, %v1545_v48  ;;  %v1548_v21 = vshra.s32 %v1484_v57, 2  ;;  %v1486_v48 = vshra.s32 %v6801_v18, 4 }
 0x238   : > { %v1387_v42 = vmax.f32 %v6585_v3, %v1355_v50  ;;  %v1427_v16 = vpack.c.bf16 %v1417_v4, %v1416_v22  ;;  %v1800_v3 = vadd.s32 %v1768_v28, %v1736_v53  ;;  %v1611_v22 = vshra.s32 %v1515_v35, 2 }
 0x239   : > { %v1357_v5 = vpop.permute.xlu0 %1356  ;;  %v1612_v4 = vshra.s32 %v1516_v45, 2  ;;  %v1613_v47 = vshra.s32 %v1517_v13, 2  ;;  %v6823_v20 = vadd.s32 160, %v6592_v9  ;;  %vm1863_vm13 = vcmp.eq.s32.totalorder %v6620_v39, %v6808_v63 }
 0x23a   : > { %v1405_v15 = vadd.f32 %v6707_v44, %v1387_v42  ;;  %v1388_v17 = vmax.f32 %v6587_v8, %v1357_v5  ;;  %5636 = vmatprep.subr.bf16.mxu1 %v1427_v16  ;;  %v1483_v8 = vshra.s32 %v6777_v54, 4  ;;  %v6811_v53 = vadd.s32 %v1800_v3, %v1576_v38 }
 0x23b   : > { %5637 = vmatpush3.bf16.msra.mxu1 %v1427_v16  ;;  %v1769_v42 = vmul.u32 2, %v1641_v27  ;;  %v1518_v16 = vand.u32 15, %v6801_v18  ;;  %v1706_v5 = vadd.s32 %v1674_v37, %v1546_v12  ;;  %v1675_v24 = vmul.u32 2, %v1611_v22 }
 0x23c   : > { %v1406_v6 = vadd.f32 %v6707_v44, %v1388_v17  ;;  %v1418_v58 = vmax.f32 %v1405_v15, 0.0  ;;  %v1547_v15 = vshra.s32 %v1483_v8, 2  ;;  %v1485_v27 = vshra.s32 %v6796_v25, 4 }
 0x23d   : > { %v1614_v12 = vshra.s32 %v1518_v16, 2  ;;  %v1737_v22 = vmul.u32 10, %v1705_v2  ;;  %v1677_v7 = vmul.u32 2, %v1613_v47  ;;  %vm1864_vm15 = vcmp.eq.s32.totalorder %v6620_v39, %v6811_v53 }
 0x23e   : > { %v1419_v28 = vmax.f32 %v1406_v6, 0.0  ;;  %v1676_v6 = vmul.u32 2, %v1612_v4  ;;  %v1644_v4 = vand.u32 3, %v1516_v45  ;;  %v1519_v45 = vand.u32 15, %v6823_v20 }
 0x23f   : > { %v1359_v50 = vpop.permute.xlu1 %1358  ;;  %v1678_v2 = vmul.u32 2, %v1614_v12  ;;  %v1646_v12 = vand.u32 3, %v1518_v16  ;;  %v7836_v18 = vmov 0.0  }
 0x240   : > { %v1389_v54 = vmax.f32 %v6601_v14, %v1359_v50  ;;  %v1428_v60 = vpack.c.bf16 %v1419_v28, %v1418_v58  ;;  %v1643_v14 = vand.u32 3, %v1515_v35  ;;  %v6827_v58 = vadd.s32 168, %v6592_v9 }
 0x241   : > { %v1361_v17 = vpop.permute.xlu0 %1360  ;;  %v1579_v28 = vand.u32 3, %v1483_v8  ;;  %v1707_v50 = vadd.s32 %v1675_v24, %v1547_v15  ;;  %v1549_v35 = vshra.s32 %v1485_v27, 2  ;;  %v1772_v8 = vmul.u32 2, %v1644_v4 }
 0x242   : > { %v1407_v38 = vadd.f32 %v6707_v44, %v1389_v54  ;;  %v1390_v3 = vmax.f32 %v6605_v19, %v1361_v17  ;;  %5638 = vmatprep.subr.bf16.mxu1 %v1428_v60  ;;  %v1738_v19 = vmul.u32 10, %v1706_v5  ;;  %v1708_v54 = vadd.s32 %v1676_v6, %v1548_v21 }
 0x243   : > { %5639 = vmatpush3.bf16.msra.mxu1 %v1428_v60  ;;  %v1771_v0 = vmul.u32 2, %v1643_v14  ;;  %v1520_v15 = vand.u32 15, %v6827_v58  ;;  %v1801_v24 = vadd.s32 %v1769_v42, %v1737_v22  ;;  %v1739_v6 = vmul.u32 10, %v1707_v50 }
 0x244   : > { %v1408_v37 = vadd.f32 %v6707_v44, %v1390_v3  ;;  %v1420_v17 = vmax.f32 %v1407_v38, 0.0  ;;  %v1550_v3 = vshra.s32 %v1486_v48, 2  ;;  %v1740_v38 = vmul.u32 10, %v1708_v54 }
 0x245   : > { %v1709_v41 = vadd.s32 %v1677_v7, %v1549_v35  ;;  %v1487_v4 = vshra.s32 %v6823_v20, 4  ;;  %v1833_v22 = vadd.s32 %v1801_v24, %v6789_v11  ;;  %v1803_v50 = vadd.s32 %v1771_v0, %v1739_v6 }
 0x246   : > { %v1421_v60 = vmax.f32 %v1408_v37, 0.0  ;;  %v1645_v37 = vand.u32 3, %v1517_v13  ;;  %v1580_v13 = vand.u32 3, %v1484_v57  ;;  %v1804_v16 = vadd.s32 %v1772_v8, %v1740_v38 }
 0x247   : > { %v1363_v56 = vpop.permute.xlu1 %1362  ;;  %v1551_v1 = vshra.s32 %v1487_v4, 2  ;;  %vm1865_vm0 = vcmp.eq.s32.totalorder %v6620_v39, %v1833_v22  ;;  %v1835_v6 = vadd.s32 %v1803_v50, %v1579_v28  ;;  %v1951_v20 = vpack.c.bf16 %v6769_v43, %v6762_v61 }
 0x248   : > { %v1391_v31 = vmax.f32 %v6612_v30, %v1363_v56  ;;  %v1429_v5 = vpack.c.bf16 %v1421_v60, %v1420_v17  ;;  %v1802_v30 = vadd.s32 %v1770_v40, %v1738_v19  ;;  %v1710_v56 = vadd.s32 %v1678_v2, %v1550_v3 }
 0x249   : > { %v1365_v21 = vpop.permute.xlu0 %1364  ;;  %v1615_v17 = vshra.s32 %v1519_v45, 2  ;;  %v1773_v7 = vmul.u32 2, %v1645_v37  ;;  %v1741_v19 = vmul.u32 10, %v1709_v41  ;;  %v1581_v41 = vand.u32 3, %v1485_v27 }
 0x24a   : > { %v1409_v47 = vadd.f32 %v6707_v44, %v1391_v31  ;;  %v1392_v14 = vmax.f32 %v6615_v36, %v1365_v21  ;;  %5640 = vmatprep.subr.bf16.mxu1 %v1429_v5  ;;  %v1488_v31 = vshra.s32 %v6827_v58, 4  ;;  %v1616_v36 = vshra.s32 %v1520_v15, 2 }
 0x24b   : > { %5641 = vmatpush3.bf16.msra.mxu1 %v1429_v5  ;;  %v1774_v60 = vmul.u32 2, %v1646_v12  ;;  %v1742_v3 = vmul.u32 10, %v1710_v56  ;;  %v1834_v8 = vadd.s32 %v1802_v30, %v6804_v59  ;;  %v1582_v21 = vand.u32 3, %v1486_v48 }
 0x24c   : > { %v1410_v42 = vadd.f32 %v6707_v44, %v1392_v14  ;;  %v1422_v54 = vmax.f32 %v1409_v47, 0.0  ;;  %v1679_v57 = vmul.u32 2, %v1615_v17  ;;  %v1552_v0 = vshra.s32 %v1488_v31, 2 }
 0x24d   : > { %v1680_v11 = vmul.u32 2, %v1616_v36  ;;  %v1805_v38 = vadd.s32 %v1773_v7, %v1741_v19  ;;  %v1806_v37 = vadd.s32 %v1774_v60, %v1742_v3  ;;  %v1647_v47 = vand.u32 3, %v1519_v45 }
 0x24e   : > { %v1423_v40 = vmax.f32 %v1410_v42, 0.0  ;;  %v1711_v14 = vadd.s32 %v1679_v57, %v1551_v1  ;;  %v6861_v59 = vadd.s32 176, %v6592_v9  ;;  %v1648_v30 = vand.u32 3, %v1520_v15 }
 0x24f   : > { %v1367_v35 = vpop.permute.xlu1 %1366  ;;  %v1712_v25 = vadd.s32 %v1680_v11, %v1552_v0  ;;  %v6864_v27 = vadd.s32 184, %v6592_v9  ;;  %v6876_v48 = vsel %vm1864_vm15, 1.0, %v7836_v18  ;;  %vm1866_vm1 = vcmp.eq.s32.totalorder %v6620_v39, %v1834_v8 }
 0x250   : > { %v1393_v2 = vmax.f32 %v6630_v46, %v1367_v35  ;;  %v1430_v5 = vpack.c.bf16 %v1423_v40, %v1422_v54  ;;  %v1836_v46 = vadd.s32 %v1804_v16, %v1580_v13  ;;  %v6882_v28 = vsel %vm1865_vm0, 1.0, %v7836_v18  ;;  %v6088_v40 = vld [vmem:[%s7821_s3 + $0x50] sm:$0xff]  }
 0x251   : > { %vm1867_vm3 = vcmp.eq.s32.totalorder %v6620_v39, %v1835_v6  ;;  %v1837_v63 = vadd.s32 %v1805_v38, %v1581_v41  ;;  %v1838_v15 = vadd.s32 %v1806_v37, %v1582_v21  ;;  %v1743_v56 = vmul.u32 10, %v1711_v14 }
 0x252   : > { %v1411_v24 = vadd.f32 %v6707_v44, %v1393_v2  ;;  %5642 = vmatprep.subr.bf16.mxu1 %v1430_v5  ;;  %v6870_v44 = vsel %vm1863_vm13, 1.0, %v7836_v18  ;;  %vm1868_vm4 = vcmp.eq.s32.totalorder %v6620_v39, %v1836_v46  ;;  %v1775_v17 = vmul.u32 2, %v1647_v47 }
 0x253   : > { %5643 = vmatpush3.bf16.msra.mxu1 %v1430_v5  ;;  %v1521_v53 = vand.u32 15, %v6861_v59  ;;  %v1744_v13 = vmul.u32 10, %v1712_v25  ;;  %v1776_v36 = vmul.u32 2, %v1648_v30  ;;  %v1522_v22 = vand.u32 15, %v6864_v27 }
 0x254   : > { %v1424_v12 = vmax.f32 %v1411_v24, 0.0  ;;  %v6893_v50 = vsel %vm1866_vm1, 1.0, %v7836_v18  ;;  %v6896_v16 = vsel %vm1867_vm3, 1.0, %v7836_v18  ;;  %v6899_v7 = vadd.s32 192, %v6592_v9 }
 0x255   : > { %v6902_v54 = vadd.s32 200, %v6592_v9  ;;  %v6910_v19 = vsel %vm1868_vm4, 1.0, %v7836_v18  ;;  %v1583_v60 = vand.u32 3, %v1487_v4  ;;  %v1489_v35 = vshra.s32 %v6861_v59, 4 }
 0x256   : > { %v1431_v45 = vpack.c.bf16 %v1424_v12, %v1424_v12  ;;  %v1490_v3 = vshra.s32 %v6864_v27, 4  ;;  %vm1869_vm5 = vcmp.eq.s32.totalorder %v6620_v39, %v1837_v63  ;;  %vm1870_vm6 = vcmp.eq.s32.totalorder %v6620_v39, %v1838_v15 }
 0x257   : > { %v1807_v1 = vadd.s32 %v1775_v17, %v1743_v56  ;;  %v1617_v57 = vshra.s32 %v1521_v53, 2  ;;  %v7837_v2 = vpack.c.bf16 %v6695_v55, %v6692_v51  ;;  %v1584_v4 = vand.u32 3, %v1488_v31 }
 0x258   : > { %5960 = vmatprep.subr.msk.bf16.mxu1 %vm2012_vm14, %v1431_v45  ;;  %v2014_v42 = vsel %vm2012_vm14, %v1431_v45, 0  ;;  %v1808_v5 = vadd.s32 %v1776_v36, %v1744_v13  ;;  %v1618_v0 = vshra.s32 %v1522_v22, 2  ;;  %v7838_v11 = vpack.c.bf16 %v6737_v23, %v6724_v29 }
 0x259   : > { %5645 = vmatpush3.bf16.msra.mxu1 %v2014_v42  ;;  %v1952_v8 = vpack.c.bf16 %v6786_v52, %v6783_v49  ;;  %v1953_v51 = vpack.c.bf16 %v6876_v48, %v6870_v44  ;;  %v1523_v55 = vand.u32 15, %v6899_v7  ;;  %v1524_v61 = vand.u32 15, %v6902_v54 }
 0x25a   : > { %5694 = vmatprep.subr.bf16.mxu1 %v7836_v18  ;;  %v1954_v43 = vpack.c.bf16 %v6893_v50, %v6882_v28  ;;  %v1955_v58 = vpack.c.bf16 %v6910_v19, %v6896_v16  ;;  %v6944_v29 = vsel %vm1869_vm5, 1.0, %v7836_v18  ;;  %v6949_v23 = vsel %vm1870_vm6, 1.0, %v7836_v18 }
 0x25b   : > { %v1839_v31 = vadd.s32 %v1807_v1, %v1583_v60  ;;  %v1553_v41 = vshra.s32 %v1489_v35, 2  ;;  %v1554_v21 = vshra.s32 %v1490_v3, 2  ;;  %v1681_v24 = vmul.u32 2, %v1617_v57 }
 0x25c   : > { %5647 = vmatmul.mubr.msk.bf16.vlgmr.msra.gmra.mrb[28].mxu1 %vm1963_vm2, %v7837_v2  ;;  %v1840_v6 = vadd.s32 %v1808_v5, %v1584_v4  ;;  %v1682_v46 = vmul.u32 2, %v1618_v0  ;;  %v6953_v38 = vadd.s32 208, %v6592_v9  ;;  %v6956_v37 = vadd.s32 216, %v6592_v9 }
 0x25d   : > { %5650 = vmatprep.mubr.msk.bf16.mxu1 %vm1963_vm2, %v7838_v11  ;;  %5695 = vmatpush3.bf16.msra.mxu1 %v6088_v40  ;;  %v1491_v47 = vshra.s32 %v6899_v7, 4  ;;  %v1492_v14 = vshra.s32 %v6902_v54, 4  ;;  %v1619_v59 = vshra.s32 %v1523_v55, 2  ;;  %v1620_v12 = vshra.s32 %v1524_v61, 2 }
 0x25e   : > { %5696 = vmatprep.subr.bf16.mxu1 %v7836_v18  ;;  %v6960_v30 = vand.u32 3, %v1489_v35  ;;  %v6962_v25 = vand.u32 3, %v1490_v3  ;;  %v1649_v27 = vand.u32 3, %v1521_v53  ;;  %v1650_v45 = vand.u32 3, %v1522_v22 }
 0x25f   : > { %vm1871_vm7 = vcmp.eq.s32.totalorder %v6620_v39, %v1839_v31  ;;  %v1713_v63 = vadd.s32 %v1681_v24, %v1553_v41  ;;  %v6966_v15 = vadd.s32 224, %v6592_v9  ;;  %v6969_v56 = vadd.s32 232, %v6592_v9 }
 0x260   : > { %v7839_v17 = vpack.c.bf16 %v6745_v33, %v6742_v26  ;;  %vm1872_vm8 = vcmp.eq.s32.totalorder %v6620_v39, %v1840_v6  ;;  %v1714_v42 = vadd.s32 %v1682_v46, %v1554_v21  ;;  %v1525_v53 = vand.u32 15, %v6953_v38 }
 0x261   : > { %v1526_v13 = vand.u32 15, %v6956_v37  ;;  %v1555_v36 = vshra.s32 %v1491_v47, 2  ;;  %v1556_v22 = vshra.s32 %v1492_v14, 2  ;;  %v1683_v40 = vmul.u32 2, %v1619_v59 }
 0x262   : > { %v1684_v60 = vmul.u32 2, %v1620_v12  ;;  %v1777_v26 = vmul.u32 2, %v1649_v27  ;;  %v1651_v35 = vand.u32 3, %v1523_v55  ;;  %v1652_v3 = vand.u32 3, %v1524_v61 }
 0x263   : > { %v1778_v33 = vmul.u32 2, %v1650_v45  ;;  %v6986_v1 = vsel %vm1871_vm7, 1.0, %v7836_v18  ;;  %v6989_v57 = vsel %vm1872_vm8, 1.0, %v7836_v18  ;;  %v1527_v2 = vand.u32 15, %v6966_v15 }
 0x264   : > { %5651 = vmatmul.mubr.msk.bf16.gmra.mrb[32].mxu1 %vm1963_vm2, %v7839_v17  ;;  %v7835_v4 = vshra.s32 %v6953_v38, 4  ;;  %v7832_v5 = vshra.s32 %v6956_v37, 4  ;;  %v1621_v0 = vshra.s32 %v1525_v53, 2  ;;  %v1622_v11 = vshra.s32 %v1526_v13, 2 }
 0x265   : > { %5654 = vmatprep.mubr.msk.bf16.mxu1 %vm1963_vm2, %v1951_v20  ;;  %v1528_v20 = vand.u32 15, %v6969_v56  ;;  %v1745_v55 = vmul.u32 10, %v1713_v63  ;;  %v1746_v61 = vmul.u32 10, %v1714_v42  ;;  %v1715_v41 = vadd.s32 %v1683_v40, %v1555_v36 }
 0x266   : > { %v1716_v21 = vadd.s32 %v1684_v60, %v1556_v22  ;;  %v1779_v31 = vmul.u32 2, %v1651_v35  ;;  %v1780_v24 = vmul.u32 2, %v1652_v3  ;;  %v6996_v6 = vadd.s32 240, %v6592_v9 }
 0x267   : > { %v6999_v46 = vadd.s32 248, %v6592_v9  ;;  %v7833_v59 = vshra.s32 %v6966_v15, 4  ;;  %v7834_v12 = vshra.s32 %v6969_v56, 4  ;;  %v1623_v27 = vshra.s32 %v1527_v2, 2 }
 0x268   : > { %v1624_v45 = vshra.s32 %v1528_v20, 2  ;;  %v1557_v63 = vshra.s32 %v7835_v4, 2  ;;  %v1558_v17 = vshra.s32 %v7832_v5, 2  ;;  %v1685_v42 = vmul.u32 2, %v1621_v0 }
 0x269   : > { %v1686_v36 = vmul.u32 2, %v1622_v11  ;;  %v1809_v22 = vadd.s32 %v1777_v26, %v1745_v55  ;;  %v1810_v40 = vadd.s32 %v1778_v33, %v1746_v61  ;;  %v1747_v60 = vmul.u32 10, %v1715_v41 }
 0x26a   : > { %v1748_v35 = vmul.u32 10, %v1716_v21  ;;  %v1653_v49 = vand.u32 3, %v1525_v53  ;;  %v1654_v52 = vand.u32 3, %v1526_v13  ;;  %v1530_v3 = vand.u32 15, %v6999_v46 }
 0x26b   : > { %v1559_v5 = vshra.s32 %v7833_v59, 2  ;;  %v1560_v0 = vshra.s32 %v7834_v12, 2  ;;  %v1687_v11 = vmul.u32 2, %v1623_v27  ;;  %v1688_v44 = vmul.u32 2, %v1624_v45 }
 0x26c   : > { %5655 = vmatmul.mubr.msk.bf16.gmra.mrb[36].mxu1 %vm1963_vm2, %v1952_v8  ;;  %v1529_v8 = vand.u32 15, %v6996_v6  ;;  %v1587_v48 = vand.u32 3, %v1491_v47  ;;  %v1717_v53 = vadd.s32 %v1685_v42, %v1557_v63  ;;  %v1718_v13 = vadd.s32 %v1686_v36, %v1558_v17 }
 0x26d   : > { %5658 = vmatprep.mubr.msk.bf16.mxu1 %vm1963_vm2, %v1953_v51  ;;  %v1588_v51 = vand.u32 3, %v1492_v14  ;;  %v1811_v26 = vadd.s32 %v1779_v31, %v1747_v60  ;;  %v1812_v33 = vadd.s32 %v1780_v24, %v1748_v35  ;;  %v1655_v55 = vand.u32 3, %v1527_v2 }
 0x26e   : > { %v1656_v61 = vand.u32 3, %v1528_v20  ;;  %v1497_v41 = vshra.s32 %v6996_v6, 4  ;;  %v1498_v21 = vshra.s32 %v6999_v46, 4  ;;  %v1625_v59 = vshra.s32 %v1529_v8, 2 }
 0x26f   : > { %v1626_v12 = vshra.s32 %v1530_v3, 2  ;;  %v1781_v27 = vmul.u32 2, %v1653_v49  ;;  %v1782_v45 = vmul.u32 2, %v1654_v52  ;;  %v1719_v4 = vadd.s32 %v1687_v11, %v1559_v5 }
 0x270   : > { %v1720_v7 = vadd.s32 %v1688_v44, %v1560_v0  ;;  %v1841_v54 = vadd.s32 %v1809_v22, %v6960_v30  ;;  %v1842_v47 = vadd.s32 %v1810_v40, %v6962_v25  ;;  %v1749_v14 = vmul.u32 10, %v1717_v53 }
 0x271   : > { %v1750_v2 = vmul.u32 10, %v1718_v13  ;;  %v1843_v20 = vadd.s32 %v1811_v26, %v1587_v48  ;;  %v1844_v31 = vadd.s32 %v1812_v33, %v1588_v51  ;;  %v1783_v5 = vmul.u32 2, %v1655_v55 }
 0x272   : > { %v1784_v24 = vmul.u32 2, %v1656_v61  ;;  %v1561_v6 = vshra.s32 %v1497_v41, 2  ;;  %v1562_v46 = vshra.s32 %v1498_v21, 2  ;;  %v1689_v28 = vmul.u32 2, %v1625_v59 }
 0x273   : > { %v1690_v50 = vmul.u32 2, %v1626_v12  ;;  %v1957_v30 = vpack.c.bf16 %v6989_v57, %v6986_v1  ;;  %v1751_v25 = vmul.u32 10, %v1719_v4  ;;  %vm1873_vm9 = vcmp.eq.s32.totalorder %v6620_v39, %v1841_v54 }
 0x274   : > { %5659 = vmatmul.mubr.msk.bf16.gmra.mrb[40].mxu1 %vm1963_vm2, %v1954_v43  ;;  %v1956_v43 = vpack.c.bf16 %v6949_v23, %v6944_v29  ;;  %v1752_v63 = vmul.u32 10, %v1720_v7  ;;  %vm1874_vm10 = vcmp.eq.s32.totalorder %v6620_v39, %v1842_v47  ;;  %v7840_v16 = vshra.s32 %v6953_v38, 4 }
 0x275   : > { %5662 = vmatprep.mubr.msk.bf16.mxu1 %vm1963_vm2, %v1955_v58  ;;  %v7841_v58 = vshra.s32 %v6956_v37, 4  ;;  %v1813_v59 = vadd.s32 %v1781_v27, %v1749_v14  ;;  %v1814_v12 = vadd.s32 %v1782_v45, %v1750_v2  ;;  %v1657_v42 = vand.u32 3, %v1529_v8 }
 0x276   : > { %v1589_v19 = vand.u32 3, %v7840_v16  ;;  %v1658_v36 = vand.u32 3, %v1530_v3  ;;  %vm1875_vm11 = vcmp.eq.s32.totalorder %v6620_v39, %v1843_v20  ;;  %vm1876_vm12 = vcmp.eq.s32.totalorder %v6620_v39, %v1844_v31  ;;  %v6089_v20 = vld [vmem:[%s7821_s3 + $0x18] sm:$0xff]  }
 0x277   : > { %v1590_v17 = vand.u32 3, %v7841_v58  ;;  %v1721_v29 = vadd.s32 %v1689_v28, %v1561_v6  ;;  %v1722_v23 = vadd.s32 %v1690_v50, %v1562_v46  ;;  %v7842_v1 = vshra.s32 %v6966_v15, 4  ;;  %5681 = vmatpush3.bf16.msra.mxu0 %v6089_v20  ;;  %v6092_v31 = vld [vmem:[%s7821_s3 + $0x58] sm:$0xff]   ;;  %v6090_v46 = vld [vmem:[%s7821_s3 + $0x30] sm:$0xff]   ;;  %v6104_v20 = vld [vmem:[%s7821_s3 + $0x8] sm:$0xff]  }
 0x278   : > { %v7843_v4 = vshra.s32 %v6969_v56, 4  ;;  %v1815_v22 = vadd.s32 %v1783_v5, %v1751_v25  ;;  %v1816_v40 = vadd.s32 %v1784_v24, %v1752_v63  ;;  %v5067_v37 = vsel %vm1873_vm9, 1.0, %v7836_v18  ;;  %5686 = vmatprep.subr.bf16.mxu0 %v7836_v18  ;;  %5697 = vmatpush3.bf16.msra.mxu1 %v6092_v31 }
 0x279   : > { %v1591_v57 = vand.u32 3, %v7842_v1  ;;  %v5068_v60 = vsel %vm1874_vm10, 1.0, %v7836_v18  ;;  %v1845_v35 = vadd.s32 %v1813_v59, %v1589_v19  ;;  %v1846_v15 = vadd.s32 %v1814_v12, %v1590_v17  ;;  %5710 = vmatprep.subr.bf16.mxu1 %v7836_v18  ;;  %v6093_v19 = vld [vmem:[%s7821_s3 + $0x70] sm:$0xff]   ;;  %v6094_v12 = vld [vmem:[%s7821_s3 + $0x78] sm:$0xff]  }
 0x27a   : > { %v1592_v38 = vand.u32 3, %v7843_v4  ;;  %v1785_v49 = vmul.u32 2, %v1657_v42  ;;  %v1786_v52 = vmul.u32 2, %v1658_v36  ;;  %v5069_v56 = vsel %vm1875_vm11, 1.0, %v7836_v18 }
 0x27b   : > { %v5070_v8 = vsel %vm1876_vm12, 1.0, %v7836_v18  ;;  %v1753_v3 = vmul.u32 10, %v1721_v29  ;;  %v1754_v0 = vmul.u32 10, %v1722_v23  ;;  %v1847_v11 = vadd.s32 %v1815_v22, %v1591_v57  ;;  %v6095_v23 = vld [vmem:[%s7821_s3 + $0x90] sm:$0xff]  }
 0x27c   : > { %5663 = vmatmul.mubr.msk.bf16.gmra.mrb[44].mxu1 %vm1963_vm2, %v1956_v43  ;;  %v1848_v44 = vadd.s32 %v1816_v40, %v1592_v38  ;;  %v1958_v48 = vpack.c.bf16 %v5068_v60, %v5067_v37  ;;  %v1959_v51 = vpack.c.bf16 %v5070_v8, %v5069_v56  ;;  %vm1877_vm13 = vcmp.eq.s32.totalorder %v6620_v39, %v1845_v35  ;;  %v6096_v38 = vld [vmem:[%s7821_s3 + $0x98] sm:$0xff]   ;;  %v6097_v60 = vld [vmem:[%s7821_s3 + $0xb0] sm:$0xff]  }
 0x27d   : > { %5666 = vmatprep.mubr.msk.bf16.mxu1 %vm1963_vm2, %v1957_v30  ;;  %vm1878_vm14 = vcmp.eq.s32.totalorder %v6620_v39, %v1846_v15  ;;  %v1593_v53 = vand.u32 3, %v1497_v41  ;;  %v1594_v13 = vand.u32 3, %v1498_v21  ;;  %v1817_v26 = vadd.s32 %v1785_v49, %v1753_v3  ;;  %v6091_v30 = vld [vmem:[%s7821_s3 + $0x38] sm:$0xff]  }
 0x27e   : > { %v1818_v33 = vadd.s32 %v1786_v52, %v1754_v0  ;;  %vm1879_vm15 = vcmp.eq.s32.totalorder %v6620_v39, %v1847_v11  ;;  %vm1880_vm0 = vcmp.eq.s32.totalorder %v6620_v39, %v1848_v44  ;;  %v5071_v55 = vsel %vm1877_vm13, 1.0, %v7836_v18  ;;  %v6098_v52 = vld [vmem:[%s7821_s3 + $0xb8] sm:$0xff]   ;;  %v6099_v0 = vld [vmem:[%s7821_s3 + $0xd0] sm:$0xff]  }
 0x27f   : > { %v5072_v61 = vsel %vm1878_vm14, 1.0, %v7836_v18  ;;  %v5073_v27 = vsel %vm1879_vm15, 1.0, %v7836_v18  ;;  %v5074_v45 = vsel %vm1880_vm0, 1.0, %v7836_v18  ;;  %v1849_v41 = vadd.s32 %v1817_v26, %v1593_v53 }
 0x280   : > { %v1850_v21 = vadd.s32 %v1818_v33, %v1594_v13  ;;  %v1960_v7 = vpack.c.bf16 %v5072_v61, %v5071_v55  ;;  %v1961_v54 = vpack.c.bf16 %v5074_v45, %v5073_v27  ;;  %vm6228_vm4 = vmmov 0   ;;  %v6101_v33 = vld [vmem:[%s7821_s3 + $0xf0] sm:$0xff]   ;;  %v6103_v45 = vld [vmem:[%s7821_s3 + $0xf8] sm:$0xff]  }
 0x281   : > { %vm1881_vm1 = vcmp.eq.s32.totalorder %v6620_v39, %v1849_v41  ;;  %5682 = vmatprep.mubr.msk.bf16.mxu0 %vm6228_vm4, %v7836_v18  ;;  %vm3256_vm7 = vcmask 130048   ;;  %vm3367_vm11 = vcmask 523264   ;;  %vm4353_vm12 = vcmask 1046528  }
 0x282   : > { %vm1882_vm3 = vcmp.eq.s32.totalorder %v6620_v39, %v1850_v21  ;;  %v5075_v47 = vsel %vm1881_vm1, 1.0, %v7836_v18  ;;  %vm4349_vm13 = vcmask 900096   ;;  %vm4875_vm15 = vcmask 270336  }
 0x283   : > { %v5076_v14 = vsel %vm1882_vm3, 1.0, %v7836_v18  ;;  %vm4877_vm0 = vcmask 516096   ;;  %vm4802_vm1 = vcmask 277504   ;;  %vm4879_vm3 = vcmask 57344  }
 0x284   : > { %5667 = vmatmul.mubr.msk.bf16.gmra.mrb[48].mxu1 %vm1963_vm2, %v1958_v48  ;;  %v1962_v2 = vpack.c.bf16 %v5076_v14, %v5075_v47 }
 0x285   : > { %5670 = vmatprep.mubr.msk.bf16.mxu1 %vm1963_vm2, %v1959_v51  ;;  %v6100_v51 = vld [vmem:[%s7821_s3 + $0xd8] sm:$0xff]  }
 0x28c   : > { %5671 = vmatmul.mubr.msk.bf16.gmra.mrb[52].mxu1 %vm1963_vm2, %v1960_v7 }
 0x28d   : > { %5674 = vmatprep.mubr.msk.bf16.mxu1 %vm1963_vm2, %v1961_v54  ;;  %v6102_v54 = vld [vmem:[%s7821_s3] sm:$0xff]  }
 0x294   : > { %5675 = vmatmul.mubr.msk.bf16.gmra.mrb[56].mxu1 %vm1963_vm2, %v1962_v2  ;;  %vm2213_vm2 = vcmask 261120  }
 0x295   : > { %5698 = vmatprep.mubr.msk.bf16.mxu1 %vm6228_vm4, %v7836_v18 }
 0x32f   : > { %v5648_v5 = vpop.f32.mrb[28].mxu1 }
 0x330   : > { %v7096_v24 = vpop.f32.mrb[29].mxu1 }
 0x331   : > { %v5649_v6 = vpop.f32.mrb[30].mxu1 }
 0x332   : > { %v2178_v28 = vpack.c.bf16 %v5649_v6, %v5648_v5  ;;  %v7101_v50 = vpop.f32.mrb[31].mxu1 }
 0x333   : > { %v2177_v43 = vpack.c.bf16 %v7101_v50, %v7096_v24  ;;  %v6109_v24 = vld [vmem:[%s7821_s3 + $0x60] sm:$0xff]  }
 0x334   : > { %5683 = vmatmul.mubr.msk.bf16.vlgmr.msra.gmra.mrb[56].mxu0 %vm2213_vm2, %v2178_v28  ;;  %v6106_v28 = vld [vmem:[%s7821_s3 + $0x40] sm:$0xff]  }
 0x335   : > { %5687 = vmatpush3.bf16.msra.mxu0 %v6090_v46  ;;  %5690 = vmatprep.mubr.msk.bf16.mxu0 %vm6228_vm4, %v7836_v18  ;;  %v6105_v46 = vld [vmem:[%s7821_s3 + $0x20] sm:$0xff]  }
 0x336   : > { %5688 = vmatprep.subr.bf16.mxu0 %v7836_v18  ;;  %v6110_v50 = vld [vmem:[%s7821_s3 + $0x80] sm:$0xff]  }
 0x337   : > { %v5652_v25 = vpop.f32.mrb[32].mxu1 }
 0x338   : > { %v7112_v63 = vpop.f32.mrb[33].mxu1 }
 0x339   : > { %v5653_v16 = vpop.f32.mrb[34].mxu1  ;;  %5689 = vmatpush3.bf16.msra.mxu0 %v6091_v30 }
 0x33a   : > { %v2180_v58 = vpack.c.bf16 %v5653_v16, %v5652_v25  ;;  %v7117_v17 = vpop.f32.mrb[35].mxu1  ;;  %5702 = vmatprep.subr.bf16.mxu0 %v7836_v18 }
 0x33b   : > { %v2179_v59 = vpack.c.bf16 %v7117_v17, %v7112_v63  ;;  %v6113_v63 = vld [vmem:[%s7821_s3 + $0xa0] sm:$0xff]  }
 0x33c   : > { %5691 = vmatmul.mubr.msk.bf16.vlgmr.msra.gmra.mrb[60].mxu0 %vm2213_vm2, %v2180_v58  ;;  %v6108_v58 = vld [vmem:[%s7821_s3 + $0x48] sm:$0xff]   ;;  %v6114_v17 = vld [vmem:[%s7821_s3 + $0xc0] sm:$0xff]  }
 0x33d   : > { %5703 = vmatpush3.bf16.msra.mxu0 %v6093_v19  ;;  %5706 = vmatprep.mubr.msk.bf16.mxu0 %vm6228_vm4, %v7836_v18  ;;  %v6107_v19 = vld [vmem:[%s7821_s3 + $0x28] sm:$0xff]  }
 0x33e   : > { %5704 = vmatprep.subr.bf16.mxu0 %v7836_v18 }
 0x33f   : > { %v5656_v42 = vpop.f32.mrb[36].mxu1 }
 0x340   : > { %v7129_v36 = vpop.f32.mrb[37].mxu1 }
 0x341   : > { %v5657_v29 = vpop.f32.mrb[38].mxu1  ;;  %5705 = vmatpush3.bf16.msra.mxu0 %v6094_v12  ;;  %v6112_v12 = vld [vmem:[%s7821_s3 + $0x88] sm:$0xff]  }
 0x342   : > { %v2182_v1 = vpack.c.bf16 %v5657_v29, %v5656_v42  ;;  %v7134_v57 = vpop.f32.mrb[39].mxu1  ;;  %5718 = vmatprep.subr.bf16.mxu0 %v7836_v18  ;;  %v6116_v42 = vld [vmem:[%s7821_s3 + $0xc8] sm:$0xff]  }
 0x343   : > { %v2181_v4 = vpack.c.bf16 %v7134_v57, %v7129_v36  ;;  %v6117_v36 = vld [vmem:[%s7821_s3 + $0xe0] sm:$0xff]   ;;  %v6118_v29 = vld [vmem:[%s7821_s3 + $0xe8] sm:$0xff]  }
 0x344   : > { %5699 = vmatmul.mubr.msk.bf16.vlgmr.msra.gmra.mrb[60].mxu1 %vm2213_vm2, %v2182_v1  ;;  %v6121_v1 = vld [vmem:[%s7822_s4 + $0x28] sm:$0xff]  }
 0x345   : > { %5711 = vmatpush3.bf16.msra.mxu1 %v6095_v23  ;;  %5714 = vmatprep.mubr.msk.bf16.mxu1 %vm6228_vm4, %v7836_v18  ;;  %v6119_v23 = vld [vmem:[%s7822_s4 + $0x20] sm:$0xff]  }
 0x346   : > { %5712 = vmatprep.subr.bf16.mxu1 %v7836_v18 }
 0x347   : > { %v5660_v22 = vpop.f32.mrb[40].mxu1 }
 0x348   : > { %v7146_v40 = vpop.f32.mrb[41].mxu1 }
 0x349   : > { %v5661_v37 = vpop.f32.mrb[42].mxu1  ;;  %5713 = vmatpush3.bf16.msra.mxu1 %v6096_v38 }
 0x34a   : > { %v2184_v35 = vpack.c.bf16 %v5661_v37, %v5660_v22  ;;  %v7151_v15 = vpop.f32.mrb[43].mxu1  ;;  %5726 = vmatprep.subr.bf16.mxu1 %v7836_v18  ;;  %v6123_v22 = vld [vmem:[%s7822_s4 + $0x30] sm:$0xff]  }
 0x34b   : > { %v2183_v49 = vpack.c.bf16 %v7151_v15, %v7146_v40 }
 0x34c   : > { %5707 = vmatmul.mubr.msk.bf16.vlgmr.msra.gmra.mrb[64].mxu0 %vm2213_vm2, %v2184_v35 }
 0x34d   : > { %5719 = vmatpush3.bf16.msra.mxu0 %v6097_v60  ;;  %5722 = vmatprep.mubr.msk.bf16.mxu0 %vm6228_vm4, %v7836_v18 }
 0x34e   : > { %5720 = vmatprep.subr.bf16.mxu0 %v7836_v18 }
 0x34f   : > { %v5664_v56 = vpop.f32.mrb[44].mxu1 }
 0x350   : > { %v7163_v8 = vpop.f32.mrb[45].mxu1 }
 0x351   : > { %v5665_v3 = vpop.f32.mrb[46].mxu1  ;;  %5721 = vmatpush3.bf16.msra.mxu0 %v6098_v52 }
 0x352   : > { %v2186_v11 = vpack.c.bf16 %v5665_v3, %v5664_v56  ;;  %v7168_v44 = vpop.f32.mrb[47].mxu1  ;;  %5734 = vmatprep.subr.bf16.mxu0 %v7836_v18 }
 0x353   : > { %v2185_v48 = vpack.c.bf16 %v7168_v44, %v7163_v8 }
 0x354   : > { %5715 = vmatmul.mubr.msk.bf16.vlgmr.msra.gmra.mrb[64].mxu1 %vm2213_vm2, %v2186_v11 }
 0x355   : > { %5727 = vmatpush3.bf16.msra.mxu1 %v6099_v0  ;;  %5730 = vmatprep.mubr.msk.bf16.mxu1 %vm6228_vm4, %v7836_v18 }
 0x356   : > { %5728 = vmatprep.subr.bf16.mxu1 %v7836_v18 }
 0x357   : > { %v5668_v53 = vpop.f32.mrb[48].mxu1 }
 0x358   : > { %v7180_v13 = vpop.f32.mrb[49].mxu1 }
 0x359   : > { %v5669_v26 = vpop.f32.mrb[50].mxu1  ;;  %5729 = vmatpush3.bf16.msra.mxu1 %v6100_v51 }
 0x35a   : > { %v2188_v55 = vpack.c.bf16 %v5669_v26, %v5668_v53  ;;  %v7185_v61 = vpop.f32.mrb[51].mxu1  ;;  %5742 = vmatprep.subr.bf16.mxu1 %v7836_v18 }
 0x35b   : > { %v2187_v27 = vpack.c.bf16 %v7185_v61, %v7180_v13 }
 0x35c   : > { %5723 = vmatmul.mubr.msk.bf16.vlgmr.msra.gmra.mrb[68].mxu0 %vm2213_vm2, %v2188_v55 }
 0x35d   : > { %5735 = vmatpush3.bf16.msra.mxu0 %v6101_v33  ;;  %5738 = vmatprep.mubr.msk.bf16.mxu0 %vm6228_vm4, %v7836_v18 }
 0x35e   : > { %5736 = vmatprep.subr.bf16.mxu0 %v7836_v18 }
 0x35f   : > { %v5672_v41 = vpop.f32.mrb[52].mxu1 }
 0x360   : > { %v7197_v21 = vpop.f32.mrb[53].mxu1 }
 0x361   : > { %v5673_v7 = vpop.f32.mrb[54].mxu1  ;;  %5737 = vmatpush3.bf16.msra.mxu0 %v6103_v45 }
 0x362   : > { %v2190_v47 = vpack.c.bf16 %v5673_v7, %v5672_v41  ;;  %v7202_v14 = vpop.f32.mrb[55].mxu1  ;;  %5750 = vmatprep.subr.bf16.mxu0 %v7836_v18 }
 0x363   : > { %v2189_v2 = vpack.c.bf16 %v7202_v14, %v7197_v21 }
 0x364   : > { %5731 = vmatmul.mubr.msk.bf16.vlgmr.msra.gmra.mrb[68].mxu1 %vm2213_vm2, %v2190_v47 }
 0x365   : > { %5743 = vmatpush3.bf16.msra.mxu1 %v6102_v54  ;;  %5746 = vmatprep.mubr.msk.bf16.mxu1 %vm6228_vm4, %v7836_v18 }
 0x366   : > { %5744 = vmatprep.subr.bf16.mxu1 %v7836_v18 }
 0x367   : > { %v5676_v31 = vpop.f32.mrb[56].mxu1 }
 0x368   : > { %v7214_v5 = vpop.f32.mrb[57].mxu1 }
 0x369   : > { %v5677_v6 = vpop.f32.mrb[58].mxu1  ;;  %5745 = vmatpush3.bf16.msra.mxu1 %v6104_v20 }
 0x36a   : > { %v2192_v30 = vpack.c.bf16 %v5677_v6, %v5676_v31  ;;  %v2165_v25 = vpop.f32.mrb[59].mxu1  ;;  %5758 = vmatprep.subr.bf16.mxu1 %v7836_v18 }
 0x36b   : > { %v2191_v16 = vpack.c.bf16 %v2165_v25, %v7214_v5 }
 0x36c   : > { %5739 = vmatmul.mubr.msk.bf16.vlgmr.msra.gmra.mrb[72].mxu0 %vm2213_vm2, %v2192_v30  ;;  %5747 = vmatmul.mubr.msk.bf16.vlgmr.msra.gmra.mrb[72].mxu1 %vm2213_vm2, %v2177_v43  ;;  %v6111_v43 = vld [vmem:[%s7821_s3 + $0x68] sm:$0xff]  }
 0x36d   : > { %5751 = vmatpush3.bf16.msra.mxu0 %v6105_v46  ;;  %5759 = vmatpush3.bf16.msra.mxu1 %v6106_v28 }
 0x36e   : > { %5752 = vmatprep.subr.bf16.mxu0 %v7836_v18  ;;  %5760 = vmatprep.subr.bf16.mxu1 %v7836_v18 }
 0x36f   : > { %5754 = vmatprep.mubr.msk.bf16.mxu0 %vm6228_vm4, %v7836_v18  ;;  %5762 = vmatprep.mubr.msk.bf16.mxu1 %vm6228_vm4, %v7836_v18 }
 0x371   : > { %5753 = vmatpush3.bf16.msra.mxu0 %v6107_v19  ;;  %5761 = vmatpush3.bf16.msra.mxu1 %v6108_v58 }
 0x372   : > { %5766 = vmatprep.subr.bf16.mxu0 %v7836_v18  ;;  %5774 = vmatprep.subr.bf16.mxu1 %v7836_v18 }
 0x374   : > { %5755 = vmatmul.mubr.msk.bf16.vlgmr.msra.gmra.mrb[76].mxu0 %vm2213_vm2, %v2179_v59  ;;  %5763 = vmatmul.mubr.msk.bf16.vlgmr.msra.gmra.mrb[76].mxu1 %vm2213_vm2, %v2181_v4  ;;  %v6115_v59 = vld [vmem:[%s7821_s3 + $0xa8] sm:$0xff]  }
 0x375   : > { %5767 = vmatpush3.bf16.msra.mxu0 %v6109_v24  ;;  %5775 = vmatpush3.bf16.msra.mxu1 %v6110_v50 }
 0x376   : > { %5768 = vmatprep.subr.bf16.mxu0 %v7836_v18  ;;  %5776 = vmatprep.subr.bf16.mxu1 %v7836_v18 }
 0x377   : > { %5770 = vmatprep.mubr.msk.bf16.mxu0 %vm6228_vm4, %v7836_v18  ;;  %5778 = vmatprep.mubr.msk.bf16.mxu1 %vm6228_vm4, %v7836_v18 }
 0x379   : > { %5769 = vmatpush3.bf16.msra.mxu0 %v6111_v43  ;;  %5777 = vmatpush3.bf16.msra.mxu1 %v6112_v12 }
 0x37a   : > { %5782 = vmatprep.subr.bf16.mxu0 %v7836_v18  ;;  %5790 = vmatprep.subr.bf16.mxu1 %v7836_v18 }
 0x37c   : > { %5771 = vmatmul.mubr.msk.bf16.vlgmr.msra.gmra.mrb[80].mxu0 %vm2213_vm2, %v2183_v49  ;;  %5779 = vmatmul.mubr.msk.bf16.vlgmr.msra.gmra.mrb[80].mxu1 %vm2213_vm2, %v2185_v48 }
 0x37d   : > { %5783 = vmatpush3.bf16.msra.mxu0 %v6113_v63  ;;  %5791 = vmatpush3.bf16.msra.mxu1 %v6114_v17 }
 0x37e   : > { %5784 = vmatprep.subr.bf16.mxu0 %v7836_v18  ;;  %5792 = vmatprep.subr.bf16.mxu1 %v7836_v18 }
 0x37f   : > { %5786 = vmatprep.mubr.msk.bf16.mxu0 %vm6228_vm4, %v7836_v18  ;;  %5794 = vmatprep.mubr.msk.bf16.mxu1 %vm6228_vm4, %v7836_v18 }
 0x381   : > { %5785 = vmatpush3.bf16.msra.mxu0 %v6115_v59  ;;  %5793 = vmatpush3.bf16.msra.mxu1 %v6116_v42  ;;  %v3178_v42 = vshra.s32 %v6592_v9, 2 }
 0x382   : > { %5798 = vmatprep.subr.bf16.mxu0 %v7836_v18  ;;  %5806 = vmatprep.subr.bf16.mxu1 %v7836_v18 }
 0x384   : > { %5787 = vmatmul.mubr.msk.bf16.vlgmr.msra.gmra.mrb[84].mxu0 %vm2213_vm2, %v2187_v27  ;;  %5795 = vmatmul.mubr.msk.bf16.vlgmr.msra.gmra.mrb[84].mxu1 %vm2213_vm2, %v2189_v2 }
 0x385   : > { %5799 = vmatpush3.bf16.msra.mxu0 %v6117_v36  ;;  %5802 = vmatprep.mubr.msk.bf16.mxu0 %vm6228_vm4, %v7836_v18  ;;  %v3179_v36 = vshra.s32 %v6597_v10, 2 }
 0x386   : > { %5800 = vmatprep.subr.bf16.mxu0 %v7836_v18  ;;  %5808 = vmatprep.mubr.msk.bf16.mxu1 %vm6228_vm4, %v7836_v18 }
 0x389   : > { %5801 = vmatpush3.bf16.msra.mxu0 %v6118_v29 }
 0x38a   : > { %5820 = vmatprep.subr.bf16.mxu0 %v7836_v18 }
 0x38c   : > { %5803 = vmatmul.mubr.msk.bf16.vlgmr.msra.gmra.mrb[88].mxu0 %vm2213_vm2, %v2191_v16 }
 0x38d   : > { %5828 = vmatprep.mubr.msk.bf16.mxu0 %vm6228_vm4, %v7836_v18  ;;  %5821 = vmatpush3.bf16.msra.mxu0 %v6119_v23 }
 0x38e   : > { %5822 = vmatprep.subr.bf16.mxu0 %v7836_v18 }
 0x391   : > { %5823 = vmatpush3.bf16.msra.mxu0 %v6121_v1 }
 0x392   : > { %5824 = vmatprep.subr.bf16.mxu0 %v7836_v18 }
 0x395   : > { %5825 = vmatpush3.bf16.msra.mxu0 %v6123_v22  ;;  %v3189_v22 = vmul.u32 11, %v3179_v36 }
 0x396   : > { %5826 = vmatprep.subr.bf16.mxu0 %v7836_v18 }
 0x407   : > { %v2251_v57 = vpop.f32.mrb[56].mxu0 }
 0x408   : > { %v5684_v4 = vpop.f32.mrb[57].mxu0 }
 0x409   : > { %v2254_v38 = vpop.f32.mrb[58].mxu0  ;;  %v3184_v4 = vand.u32 3, %v6597_v10 }
 0x40a   : > { %v5685_v40 = vpop.f32.mrb[59].mxu0 }
 0x40f   : > { %v2315_v37 = vpop.f32.mrb[60].mxu0 }
 0x410   : > { %v5692_v60 = vpop.f32.mrb[61].mxu0 }
 0x411   : > { %v2318_v35 = vpop.f32.mrb[62].mxu0 }
 0x412   : > { %v5693_v15 = vpop.f32.mrb[63].mxu0 }
 0x417   : > { %v2379_v49 = vpop.f32.mrb[60].mxu1 }
 0x418   : > { %v5700_v52 = vpop.f32.mrb[61].mxu1 }
 0x419   : > { %v2382_v56 = vpop.f32.mrb[62].mxu1 }
 0x41a   : > { %v5701_v8 = vpop.f32.mrb[63].mxu1 }
 0x41f   : > { %v2443_v3 = vpop.f32.mrb[64].mxu0 }
 0x420   : > { %v5708_v0 = vpop.f32.mrb[65].mxu0 }
 0x421   : > { %v2446_v11 = vpop.f32.mrb[66].mxu0 }
 0x422   : > { %v5709_v44 = vpop.f32.mrb[67].mxu0 }
 0x427   : > { %v2507_v48 = vpop.f32.mrb[64].mxu1 }
 0x428   : > { %v5716_v51 = vpop.f32.mrb[65].mxu1 }
 0x429   : > { %v2510_v53 = vpop.f32.mrb[66].mxu1 }
 0x42a   : > { %v5717_v13 = vpop.f32.mrb[67].mxu1 }
 0x42b   : > { %v3194_v13 = vshra.s32 %v3189_v22, 5 }
 0x42f   : > { %v7334_v26 = vpop.f32.mrb[68].mxu0 }
 0x430   : > { %v5724_v33 = vpop.f32.mrb[69].mxu0 }
 0x431   : > { %v7336_v55 = vpop.f32.mrb[70].mxu0 }
 0x432   : > { %v5725_v61 = vpop.f32.mrb[71].mxu0 }
 0x433   : > { %v3209_v61 = vshra.s32 %v3184_v4, 1 }
 0x437   : > { %v2635_v27 = vpop.f32.mrb[68].mxu1 }
 0x438   : > { %v5732_v45 = vpop.f32.mrb[69].mxu1 }
 0x439   : > { %v7338_v41 = vpop.f32.mrb[70].mxu1 }
 0x43a   : > { %v5733_v21 = vpop.f32.mrb[71].mxu1 }
 0x43b   : > { %v3180_v21 = vshra.s32 %v6636_v32, 2 }
 0x43f   : > { %v7340_v7 = vpop.f32.mrb[72].mxu0  ;;  %v2755_v54 = vpop.f32.mrb[72].mxu1 }
 0x440   : > { %v2756_v47 = vadd.f32 %v2755_v54, %v2251_v57  ;;  %v5740_v14 = vpop.f32.mrb[73].mxu0  ;;  %v5748_v2 = vpop.f32.mrb[73].mxu1  ;;  %v3183_v57 = vand.u32 3, %v6592_v9 }
 0x441   : > { %v7342_v20 = vpop.f32.mrb[74].mxu0  ;;  %v2758_v31 = vpop.f32.mrb[74].mxu1 }
 0x442   : > { %v2759_v5 = vadd.f32 %v2758_v31, %v2254_v38  ;;  %v5741_v6 = vpop.f32.mrb[75].mxu0  ;;  %v5749_v46 = vpop.f32.mrb[75].mxu1  ;;  %v3188_v38 = vmul.u32 11, %v3178_v42  ;;  %v3208_v33 = vshra.s32 %v3183_v57, 1 }
 0x443   : > { %v3185_v6 = vand.u32 3, %v6636_v32  ;;  %v3190_v46 = vmul.u32 11, %v3180_v21 }
 0x444   : > { %v3193_v51 = vshra.s32 %v3188_v38, 5 }
 0x446   : > { %v3218_v14 = vadd.s32 %v3208_v33, %v3193_v51 }
 0x447   : > { %v2811_v28 = vpop.f32.mrb[76].mxu0  ;;  %v2867_v30 = vpop.f32.mrb[76].mxu1 }
 0x448   : > { %v2812_v25 = vadd.f32 %v2811_v28, %v2315_v37  ;;  %v2868_v16 = vadd.f32 %v2867_v30, %v2379_v49  ;;  %v5756_v19 = vpop.f32.mrb[77].mxu0  ;;  %v5764_v58 = vpop.f32.mrb[77].mxu1 }
 0x449   : > { %v2814_v24 = vpop.f32.mrb[78].mxu0  ;;  %v2870_v50 = vpop.f32.mrb[78].mxu1 }
 0x44a   : > { %v3154_v43 = vadd.f32 %v2812_v25, %v2756_v47  ;;  %v2815_v12 = vadd.f32 %v2814_v24, %v2318_v35  ;;  %v2871_v63 = vadd.f32 %v2870_v50, %v2382_v56  ;;  %v5757_v17 = vpop.f32.mrb[79].mxu0  ;;  %v5765_v59 = vpop.f32.mrb[79].mxu1  ;;  %v3198_v25 = vmul.u32 3, %v3193_v51 }
 0x44b   : > { %v3223_v17 = vmul.u32 4, %v3218_v14 }
 0x44c   : > { %v3155_v29 = vadd.f32 %v2815_v12, %v2759_v5  ;;  %v3213_v12 = vand.u32 1, %v3183_v57 }
 0x44f   : > { %v2923_v23 = vpop.f32.mrb[80].mxu0  ;;  %v2979_v1 = vpop.f32.mrb[80].mxu1 }
 0x450   : > { %v2924_v40 = vadd.f32 %v2923_v23, %v2443_v3  ;;  %v2980_v37 = vadd.f32 %v2979_v1, %v2507_v48  ;;  %v5772_v60 = vpop.f32.mrb[81].mxu0  ;;  %v5780_v35 = vpop.f32.mrb[81].mxu1  ;;  %v3181_v3 = vshra.s32 %v6639_v34, 2  ;;  %v3195_v23 = vshra.s32 %v3190_v46, 5 }
 0x451   : > { %v2926_v15 = vpop.f32.mrb[82].mxu0  ;;  %v2982_v49 = vpop.f32.mrb[82].mxu1  ;;  %v3210_v1 = vshra.s32 %v3185_v6, 1 }
 0x452   : > { %v3156_v52 = vadd.f32 %v2924_v40, %v2868_v16  ;;  %v2927_v56 = vadd.f32 %v2926_v15, %v2446_v11  ;;  %v2983_v8 = vadd.f32 %v2982_v49, %v2510_v53  ;;  %v5773_v0 = vpop.f32.mrb[83].mxu0  ;;  %v5781_v44 = vpop.f32.mrb[83].mxu1  ;;  %v3219_v11 = vadd.s32 %v3209_v61, %v3194_v13 }
 0x453   : > { %v3186_v16 = vand.u32 3, %v6639_v34  ;;  %v3191_v19 = vmul.u32 11, %v3181_v3  ;;  %v3182_v40 = vshra.s32 %v6646_v62, 2  ;;  %v3215_v61 = vand.u32 1, %v3185_v6  ;;  %v6120_v34 = vld [vmem:[%s7822_s4 + $0x60] sm:$0xff]  }
 0x454   : > { %v7348_v45 = vadd.f32 %v3156_v52, %v3154_v43  ;;  %v3157_v10 = vadd.f32 %v2927_v56, %v2871_v63  ;;  %v3199_v43 = vmul.u32 3, %v3194_v13  ;;  %v3214_v63 = vand.u32 1, %v3184_v4 }
 0x455   : > { %v3224_v59 = vmul.u32 4, %v3219_v11  ;;  %v3196_v38 = vshra.s32 %v3191_v19, 5  ;;  %v3211_v22 = vshra.s32 %v3186_v16, 1  ;;  %v3220_v52 = vadd.s32 %v3210_v1, %v3195_v23  ;;  %v6124_v1 = vld [vmem:[%s7822_s4 + $0x70] sm:$0xff]  }
 0x456   : > { %v7352_v48 = vadd.f32 %v3157_v10, %v3155_v29  ;;  %v3204_v35 = vsub.s32 %v3179_v36, %v3199_v43  ;;  %v3187_v56 = vand.u32 3, %v6646_v62 }
 0x457   : > { %v3035_v54 = vpop.f32.mrb[84].mxu0  ;;  %v3091_v47 = vpop.f32.mrb[84].mxu1  ;;  %v3229_v15 = vadd.s32 %v3224_v59, %v3214_v63  ;;  %v3221_v4 = vadd.s32 %v3211_v22, %v3196_v38  ;;  %v3201_v14 = vmul.u32 3, %v3196_v38  ;;  %v6122_v59 = vld [vmem:[%s7822_s4 + $0x68] sm:$0xff]  }
 0x458   : > { %v3036_v53 = vadd.f32 %v3035_v54, %v7334_v26  ;;  %v3092_v2 = vadd.f32 %v3091_v47, %v2635_v27  ;;  %v5788_v31 = vpop.f32.mrb[85].mxu0  ;;  %v5796_v5 = vpop.f32.mrb[85].mxu1  ;;  %v3200_v54 = vmul.u32 3, %v3195_v23  ;;  %v3225_v47 = vmul.u32 4, %v3220_v52 }
 0x459   : > { %v3038_v28 = vpop.f32.mrb[86].mxu0  ;;  %v3094_v30 = vpop.f32.mrb[86].mxu1  ;;  %v3234_v33 = vadd.s32 %v3229_v15, %v3204_v35  ;;  %v3226_v11 = vmul.u32 4, %v3221_v4  ;;  %v3217_v32 = vand.u32 1, %v3187_v56  ;;  %v6129_v4 = vld [vmem:[%s7822_s4 + $0xa8] sm:$0xff]  }
 0x45a   : > { %v3158_v58 = vadd.f32 %v3036_v53, %v2980_v37  ;;  %v3039_v24 = vadd.f32 %v3038_v28, %v7336_v55  ;;  %v3095_v26 = vadd.f32 %v3094_v30, %v7338_v41  ;;  %v5789_v27 = vpop.f32.mrb[87].mxu0  ;;  %v5797_v50 = vpop.f32.mrb[87].mxu1  ;;  %v3203_v37 = vsub.s32 %v3178_v42, %v3198_v25 }
 0x45b   : > { %v3228_v55 = vadd.s32 %v3223_v17, %v3213_v12  ;;  %v3216_v42 = vand.u32 1, %v3186_v16  ;;  %v3212_v53 = vshra.s32 %v3187_v56, 1  ;;  %v3205_v6 = vsub.s32 %v3180_v21, %v3200_v54  ;;  %v6130_v56 = vld [vmem:[%s7822_s4 + $0xe8] sm:$0xff]  }
 0x45c   : > { %v3159_v29 = vadd.f32 %v3039_v24, %v2983_v8  ;;  %v3192_v8 = vmul.u32 11, %v3182_v40  ;;  %v3230_v46 = vadd.s32 %v3225_v47, %v3215_v61  ;;  %vm3239_vm6 = vcmp.eq.s32.totalorder %v6620_v39, %v3234_v33  ;;  %v6131_v33 = vld [vmem:[%s7822_s4 + $0xb0] sm:$0xff]  }
 0x45d   : > { %v3233_v13 = vadd.s32 %v3228_v55, %v3203_v37  ;;  %v3206_v28 = vsub.s32 %v3181_v3, %v3201_v14  ;;  %v3231_v30 = vadd.s32 %v3226_v11, %v3216_v42  ;;  %v5143_v24 = vsel %vm3239_vm6, 1.0, %v7836_v18  ;;  %v6132_v61 = vld [vmem:[%s7822_s4 + $0xf0] sm:$0xff]   ;;  %v6133_v42 = vld [vmem:[%s7822_s4 + $0xb8] sm:$0xff]  }
 0x45e   : > { %v3197_v62 = vshra.s32 %v3192_v8, 5 }
 0x45f   : > { %v3147_v60 = vpop.f32.mrb[88].mxu0  ;;  %vm3238_vm5 = vcmp.eq.s32.totalorder %v6620_v39, %v3233_v13 }
 0x460   : > { %v3148_v41 = vadd.f32 %v3147_v60, %v7340_v7  ;;  %v5804_v49 = vpop.f32.mrb[89].mxu0  ;;  %v5141_v7 = vld [vmem:[%s7827_s9 + $0x1] ss:$0 sm:$0xff]  ;;  %v3222_v25 = vadd.s32 %v3212_v53, %v3197_v62  ;;  %v3202_v27 = vmul.u32 3, %v3197_v62 }
 0x461   : > { %v3150_v57 = vpop.f32.mrb[90].mxu0  ;;  %v6128_v49 = vld [vmem:[%s7822_s4 + $0xe0] sm:$0xff]  }
 0x462   : > { %v3160_v0 = vadd.f32 %v3148_v41, %v3092_v2  ;;  %v3151_v44 = vadd.f32 %v3150_v57, %v7342_v20  ;;  %v5805_v51 = vpop.f32.mrb[91].mxu0  ;;  %v3227_v21 = vmul.u32 4, %v3222_v25  ;;  %v3207_v3 = vsub.s32 %v3182_v40, %v3202_v27  ;;  %v6126_v40 = vld [vmem:[%s7822_s4 + $0x78] sm:$0xff]   ;;  %v6127_v41 = vld [vmem:[%s7822_s4 + $0xa0] sm:$0xff]  }
 0x463   : > { %v6135_v62 = vld [vmem:[%s7822_s4 + $0x100] sm:$0xff]  }
 0x464   : > { %v3164_v36 = vadd.f32 %v3160_v0, %v3158_v58  ;;  %v3161_v10 = vadd.f32 %v3151_v44, %v3095_v26  ;;  %v3235_v26 = vadd.s32 %v3230_v46, %v3205_v6  ;;  %v3232_v12 = vadd.s32 %v3227_v21, %v3217_v32  ;;  %v6136_v53 = vld [vmem:[%s7822_s4] sm:$0xff]   ;;  %v6141_v6 = vld [vmem:[%s7822_s4 + $0x118] sm:$0xff]   ;;  %v6152_v32 = vld [vmem:[%s7822_s4 + $0xc8] sm:$0xff]  }
 0x465   : > { %v6142_v46 = vld [vmem:[%s7822_s4 + $0x18] sm:$0xff]   ;;  %v6144_v25 = vld [vmem:[%s7822_s4 + $0x80] sm:$0xff]   ;;  %v6153_v21 = vld [vmem:[%s7822_s4 + $0xd0] sm:$0xff]  }
 0x466   : > { %v3166_v2 = vadd.f32 %v3164_v36, %v7348_v45  ;;  %v3165_v20 = vadd.f32 %v3161_v10, %v3159_v29  ;;  %v5142_v45 = vsel %vm3238_vm5, 1.0, %v7836_v18  ;;  %vm3240_vm8 = vcmp.eq.s32.totalorder %v6620_v39, %v3235_v26  ;;  %v6134_v36 = vld [vmem:[%s7822_s4 + $0xf8] sm:$0xff]  }
 0x467   : > { %v3253_v43 = vpack.c.bf16 %v5143_v24, %v5142_v45  ;;  %v5144_v63 = vsel %vm3240_vm8, 1.0, %v7836_v18  ;;  %v3237_v29 = vadd.s32 %v3232_v12, %v3207_v3  ;;  %v6146_v45 = vld [vmem:[%s7822_s4 + $0x88] sm:$0xff]   ;;  %v6149_v24 = vld [vmem:[%s7822_s4 + $0x58] sm:$0xff]   ;;  %v6156_v3 = vld [vmem:[%s7824_s6] sm:$0xff]  }
 0x468   : > { %v3173_v31 = vadd.f32 %v5141_v7, %v3166_v2  ;;  %v3167_v5 = vadd.f32 %v3165_v20, %v7352_v48  ;;  %v3236_v48 = vadd.s32 %v3231_v30, %v3206_v28  ;;  %v6137_v2 = vld [vmem:[%s7822_s4 + $0x108] sm:$0xff]   ;;  %v6143_v30 = vld [vmem:[%s7822_s4 + $0x40] sm:$0xff]   ;;  %v6150_v26 = vld [vmem:[%s7822_s4 + $0x98] sm:$0xff]  }
 0x469   : > { %vm3242_vm10 = vcmp.eq.s32.totalorder %v6620_v39, %v3237_v29  ;;  %v6138_v20 = vld [vmem:[%s7822_s4 + $0x8] sm:$0xff]   ;;  %v6161_v29 = vld [vmem:[%s7824_s6 + $0x10] sm:$0xff]  }
 0x46a   : > { %v3174_v16 = vadd.f32 %v5141_v7, %v3167_v5  ;;  %v3175_v19 = vmax.f32 %v3173_v31, 0.0  ;;  %vm3241_vm9 = vcmp.eq.s32.totalorder %v6620_v39, %v3236_v48  ;;  %v5146_v38 = vsel %vm3242_vm10, 1.0, %v7836_v18  ;;  %v6125_v39 = vld [vmem:[%s7822_s4 + $0x38] sm:$0xff]   ;;  %v6139_v31 = vld [vmem:[%s7822_s4 + $0x110] sm:$0xff]   ;;  %v6151_v48 = vld [vmem:[%s7822_s4 + $0xc0] sm:$0xff]  }
 0x46b   : > { %v5145_v17 = vsel %vm3241_vm9, 1.0, %v7836_v18  ;;  %v3255_v22 = vpack.c.bf16 %v5146_v38, %v5146_v38  ;;  %5827 = vmatpush3.bf16.msra.mxu0 %v6125_v39  ;;  %v6140_v5 = vld [vmem:[%s7822_s4 + $0x10] sm:$0xff]   ;;  %v6157_v12 = vld [vmem:[%s7824_s6 + $0x48] sm:$0xff]   ;;  %v6164_v38 = vld [vmem:[%s7824_s6 + $0x18] sm:$0xff]  }
 0x46c   : > { %v3176_v58 = vmax.f32 %v3174_v16, 0.0  ;;  %v3254_v23 = vpack.c.bf16 %v5145_v17, %v5144_v63  ;;  %5844 = vmatprep.subr.bf16.mxu0 %v7836_v18  ;;  %v6145_v16 = vld [vmem:[%s7822_s4 + $0x48] sm:$0xff]   ;;  %v6159_v17 = vld [vmem:[%s7824_s6 + $0x80] sm:$0xff]  }
 0x46d   : > { %v6158_v63 = vld [vmem:[%s7824_s6 + $0x8] sm:$0xff]   ;;  %v6166_v39 = vld [vmem:[%s7824_s6 + $0x60] sm:$0xff]  }
 0x46e   : > { %v3177_v50 = vpack.c.bf16 %v3176_v58, %v3175_v19  ;;  %v6147_v19 = vld [vmem:[%s7822_s4 + $0x50] sm:$0xff]  }
 0x46f   : > { %v6148_v58 = vld [vmem:[%s7822_s4 + $0x90] sm:$0xff]  }
 0x470   : > { %5807 = vmatpush3.bf16.msra.mxu1 %v3177_v50  ;;  %v6154_v50 = vld [vmem:[%s7822_s4 + $0xd8] sm:$0xff]  }
 0x471   : > { %5832 = vmatprep.subr.bf16.mxu1 %v7836_v18 }
 0x473   : > { %5809 = vmatmul.mubr.msk.bf16.vlgmr.msra.gmra.mrb[88].mxu1 %vm3256_vm7, %v3253_v43 }
 0x474   : > { %5812 = vmatprep.mubr.msk.bf16.mxu1 %vm6228_vm4, %v7836_v18  ;;  %5833 = vmatpush3.bf16.msra.mxu1 %v6120_v34  ;;  %v6155_v34 = vld [vmem:[%s7824_s6 + $0x40] sm:$0xff]  }
 0x475   : > { %5834 = vmatprep.subr.bf16.mxu1 %v7836_v18 }
 0x478   : > { %5835 = vmatpush3.bf16.msra.mxu1 %v6122_v59  ;;  %v6160_v59 = vld [vmem:[%s7824_s6 + $0x50] sm:$0xff]  }
 0x479   : > { %5836 = vmatprep.subr.bf16.mxu1 %v7836_v18 }
 0x47b   : > { %5813 = vmatmul.mubr.msk.bf16.gmra.mrb[92].mxu1 %vm3256_vm7, %v3254_v23  ;;  %v6162_v23 = vld [vmem:[%s7824_s6 + $0x88] sm:$0xff]  }
 0x47c   : > { %5816 = vmatprep.mubr.msk.bf16.mxu1 %vm6228_vm4, %v7836_v18  ;;  %5837 = vmatpush3.bf16.msra.mxu1 %v6124_v1  ;;  %v6163_v1 = vld [vmem:[%s7824_s6 + $0x58] sm:$0xff]  }
 0x47d   : > { %5838 = vmatprep.subr.bf16.mxu1 %v7836_v18 }
 0x480   : > { %5839 = vmatpush3.bf16.msra.mxu1 %v6126_v40  ;;  %v6167_v40 = vld [vmem:[%s7824_s6 + $0x20] sm:$0xff]  }
 0x481   : > { %5856 = vmatprep.subr.bf16.mxu1 %v7836_v18 }
 0x483   : > { %5817 = vmatmul.mubr.msk.bf16.gmra.mrb[96].mxu1 %vm3256_vm7, %v3255_v22  ;;  %v6165_v22 = vld [vmem:[%s7824_s6 + $0x90] sm:$0xff]  }
 0x484   : > { %5840 = vmatprep.mubr.msk.bf16.mxu1 %vm6228_vm4, %v7836_v18 }
 0x546   : > { %v3300_v60 = vpop.f32.mrb[88].mxu1 }
 0x547   : > { %v5810_v37 = vpop.f32.mrb[89].mxu1 }
 0x548   : > { %v3303_v35 = vpop.f32.mrb[90].mxu1  ;;  %v6169_v37 = vld [vmem:[%s7824_s6 + $0x68] sm:$0xff]  }
 0x549   : > { %v7416_v55 = vpack.c.bf16 %v3303_v35, %v3300_v60  ;;  %v5811_v15 = vpop.f32.mrb[91].mxu1  ;;  %v6168_v60 = vld [vmem:[%s7824_s6 + $0x98] sm:$0xff]   ;;  %v6170_v35 = vld [vmem:[%s7824_s6 + $0x28] sm:$0xff]  }
 0x54a   : > { %v6172_v15 = vld [vmem:[%s7824_s6 + $0x70] sm:$0xff]  }
 0x54b   : > { %v3342_v52 = vrot.slane %v7416_v55, 2  ;;  %v3427_v57 = vrot.slane %v7416_v55, 6  ;;  %v3806_v27 = vrot.slane %v7416_v55, 4 }
 0x54d   : > { %5829 = vmatmul.mubr.msk.bf16.vlgmr.msra.gmra.mrb[92].mxu0 %vm3367_vm11, %v3342_v52  ;;  %5841 = vmatmul.mubr.msk.bf16.vlgmr.msra.gmra.mrb[100].mxu1 %vm3367_vm11, %v3427_v57  ;;  %v6174_v52 = vld [vmem:[%s7824_s6 + $0xa8] sm:$0xff]   ;;  %v6177_v57 = vld [vmem:[%s7824_s6 + $0xb0] sm:$0x7f]  }
 0x54e   : > { %5845 = vmatpush3.bf16.msra.mxu0 %v6127_v41  ;;  %5857 = vmatpush3.bf16.msra.mxu1 %v6128_v49  ;;  %v3308_v8 = vpop.f32.mrb[92].mxu1  ;;  %v6173_v41 = vld [vmem:[%s7824_s6 + $0x30] sm:$0xff]   ;;  %v6175_v49 = vld [vmem:[%s7824_s6 + $0x78] sm:$0xff]  }
 0x54f   : > { %5846 = vmatprep.subr.bf16.mxu0 %v7836_v18  ;;  %5858 = vmatprep.subr.bf16.mxu1 %v7836_v18  ;;  %v5814_v0 = vpop.f32.mrb[93].mxu1 }
 0x550   : > { %v3311_v44 = vpop.f32.mrb[94].mxu1  ;;  %5852 = vmatprep.mubr.msk.bf16.mxu0 %vm6228_vm4, %v7836_v18  ;;  %5864 = vmatprep.mubr.msk.bf16.mxu1 %vm6228_vm4, %v7836_v18  ;;  %v4060_v0 = vsub.s32 0, %v6592_v9 }
 0x551   : > { %v7440_v51 = vpack.c.bf16 %v3311_v44, %v3308_v8  ;;  %v5815_v13 = vpop.f32.mrb[95].mxu1  ;;  %v7643_v8 = vld [vmem:[%s370_s30] sm:$0xf]  ;;  %s4953_s30 = sshll.u32 %s7846_s14, 3 }
 0x552   : > { %5847 = vmatpush3.bf16.msra.mxu0 %v6129_v4  ;;  %5859 = vmatpush3.bf16.msra.mxu1 %v6130_v56  ;;  %v6176_v4 = vld [vmem:[%s7824_s6 + $0x38] sm:$0xff]   ;;  %v4064_v56 = vsub.s32 1, %v6592_v9  ;;  %v4087_v13 = vrot.slane %v7643_v8, %v4060_v0  ;;  %s7785_s15 = scalar_lea.vmem %s7828_s10, %s4953_s30 }
 0x553   : > { %5848 = vmatprep.subr.bf16.mxu0 %v7836_v18  ;;  %5860 = vmatprep.subr.bf16.mxu1 %v7836_v18  ;;  %v3512_v7 = vrot.slane %v7440_v51, 2  ;;  %v3596_v14 = vrot.slane %v7440_v51, 6  ;;  %v3941_v43 = vrot.slane %v7440_v51, 4  ;;  %4874 = vst [vmem:[%s7785_s15] sm:$0xff] %v7836_v18 }
 0x554   : > { %v4091_v44 = vrot.slane %v7643_v8, %v4064_v56  ;;  %4714 = vrot.lane.b32.xlu0 %v7643_v8, %s6229_s27 }
 0x556   : > { %5849 = vmatpush3.bf16.msra.mxu0 %v6131_v33  ;;  %5861 = vmatpush3.bf16.msra.mxu1 %v6132_v61  ;;  %v3316_v10 = vpop.f32.mrb[96].mxu1  ;;  %v4068_v33 = vsub.s32 2, %v6592_v9  ;;  %v4100_v61 = vpack.c.bf16 %v4091_v44, %v4091_v44 }
 0x557   : > { %5850 = vmatprep.subr.bf16.mxu0 %v7836_v18  ;;  %5862 = vmatprep.subr.bf16.mxu1 %v7836_v18  ;;  %v5818_v54 = vpop.f32.mrb[97].mxu1  ;;  %v3324_v28 = vpack.c.bf16 %v3316_v10, %v3316_v10  ;;  %v6178_v10 = vld [vmem:[%s7823_s5 + $0x40] sm:$0xff]  }
 0x558   : > { %v3319_v47 = vpop.f32.mrb[98].mxu1  ;;  %v6179_v54 = vld [vmem:[%s7823_s5 + $0xc0] sm:$0xff]  }
 0x559   : > { %v5819_v11 = vpop.f32.mrb[99].mxu1 }
 0x55a   : > { %5851 = vmatpush3.bf16.msra.mxu0 %v6133_v42  ;;  %5863 = vmatpush3.bf16.msra.mxu1 %v6134_v36  ;;  %v4099_v42 = vpack.c.bf16 %v4087_v13, %v4087_v13  ;;  %v7657_v36 = vrot.slane %v7643_v8, %v4068_v33  ;;  %v6182_v11 = vld [vmem:[%s7823_s5 + $0x48] sm:$0xff]  }
 0x55b   : > { %5868 = vmatprep.subr.bf16.mxu0 %v7836_v18  ;;  %5880 = vmatprep.subr.bf16.mxu1 %v7836_v18 }
 0x55c   : > { %v4101_v47 = vpack.c.bf16 %v7657_v36, %v7657_v36  ;;  %4798 = vrot.lane.b32.xlu0 %v7657_v36, %s6231_s16  ;;  %v4709_v36 = vld [vmem:[%s7827_s9 + $0x3] sm:$0x1] }
 0x55d   : > { %5853 = vmatmul.mubr.msk.bf16.vlgmr.msra.gmra.mrb[96].mxu0 %vm3367_vm11, %v3512_v7  ;;  %5865 = vmatmul.mubr.msk.bf16.vlgmr.msra.gmra.mrb[104].mxu1 %vm3367_vm11, %v3596_v14  ;;  %v6180_v7 = vld [vmem:[%s7823_s5] sm:$0xff]  }
 0x55e   : > { %5869 = vmatpush3.bf16.msra.mxu0 %v6135_v62  ;;  %5881 = vmatpush3.bf16.msra.mxu1 %v6136_v53  ;;  %v6181_v14 = vld [vmem:[%s7823_s5 + $0x80] sm:$0xff]   ;;  %v6183_v62 = vld [vmem:[%s7823_s5 + $0xc8] sm:$0xff]  }
 0x55f   : > { %5870 = vmatprep.subr.bf16.mxu0 %v7836_v18  ;;  %5882 = vmatprep.subr.bf16.mxu1 %v7836_v18  ;;  %v6184_v53 = vld [vmem:[%s7823_s5 + $0x8] sm:$0xff]  }
 0x560   : > { %5888 = vmatprep.mubr.msk.bf16.mxu1 %vm6228_vm4, %v7836_v18  ;;  %5876 = vmatprep.mubr.msk.bf16.mxu0 %vm6228_vm4, %v7836_v18 }
 0x562   : > { %5871 = vmatpush3.bf16.msra.mxu0 %v6137_v2  ;;  %5883 = vmatpush3.bf16.msra.mxu1 %v6138_v20  ;;  %v6185_v2 = vld [vmem:[%s7823_s5 + $0x88] sm:$0xff]   ;;  %v6186_v20 = vld [vmem:[%s7823_s5 + $0x50] sm:$0xff]  }
 0x563   : > { %5872 = vmatprep.subr.bf16.mxu0 %v7836_v18  ;;  %5884 = vmatprep.subr.bf16.mxu1 %v7836_v18 }
 0x566   : > { %5873 = vmatpush3.bf16.msra.mxu0 %v6139_v31  ;;  %5885 = vmatpush3.bf16.msra.mxu1 %v6140_v5  ;;  %v6187_v31 = vld [vmem:[%s7823_s5 + $0xd0] sm:$0xff]  }
 0x567   : > { %5874 = vmatprep.subr.bf16.mxu0 %v7836_v18  ;;  %5886 = vmatprep.subr.bf16.mxu1 %v7836_v18  ;;  %v6188_v5 = vld [vmem:[%s7823_s5 + $0x10] sm:$0xff]  }
 0x56a   : > { %5875 = vmatpush3.bf16.msra.mxu0 %v6141_v6  ;;  %5887 = vmatpush3.bf16.msra.mxu1 %v6142_v46  ;;  %v6189_v6 = vld [vmem:[%s7823_s5 + $0x90] sm:$0xff]   ;;  %v6190_v46 = vld [vmem:[%s7823_s5 + $0x58] sm:$0xff]  }
 0x56b   : > { %5892 = vmatprep.subr.bf16.mxu0 %v7836_v18  ;;  %5904 = vmatprep.subr.bf16.mxu1 %v7836_v18 }
 0x56d   : > { %5889 = vmatmul.mubr.msk.bf16.vlgmr.msra.gmra.mrb[108].mxu1 %vm3367_vm11, %v7416_v55  ;;  %5877 = vmatmul.mubr.msk.bf16.vlgmr.msra.gmra.mrb[100].mxu0 %vm3367_vm11, %v3324_v28  ;;  %v6171_v55 = vld [vmem:[%s7824_s6 + $0xa0] sm:$0xff]   ;;  %v6191_v28 = vld [vmem:[%s7823_s5 + $0xd8] sm:$0xff]  }
 0x56e   : > { %5893 = vmatpush3.bf16.msra.mxu0 %v6143_v30  ;;  %5905 = vmatpush3.bf16.msra.mxu1 %v6144_v25  ;;  %v6192_v30 = vld [vmem:[%s7823_s5 + $0x18] sm:$0xff]  }
 0x56f   : > { %5894 = vmatprep.subr.bf16.mxu0 %v7836_v18  ;;  %5906 = vmatprep.subr.bf16.mxu1 %v7836_v18  ;;  %v6193_v25 = vld [vmem:[%s7823_s5 + $0x98] sm:$0xff]  }
 0x570   : > { %5900 = vmatprep.mubr.msk.bf16.mxu0 %vm6228_vm4, %v7836_v18  ;;  %5912 = vmatprep.mubr.msk.bf16.mxu1 %vm6228_vm4, %v7836_v18 }
 0x572   : > { %5895 = vmatpush3.bf16.msra.mxu0 %v6145_v16  ;;  %5907 = vmatpush3.bf16.msra.mxu1 %v6146_v45  ;;  %v6194_v16 = vld [vmem:[%s7823_s5 + $0x60] sm:$0xff]  }
 0x573   : > { %5896 = vmatprep.subr.bf16.mxu0 %v7836_v18  ;;  %5908 = vmatprep.subr.bf16.mxu1 %v7836_v18  ;;  %v6195_v45 = vld [vmem:[%s7823_s5 + $0xe0] sm:$0xff]  }
 0x576   : > { %5897 = vmatpush3.bf16.msra.mxu0 %v6147_v19  ;;  %5909 = vmatpush3.bf16.msra.mxu1 %v6148_v58  ;;  %v6196_v19 = vld [vmem:[%s7823_s5 + $0x20] sm:$0xff]  }
 0x577   : > { %5898 = vmatprep.subr.bf16.mxu0 %v7836_v18  ;;  %5910 = vmatprep.subr.bf16.mxu1 %v7836_v18  ;;  %v6197_v58 = vld [vmem:[%s7823_s5 + $0xa0] sm:$0xff]  }
 0x57a   : > { %5899 = vmatpush3.bf16.msra.mxu0 %v6149_v24  ;;  %5911 = vmatpush3.bf16.msra.mxu1 %v6150_v26  ;;  %v6198_v24 = vld [vmem:[%s7823_s5 + $0x68] sm:$0xff]  }
 0x57b   : > { %5916 = vmatprep.subr.bf16.mxu0 %v7836_v18  ;;  %5553 = vmatprep.subr.bf16.mxu1 %v6155_v34  ;;  %v6199_v26 = vld [vmem:[%s7823_s5 + $0xe8] sm:$0xff]   ;;  %v6206_v34 = vld [vmem:[%s7823_s5 + $0x78] sm:$0xff]  }
 0x57d   : > { %5901 = vmatmul.mubr.msk.bf16.vlgmr.msra.gmra.mrb[104].mxu0 %vm3367_vm11, %v3806_v27  ;;  %5913 = vmatmul.mubr.msk.bf16.vlgmr.msra.gmra.mrb[112].mxu1 %vm3367_vm11, %v7440_v51  ;;  %v4355_v51 = vsel %vm4353_vm12, %v6177_v57, 0  ;;  %v6201_v27 = vld [vmem:[%s7823_s5 + $0xa8] sm:$0xff]  }
 0x57e   : > { %5917 = vmatpush3.bf16.msra.mxu0 %v6151_v48  ;;  %5924 = vmatprep.mubr.msk.bf16.mxu0 %vm6228_vm4, %v7836_v18  ;;  %v6200_v48 = vld [vmem:[%s7823_s5 + $0x28] sm:$0xff]  }
 0x57f   : > { %5918 = vmatprep.subr.bf16.mxu0 %v7836_v18  ;;  %5554 = vmatpush3.bf16.msra.mxu1 %v6156_v3  ;;  %v6207_v3 = vld [vmem:[%s7823_s5 + $0xf8] sm:$0xff]  }
 0x580   : > { %5555 = vmatprep.subr.bf16.mxu1 %v6157_v12  ;;  %4389 = vmatprep.mubr.bf16.mxu1 %v4100_v61  ;;  %v6208_v12 = vld [vmem:[%s7823_s5 + $0x38] sm:$0xff]  }
 0x582   : > { %5919 = vmatpush3.bf16.msra.mxu0 %v6152_v32  ;;  %v6202_v32 = vld [vmem:[%s7823_s5 + $0x70] sm:$0xff]  }
 0x583   : > { %5920 = vmatprep.subr.bf16.mxu0 %v7836_v18  ;;  %5556 = vmatpush3.bf16.msra.mxu1 %v6158_v63  ;;  %v6209_v63 = vld [vmem:[%s7823_s5 + $0xb8] sm:$0xff]  }
 0x584   : > { %5557 = vmatprep.subr.bf16.mxu1 %v6160_v59 }
 0x586   : > { %5921 = vmatpush3.bf16.msra.mxu0 %v6153_v21  ;;  %v6203_v21 = vld [vmem:[%s7823_s5 + $0xf0] sm:$0xff]  }
 0x587   : > { %5922 = vmatprep.subr.bf16.mxu0 %v7836_v18  ;;  %5558 = vmatpush3.bf16.msra.mxu1 %v6161_v29 }
 0x588   : > { %5559 = vmatprep.subr.bf16.mxu1 %v6163_v1 }
 0x58a   : > { %5923 = vmatpush3.bf16.msra.mxu0 %v6154_v50  ;;  %v6204_v50 = vld [vmem:[%s7823_s5 + $0x30] sm:$0xff]  }
 0x58b   : > { %5928 = vmatprep.subr.bf16.mxu0 %v7836_v18  ;;  %5560 = vmatpush3.bf16.msra.mxu1 %v6164_v38 }
 0x58c   : > { %5561 = vmatprep.subr.bf16.mxu1 %v6166_v39 }
 0x58d   : > { %5925 = vmatmul.mubr.msk.bf16.vlgmr.msra.gmra.mrb[108].mxu0 %vm3367_vm11, %v3941_v43  ;;  %v6205_v43 = vld [vmem:[%s7823_s5 + $0xb0] sm:$0xff]  }
 0x58e   : > { %5942 = vmatprep.mubr.msk.bf16.mxu0 %vm6228_vm4, %v7836_v18  ;;  %5929 = vmatpush3.bf16.msra.mxu0 %v6159_v17 }
 0x58f   : > { %5930 = vmatprep.subr.bf16.mxu0 %v7836_v18  ;;  %5562 = vmatpush3.bf16.msra.mxu1 %v6167_v40 }
 0x590   : > { %5563 = vmatprep.subr.bf16.mxu1 %v6169_v37 }
 0x592   : > { %5931 = vmatpush3.bf16.msra.mxu0 %v6162_v23 }
 0x593   : > { %5932 = vmatprep.subr.bf16.mxu0 %v7836_v18  ;;  %5564 = vmatpush3.bf16.msra.mxu1 %v6170_v35 }
 0x594   : > { %5565 = vmatprep.subr.bf16.mxu1 %v6172_v15 }
 0x596   : > { %5933 = vmatpush3.bf16.msra.mxu0 %v6165_v22 }
 0x597   : > { %5934 = vmatprep.subr.bf16.mxu0 %v7836_v18  ;;  %5566 = vmatpush3.bf16.msra.mxu1 %v6173_v41 }
 0x598   : > { %5567 = vmatprep.subr.bf16.mxu1 %v6175_v49 }
 0x59a   : > { %5935 = vmatpush3.bf16.msra.mxu0 %v6168_v60 }
 0x59b   : > { %5936 = vmatprep.subr.bf16.mxu0 %v7836_v18  ;;  %5568 = vmatpush3.bf16.msra.mxu1 %v6176_v4 }
 0x59c   : > { %5583 = vmatprep.subr.bf16.mxu1 %v6178_v10 }
 0x59e   : > { %5937 = vmatpush3.bf16.msra.mxu0 %v6171_v55  ;;  %4390 = vmatmul.mubr.bf16.vlgmr.msra.gmra.mrb[116].mxu1 %v4099_v42 }
 0x59f   : > { %5938 = vmatprep.subr.bf16.mxu0 %v7836_v18  ;;  %5584 = vmatpush3.bf16.msra.mxu1 %v6180_v7 }
 0x5a0   : > { %5585 = vmatprep.subr.bf16.mxu1 %v6182_v11 }
 0x5a2   : > { %5939 = vmatpush3.bf16.msra.mxu0 %v6174_v52 }
 0x5a3   : > { %5940 = vmatprep.subr.bf16.mxu0 %v7836_v18  ;;  %5586 = vmatpush3.bf16.msra.mxu1 %v6184_v53 }
 0x5a4   : > { %5587 = vmatprep.subr.bf16.mxu1 %v6186_v20 }
 0x5a6   : > { %5941 = vmatpush3.bf16.msra.mxu0 %v4355_v51 }
 0x5a7   : > { %5605 = vmatprep.subr.bf16.mxu0 %v6179_v54  ;;  %5588 = vmatpush3.bf16.msra.mxu1 %v6188_v5 }
 0x5a8   : > { %5589 = vmatprep.subr.bf16.mxu1 %v6190_v46 }
 0x5a9   : > { %5943 = vmatmul.mubr.msk.bf16.vlgmr.msra.gmra.mrb[112].mxu0 %vm4349_vm13, %v4101_v47 }
 0x5aa   : > { %5606 = vmatpush3.bf16.msra.mxu0 %v6181_v14 }
 0x5ab   : > { %5607 = vmatprep.subr.bf16.mxu0 %v6183_v62  ;;  %5590 = vmatpush3.bf16.msra.mxu1 %v6192_v30 }
 0x5ac   : > { %5591 = vmatprep.subr.bf16.mxu1 %v6194_v16 }
 0x5ae   : > { %5608 = vmatpush3.bf16.msra.mxu0 %v6185_v2 }
 0x5af   : > { %5609 = vmatprep.subr.bf16.mxu0 %v6187_v31  ;;  %5592 = vmatpush3.bf16.msra.mxu1 %v6196_v19 }
 0x5b0   : > { %5593 = vmatprep.subr.bf16.mxu1 %v6198_v24 }
 0x5b2   : > { %5610 = vmatpush3.bf16.msra.mxu0 %v6189_v6 }
 0x5b3   : > { %5611 = vmatprep.subr.bf16.mxu0 %v6191_v28  ;;  %5594 = vmatpush3.bf16.msra.mxu1 %v6200_v48  ;;  %v6230_v28 = vmov 1966171168  }
 0x5b4   : > { %5595 = vmatprep.subr.bf16.mxu1 %v6202_v32  ;;  %v4027_v30 = vunpack.c.l.s4 %v6230_v28 }
 0x5b6   : > { %5612 = vmatpush3.bf16.msra.mxu0 %v6193_v25  ;;  %v4028_v24 = vunpack.c.0.s8 %v4027_v30 }
 0x5b7   : > { %5613 = vmatprep.subr.bf16.mxu0 %v6195_v45  ;;  %5596 = vmatpush3.bf16.msra.mxu1 %v6204_v50 }
 0x5b8   : > { %5597 = vmatprep.subr.bf16.mxu1 %v6206_v34  ;;  %v7764_v32 = vsub.s32 %v4028_v24, %v6592_v9 }
 0x5ba   : > { %5614 = vmatpush3.bf16.msra.mxu0 %v6197_v58 }
 0x5bb   : > { %5615 = vmatprep.subr.bf16.mxu0 %v6199_v26  ;;  %5598 = vmatpush3.bf16.msra.mxu1 %v6208_v12  ;;  %v5195_v26 = vld [vmem:[%s7827_s9 + $0x2] ss:$0 sm:$0xff] }
 0x5bc   : > { %5946 = vmatprep.subr.bf16.mxu1 %v7836_v18 }
 0x5be   : > { %5616 = vmatpush3.bf16.msra.mxu0 %v6201_v27 }
 0x5bf   : > { %5617 = vmatprep.subr.bf16.mxu0 %v6203_v21  ;;  %v7844_v21 = vlaneseq }
 0x5c1   : > { %vm4022_vm14 = vcmp.lt.s32.totalorder %v7844_v21, 128 }
 0x5c2   : > { %5618 = vmatpush3.bf16.msra.mxu0 %v6205_v43 }
 0x5c3   : > { %5619 = vmatprep.subr.bf16.mxu0 %v6207_v3 }
 0x5c6   : > { %5620 = vmatpush3.bf16.msra.mxu0 %v6209_v63 }
 0x5c7   : > { %5952 = vmatprep.subr.bf16.mxu0 %v7836_v18 }
 0x620   : > { %v3405_v17 = vpop.f32.mrb[92].mxu0  ;;  %v3489_v59 = vpop.f32.mrb[100].mxu1 }
 0x621   : > { %v5830_v29 = vpop.f32.mrb[93].mxu0  ;;  %v5842_v23 = vpop.f32.mrb[101].mxu1 }
 0x622   : > { %v3408_v1 = vpop.f32.mrb[94].mxu0  ;;  %v3492_v38 = vpop.f32.mrb[102].mxu1 }
 0x623   : > { %v5831_v22 = vpop.f32.mrb[95].mxu0  ;;  %v5843_v39 = vpop.f32.mrb[103].mxu1 }
 0x630   : > { %v3574_v40 = vpop.f32.mrb[96].mxu0  ;;  %v3658_v60 = vpop.f32.mrb[104].mxu1 }
 0x631   : > { %v5854_v37 = vpop.f32.mrb[97].mxu0  ;;  %v5866_v35 = vpop.f32.mrb[105].mxu1 }
 0x632   : > { %v3577_v55 = vpop.f32.mrb[98].mxu0  ;;  %v3661_v15 = vpop.f32.mrb[106].mxu1 }
 0x633   : > { %v5855_v41 = vpop.f32.mrb[99].mxu0  ;;  %v5867_v49 = vpop.f32.mrb[107].mxu1 }
 0x640   : > { %v3800_v52 = vpop.f32.mrb[108].mxu1  ;;  %v3733_v57 = vpop.f32.mrb[100].mxu0 }
 0x641   : > { %v3801_v4 = vadd.f32 %v3800_v52, %v3405_v17  ;;  %v5890_v44 = vpop.f32.mrb[109].mxu1  ;;  %v5878_v51 = vpop.f32.mrb[101].mxu0 }
 0x642   : > { %v3803_v13 = vpop.f32.mrb[110].mxu1  ;;  %v3736_v61 = vpop.f32.mrb[102].mxu0  ;;  %v6210_v44 = vld [vmem:[%s7825_s7] sm:$0xff]  }
 0x643   : > { %v5891_v42 = vpop.f32.mrb[111].mxu1  ;;  %v5879_v10 = vpop.f32.mrb[103].mxu0 }
 0x650   : > { %v3868_v54 = vpop.f32.mrb[104].mxu0  ;;  %v3935_v47 = vpop.f32.mrb[112].mxu1 }
 0x651   : > { %v3869_v7 = vadd.f32 %v3868_v54, %v3489_v59  ;;  %v3936_v14 = vadd.f32 %v3935_v47, %v3574_v40  ;;  %v5902_v11 = vpop.f32.mrb[105].mxu0  ;;  %v5914_v62 = vpop.f32.mrb[113].mxu1  ;;  %v4072_v59 = vsub.s32 3, %v6592_v9 }
 0x652   : > { %v3871_v53 = vpop.f32.mrb[106].mxu0  ;;  %v3938_v2 = vpop.f32.mrb[114].mxu1 }
 0x653   : > { %v4009_v20 = vadd.f32 %v3869_v7, %v3801_v4  ;;  %v5903_v31 = vpop.f32.mrb[107].mxu0  ;;  %v5915_v5 = vpop.f32.mrb[115].mxu1 }
 0x660   : > { %v4003_v6 = vpop.f32.mrb[108].mxu0 }
 0x661   : > { %v4004_v46 = vadd.f32 %v4003_v6, %v3658_v60  ;;  %v5926_v25 = vpop.f32.mrb[109].mxu0  ;;  %v4715_v6 = vpop.permute.xlu0 %4714 }
 0x662   : > { %v4006_v16 = vpop.f32.mrb[110].mxu0 }
 0x663   : > { %v4010_v45 = vadd.f32 %v4004_v46, %v3936_v14  ;;  %v5927_v19 = vpop.f32.mrb[111].mxu0  ;;  %v4716_v46 = vrot.slane %v4715_v6, 2 }
 0x664   : > { %v4741_v19 = vld [vmem:[%s7827_s9 + $0x4] sm:$0x1] }
 0x665   : > { %v4011_v58 = vadd.f32 %v4010_v45, %v4009_v20  ;;  %v4797_v20 = vrot.slane %v7643_v8, %v4072_v59  ;;  %v6211_v8 = vld [vmem:[%s7826_s8] sm:$0xff]  }
 0x667   : > { %v4012_v48 = vadd.f32 %v4011_v58, %v3733_v57 }
 0x669   : > { %v4018_v27 = vadd.f32 %v5195_v26, %v4012_v48 }
 0x66b   : > { %v4019_v50 = vmax.f32 %v4018_v27, 0.0 }
 0x66d   : > { %4024 = vst.msk [vmem:[#allocation2] sm:$0x1] %vm4022_vm14, %v4019_v50  ;;  %v4032_v43 = vrot.slane %v4019_v50, %v7764_v32  ;;  %v6212_v50 = vld [vmem:[%s7826_s8 + $0x8] sm:$0xff]  }
 0x66f   : > { %v4033_v34 = vcombine.high %v4032_v43, %v4032_v43  ;;  %v4040_v3 = vrot.slane %v4032_v43, %v7764_v32 }
 0x671   : > { %v4047_v12 = vrot.slane %v4033_v34, %v7764_v32  ;;  %v4050_v63 = vcombine.high %v4040_v3, %v4040_v3 }
 0x673   : > { %4049 = vst.msk [vmem:[#allocation2 + $0x1] sm:$0x1] %vm4022_vm14, %v4047_v12  ;;  %4052 = vst.msk [vmem:[#allocation2 + $0x2] sm:$0x1] %vm4022_vm14, %v4050_v63  ;;  %v4053_v17 = vcombine.high %v4047_v12, %v4047_v12 }
 0x675   : > { %4055 = vst.msk [vmem:[#allocation2 + $0x3] sm:$0x1] %vm4022_vm14, %v4053_v17 }
 0x67c   : > { %v4056_v29 = vld [vmem:[#allocation2] sm:$0xf] }
 0x67d   : > { %v4065_v23 = vrot.slane %v4056_v29, %v4064_v56  ;;  %v4073_v1 = vrot.slane %v4056_v29, %v4072_v59  ;;  %v4061_v38 = vrot.slane %v4056_v29, %v4060_v0  ;;  %v4069_v22 = vrot.slane %v4056_v29, %v4068_v33  ;;  %v5569_v56 = vpop.f32.mrb[116].mxu1  ;;  %v4431_v33 = vpop.f32.mrb[112].mxu0 }
 0x67e   : > { %v5570_v0 = vpop.f32.mrb[117].mxu1  ;;  %v5944_v41 = vpop.f32.mrb[113].mxu0 }
 0x67f   : > { %v4079_v39 = vpack.c.bf16 %v4065_v23, %v4065_v23  ;;  %v4081_v40 = vpack.c.bf16 %v4073_v1, %v4073_v1  ;;  %v4078_v60 = vpack.c.bf16 %v4061_v38, %v4061_v38  ;;  %v4080_v37 = vpack.c.bf16 %v4069_v22, %v4069_v22  ;;  %v5572_v9 = vpop.f32.mrb[118].mxu1  ;;  %v4434_v49 = vpop.f32.mrb[114].mxu0 }
 0x680   : > { %v5571_v35 = vadd.f32 %v5570_v0, %v5569_v56  ;;  %v5573_v55 = vpop.f32.mrb[119].mxu1  ;;  %v5945_v52 = vpop.f32.mrb[115].mxu0 }
 0x681   : > { %4661 = vmatprep.mubr.bf16.mxu1 %v4079_v39  ;;  %4701 = vmatprep.mubr.bf16.mxu0 %v4081_v40 }
 0x682   : > { %4662 = vmatmul.mubr.bf16.vlgmr.msra.gmra.mrb[120].mxu1 %v4078_v60  ;;  %4702 = vmatmul.mubr.bf16.vlgmr.msra.gmra.mrb[116].mxu0 %v4080_v37  ;;  %v4432_v15 = vadd.f32 %v5571_v35, %v4431_v33 }
 0x683   : > { %5948 = vmatprep.mubr.msk.bf16.mxu1 %vm6228_vm4, %v7836_v18  ;;  %5956 = vmatprep.mubr.msk.bf16.mxu0 %vm6228_vm4, %v7836_v18 }
 0x684   : > { %5947 = vmatpush3.bf16.msra.mxu1 %v6210_v44  ;;  %5953 = vmatpush3.bf16.msra.mxu0 %v6211_v8 }
 0x685   : > { %5954 = vmatprep.subr.bf16.mxu0 %v7836_v18  ;;  %v4799_v18 = vpop.permute.xlu0 %4798 }
 0x688   : > { %5955 = vmatpush3.bf16.msra.mxu0 %v6212_v50 }
 0x755   : > { %v5599_v57 = vpop.f32.mrb[120].mxu1  ;;  %v5621_v4 = vpop.f32.mrb[116].mxu0 }
 0x756   : > { %v5600_v51 = vpop.f32.mrb[121].mxu1  ;;  %v5622_v13 = vpop.f32.mrb[117].mxu0 }
 0x757   : > { %v5601_v61 = vadd.f32 %v5600_v51, %v5599_v57  ;;  %v5623_v42 = vadd.f32 %v5622_v13, %v5621_v4  ;;  %v5602_v10 = vpop.f32.mrb[122].mxu1  ;;  %v5624_v54 = vpop.f32.mrb[118].mxu0 }
 0x758   : > { %v5603_v47 = vpop.f32.mrb[123].mxu1  ;;  %v5625_v7 = vpop.f32.mrb[119].mxu0 }
 0x759   : > { %v4664_v14 = vadd.f32 %v5601_v61, %v4432_v15 }
 0x75b   : > { %v4704_v11 = vadd.f32 %v5623_v42, %v4664_v14 }
 0x75d   : > { %v4710_v62 = vadd.f32 %v4709_v36, %v4704_v11 }
 0x75f   : > { %4876 = vst.msk [vmem:[%s7785_s15] sm:$0x1] %vm4875_vm15, %v4710_v62  ;;  %v4726_v53 = vrot.slane %v4710_v62, %v7764_v32  ;;  %v4711_v31 = vmul.f32 0.5, %v4710_v62 }
 0x761   : > { %v4733_v2 = vrot.slane %v4726_v53, %v7764_v32  ;;  %v4712_v5 = vmul.f32 1.442695, %v4711_v31 }
 0x763   : > { %4734 = vrot.lane.b32.xlu1 %v4733_v2, %s6232_s20  ;;  %6213 = vpow2.f32 %v4712_v5 }
 0x767   : > { %4800 = vrot.lane.b32.xlu1 %v4797_v20, %s6231_s16 }
 0x76b   : > { %4828 = vrot.lane.b32.xlu1 %v4710_v62, %s6233_s21 }
 0x76d   : > { %v6214_v28 = vpop.eup %6213 }
 0x76e   : > { %v4718_v30 = vmul.f32 %v6214_v28, %v4716_v46 }
 0x7d5   : > { %v4735_v25 = vpop.permute.xlu1 %4734 }
 0x7d6   : > { %v4737_v16 = vadd.f32 %v4735_v25, %v4718_v30 }
 0x7d8   : > { %v4738_v45 = vpack.c.bf16 %v4737_v16, %v4737_v16 }
 0x7d9   : > { %v4801_v43 = vpop.permute.xlu1 %4800 }
 0x7da   : > { %5949 = vmatmul.mubr.msk.bf16.vlgmr.msra.gmra.mrb[124].mxu1 %vm3256_vm7, %v4738_v45  ;;  %v4803_v34 = vsel %vm4802_vm1, %v4799_v18, %v4801_v43 }
 0x7dd   : > { %v4829_v29 = vpop.permute.xlu1 %4828 }
 0x8ad   : > { %v4785_v58 = vpop.f32.mrb[124].mxu1 }
 0x8ae   : > { %v4786_v24 = vadd.f32 %v4785_v58, %v4741_v19  ;;  %v5950_v26 = vpop.f32.mrb[125].mxu1 }
 0x8af   : > { %v4788_v48 = vpop.f32.mrb[126].mxu1 }
 0x8b0   : > { %v4791_v27 = vmul.f32 0.5, %v4786_v24  ;;  %4878 = vst.msk [vmem:[%s7785_s15 + $0x1] sm:$0x1] %vm4877_vm0, %v4786_v24  ;;  %v5951_v32 = vpop.f32.mrb[127].mxu1 }
 0x8b2   : > { %v4792_v21 = vmul.f32 1.442695, %v4791_v27 }
 0x8b4   : > { %6215 = vpow2.f32 %v4792_v21 }
 0x8be   : > { %v6216_v3 = vpop.eup %6215 }
 0x8bf   : > { %v4805_v12 = vmul.f32 %v6216_v3, %v4803_v34 }
 0x8c1   : > { %4807 = vrot.lane.b32.xlu0 %v4805_v12, %s6225_s24 }
 0x933   : > { %v4808_v63 = vpop.permute.xlu0 %4807 }
 0x934   : > { %v4810_v17 = vadd.f32 %v4808_v63, %v4786_v24 }
 0x936   : > { %v4811_v59 = vpack.c.bf16 %v4810_v17, %v4810_v17 }
 0x938   : > { %5957 = vmatmul.mubr.msk.bf16.vlgmr.msra.gmra.mrb[120].mxu0 %vm2213_vm2, %v4811_v59 }
 0xa0b   : > { %v4868_v23 = vpop.f32.mrb[120].mxu0 }
 0xa0c   : > { %v4869_v1 = vadd.f32 %v4868_v23, %v4829_v29  ;;  %v5958_v38 = vpop.f32.mrb[121].mxu0 }
 0xa0d   : > { %v4871_v22 = vpop.f32.mrb[122].mxu0 }
 0xa0e   : > { %4880 = vst.msk [vmem:[%s7785_s15 + $0x2] sm:$0x1] %vm4879_vm3, %v4869_v1  ;;  %v5959_v39 = vpop.f32.mrb[123].mxu0 }
 0xa0f PF: > { %s20_s13 = sadd.s32 1, %s6223_s13  }
 0xa10   : > { %p17_p4 = scmp.ge.s32.totalorder %s20_s13, 6  }
 0xa12   :  { %19 = sbr.rel (!%p17_p4) target bundleno = 1 (0x1), region = 93 }

// kernel: squeeze.5
= control target key start
LH: loop header
LB: loop body
LE: loop exit
PB: predicated region body
PF: predicated region fallthrough
CT: control target
= control target key end

     0   :  { %s104_s0 = inlined_call_operand.vmem [shape: f32[4,8], index: 0, kind: input, shape index: {}]   ;;  %s105_s1 = inlined_call_operand.hbm [shape: f32[4,2,4], index: 1, kind: output, shape index: {}]  }
   0x1   :  { %v5_v0 = vld [vmem:[%s104_s0] sm:$0xf] }
   0x2   :  { %2 = vsyncpa [#allocation1], 0  ;;  %6 = vst [vmem:[#allocation3] sm:$0xf] %v5_v0  ;;  %vm8_vm0 = vcmask 31744   ;;  %s77_s0 = smov 124  }
   0x3   :  { %s78_s8 = smov [#allocation0]  }
   0x4   :  { %s43_s9 = sshll.u32 %s78_s8, 4  ;;  %s44_s9 = int_to_ptr.vmem [resolvable:$true] %s43_s9 }
   0x5   :  { %s53_s10 = scalar_lea.vmem %s44_s9, 128  ;;  %p58_p1 = scmp.lt.s32.totalorder %s44_s9, %s44_s9 }
   0x6   :  { %p54_p0 = scmp.ne.s32.totalorder %s44_s9, %s53_s10  ;;  %p59_p2 = scmp.lt.s32.totalorder %s53_s10, %s53_s10 }
   0x8   :  { %p60_p3 = por %p59_p2, %p58_p1 }
   0x9   :  { %v10_v1 = vld [vmem:[#allocation3] sm:$0xf]  }
   0xa   :  { %v7_v2 = vld [vmem:[#allocation3] sm:$0xf]   ;;  %11 = vrot.lane.b32.xlu0 %v10_v1, %s77_s0  ;;  %p61_p4 = pnand %p60_p3, %p54_p0 }
   0xb   :  { %9 = vst.msk [vmem:[#allocation2] ss:$8 sm:$0xf] %vm8_vm0, %v7_v2  }
  0x7c   :  { %v12_v3 = vpop.permute.xlu0 %11  }
  0x7d   :  { %15 = vst.msk [vmem:[#allocation2 + $0x1] ss:$8 sm:$0xf] %vm8_vm0, %v12_v3  }
  0x84   :  { %v19_v4 = vld [vmem:[#allocation2] sm:$0x3]  ;;  %v23_v5 = vld [vmem:[#allocation2 + $0x8] sm:$0x3]  ;;  %v28_v6 = vld [vmem:[#allocation2 + $0x10] sm:$0x3] }
  0x85   :  { %21 = vst [vmem:[#allocation0] sm:$0x3] %v19_v4  ;;  %26 = vst [vmem:[#allocation0 + $0x2] sm:$0x3] %v23_v5  ;;  %v34_v7 = vld [vmem:[#allocation2 + $0x18] sm:$0x3] }
  0x86   :  { %32 = vst [vmem:[#allocation0 + $0x4] sm:$0x3] %v28_v6  ;;  %38 = vst [vmem:[#allocation0 + $0x6] sm:$0x3] %v34_v7 }
  0x87   :  { %64 = shalt.err (!%p61_p4)
}
  0x88   :  { %s65_s13 = scalar_lea.hbm %s105_s1, 128 }
  0x89   :  { %p66_p5 = scmp.ne.s32.totalorder %s105_s1, %s65_s13  ;;  %p69_p6 = scmp.lt.u32.totalorder %s65_s13, %s105_s1 }
  0x8b   :  { %p71_p7 = pnand %p69_p6, %p66_p5 }
  0x8d   :  { %74 = shalt.err (!%p71_p7)
}
  0x8e   :  { %46 = dma.vmem_to_hbm [thread:$0]  %s44_s9, 128, %s105_s1, [#allocation1]  }
  0x8f   :  { %75 = dma.done.wait [#allocation1], 128  }
  0x90   :  { %76 = vsyncadd [#allocation1], 4294967168 }
  0x91   :  { %48 = vsyncpa [#allocation1], 1 }

</bundles_post_ra>
